<compile_context>
chip_gen: v6e
topology: v6e:2x2x1
jax: 0.10.0
libtpu: 0.0.40
codegen_flags: <defaults>
</compile_context>

<pallas_src>
import math
import numpy as np
import jax
import jax.numpy as jnp
from jax.experimental import pallas as pl
from jax.experimental.pallas import tpu as pltpu

jax.config.update("jax_default_matmul_precision", "highest")

# ---------------- small model config ----------------
DIM = 32
N_LAYERS = 2
N_HEADS = 4
N_KV_HEADS = 2
VOCAB = 64
MULTIPLE_OF = 16
NORM_EPS = 1e-5
MAX_SEQ = 16
BATCH = 2

HEAD_DIM = DIM // N_HEADS              # 8
N_REP = N_HEADS // N_KV_HEADS          # 2
Q_DIM = N_HEADS * HEAD_DIM             # 32
KV_DIM = N_KV_HEADS * HEAD_DIM         # 16
QKV_DIM = Q_DIM + 2 * KV_DIM           # 64
K_OFF = Q_DIM                          # 32
V_OFF = Q_DIM + KV_DIM                 # 48
_h = int(2 * (4 * DIM) / 3)
FFN_HIDDEN = MULTIPLE_OF * ((_h + MULTIPLE_OF - 1) // MULTIPLE_OF)  # 96

_HI = jax.lax.Precision.HIGHEST


# ---------------- the fused decode-step kernel ----------------
def _decode_step_kernel(start_ref, h0_ref, cos_ref, sin_ref,
                        anorm_ref, wbig_ref, wo_ref, fnorm_ref, w1_ref, w2_ref,
                        onorm_ref, wout_ref, ck_in_ref, cv_in_ref,
                        logits_ref, ck_out_ref, cv_out_ref,
                        h_scr, attn_scr):
    layer = pl.program_id(0)
    start = start_ref[0]

    # hidden state carried across the layer grid axis in VMEM scratch
    @pl.when(layer == 0)
    def _():
        h_scr[...] = h0_ref[...]

    x = h_scr[...]                                                          # (B, D)

    # attention RMSNorm (reference quirk: multiply by sqrt, not rsqrt)
    xn = anorm_ref[0] * (x * jnp.sqrt(jnp.mean(x * x, axis=-1, keepdims=True) + NORM_EPS))

    # fused QKV projection + RoPE rotation companion: one lane-dense (D, 128) matmul.
    # wbig = [Wq | Wk | Wv | rot(Wq) | rot(Wk) | 0]; RoPE = base*cos + rot*sin.
    big = jnp.dot(xn, wbig_ref[0], preferred_element_type=jnp.float32, precision=_HI)   # (B, 2*QKV)
    qkv = big[:, :QKV_DIM] * cos_ref[...] + big[:, QKV_DIM:] * sin_ref[...]             # (B, QKV)

    inv_sqrt_dh = 1.0 / math.sqrt(HEAD_DIM)
    # GQA attention without repeat_kv: each kv head slab serves N_REP query heads.
    # (Unrolled tiny 2-D dots: avoids in-kernel relayouts at these toy sizes; see scaling notes.)
    for b in range(BATCH):
        for g in range(N_KV_HEADS):
            row = b * N_KV_HEADS + g
            k_new = qkv[b:b + 1, K_OFF + g * HEAD_DIM:K_OFF + (g + 1) * HEAD_DIM]       # (1, Dh)
            v_new = qkv[b:b + 1, V_OFF + g * HEAD_DIM:V_OFF + (g + 1) * HEAD_DIM]       # (1, Dh)
            s_iota = jax.lax.broadcasted_iota(jnp.int32, (MAX_SEQ, HEAD_DIM), 0)
            # in-kernel single-token cache update (cache aliased input -> output)
            k_cache = jnp.where(s_iota == start, k_new, ck_in_ref[0, row])              # (S, Dh)
            v_cache = jnp.where(s_iota == start, v_new, cv_in_ref[0, row])
            ck_out_ref[0, row] = k_cache
            cv_out_ref[0, row] = v_cache
            for r in range(N_REP):
                hq = g * N_REP + r
                q_h = qkv[b:b + 1, hq * HEAD_DIM:(hq + 1) * HEAD_DIM]                   # (1, Dh)
                scores = jax.lax.dot_general(
                    q_h, k_cache, (((1,), (1,)), ((), ())),
                    preferred_element_type=jnp.float32, precision=_HI) * inv_sqrt_dh     # (1, S)
                pos = jax.lax.broadcasted_iota(jnp.int32, (1, MAX_SEQ), 1)
                scores = jnp.where(pos <= start, scores, -1e30)       # attend to cache[0:start+1]
                m = jnp.max(scores, axis=-1, keepdims=True)
                p = jnp.exp(scores - m)
                p = p / jnp.sum(p, axis=-1, keepdims=True)
                attn = jnp.dot(p, v_cache, preferred_element_type=jnp.float32,
                               precision=_HI)                                            # (1, Dh)
                attn_scr[b:b + 1, hq * HEAD_DIM:(hq + 1) * HEAD_DIM] = attn

    # single Wo matmul over all heads
    attn_out = jnp.dot(attn_scr[...], wo_ref[0], preferred_element_type=jnp.float32,
                       precision=_HI)                                                    # (B, D)
    h1 = x + attn_out

    # FFN (reference quirks: sqrt-RMSNorm; silu(w1(x)) * w1(x); w3 unused)
    hn = fnorm_ref[0] * (h1 * jnp.sqrt(jnp.mean(h1 * h1, axis=-1, keepdims=True) + NORM_EPS))
    t = jnp.dot(hn, w1_ref[0], preferred_element_type=jnp.float32, precision=_HI)        # (B, F)
    h2 = h1 + jnp.dot((t * jax.nn.sigmoid(t)) * t, w2_ref[0],
                      preferred_element_type=jnp.float32, precision=_HI)
    h_scr[...] = h2

    # fused final RMSNorm + vocab projection at the last layer
    @pl.when(layer == N_LAYERS - 1)
    def _():
        hn_f = onorm_ref[...] * (h2 * jnp.sqrt(jnp.mean(h2 * h2, axis=-1, keepdims=True) + NORM_EPS))
        logits_ref[...] = jnp.dot(hn_f, wout_ref[...],
                                  preferred_element_type=jnp.float32, precision=_HI)


# ---------------- host glue (RoPE tables, embedding gather, pallas_call) ----------------
def _rope_base(start_pos):
    j = jnp.arange(0, HEAD_DIM, 2, dtype=jnp.float32)
    theta = 1.0 / (10000.0 ** (j / HEAD_DIM))
    freqs = jnp.asarray(start_pos, jnp.float32) * theta
    return jnp.cos(freqs), jnp.sin(freqs)


def _rope_vectors(start_pos):
    cos, sin = _rope_base(start_pos)
    cos_h = jnp.repeat(cos, 2)                       # interleaved-pair layout
    sin_h = jnp.repeat(sin, 2)
    cos_vec = jnp.concatenate([jnp.tile(cos_h, N_HEADS), jnp.tile(cos_h, N_KV_HEADS),
                               jnp.ones((KV_DIM,), jnp.float32)])
    sin_vec = jnp.concatenate([jnp.tile(sin_h, N_HEADS), jnp.tile(sin_h, N_KV_HEADS),
                               jnp.zeros((KV_DIM,), jnp.float32)])
    return cos_vec[None, :], sin_vec[None, :]


@jax.jit
def decode_step_pallas(sp, tokens, start_pos, cache_k, cache_v):
    B = tokens.shape[0]
    h0 = jnp.take(sp["emb"], tokens[:, 0], axis=0)            # (B, D) embedding gather (glue)
    cos_vec, sin_vec = _rope_vectors(start_pos)
    start_arr = jnp.reshape(jnp.asarray(start_pos, jnp.int32), (1,))

    kv_shape = (N_LAYERS, B * N_KV_HEADS, MAX_SEQ, HEAD_DIM)
    kv_spec = pl.BlockSpec((1, B * N_KV_HEADS, MAX_SEQ, HEAD_DIM), lambda l: (l, 0, 0, 0))
    out_shapes = (jax.ShapeDtypeStruct((B, VOCAB), jnp.float32),
                  jax.ShapeDtypeStruct(kv_shape, jnp.float32),
                  jax.ShapeDtypeStruct(kv_shape, jnp.float32))

    logits, ck, cv = pl.pallas_call(
        _decode_step_kernel,
        grid=(N_LAYERS,),
        in_specs=[
            pl.BlockSpec(memory_space=pltpu.MemorySpace.SMEM),             # start_pos scalar
            pl.BlockSpec((B, DIM), lambda l: (0, 0)),                      # token embeddings
            pl.BlockSpec((1, QKV_DIM), lambda l: (0, 0)),                  # RoPE cos
            pl.BlockSpec((1, QKV_DIM), lambda l: (0, 0)),                  # RoPE sin
            pl.BlockSpec((1, 1, DIM), lambda l: (l, 0, 0)),                # attn norm (per layer)
            pl.BlockSpec((1, DIM, 2 * QKV_DIM), lambda l: (l, 0, 0)),      # fused qkv(+rot) weight
            pl.BlockSpec((1, Q_DIM, DIM), lambda l: (l, 0, 0)),            # wo
            pl.BlockSpec((1, 1, DIM), lambda l: (l, 0, 0)),                # ffn norm
            pl.BlockSpec((1, DIM, FFN_HIDDEN), lambda l: (l, 0, 0)),       # w1
            pl.BlockSpec((1, FFN_HIDDEN, DIM), lambda l: (l, 0, 0)),       # w2
            pl.BlockSpec((1, DIM), lambda l: (0, 0)),                      # final norm
            pl.BlockSpec((DIM, VOCAB), lambda l: (0, 0)),                  # output projection
            kv_spec,                                                       # cache_k (aliased)
            kv_spec,                                                       # cache_v (aliased)
        ],
        out_specs=(pl.BlockSpec((B, VOCAB), lambda l: (0, 0)), kv_spec, kv_spec),
        out_shape=out_shapes,
        scratch_shapes=[pltpu.VMEM((B, DIM), jnp.float32),                 # hidden-state carry
                        pltpu.VMEM((B, Q_DIM), jnp.float32)],              # per-layer attn output
        input_output_aliases={12: 1, 13: 2},
        compiler_params=pltpu.CompilerParams(dimension_semantics=("arbitrary",)),
    )(start_arr, h0, cos_vec, sin_vec,
      sp["attn_norm"], sp["wbig"], sp["wo"], sp["ffn_norm"], sp["w1"], sp["w2"],
      sp["final_norm"], sp["w_out"], cache_k, cache_v)
    return logits.reshape(B, 1, VOCAB), ck, cv


# ---------------- parameter setup ----------------
def _rot_cols(w):
    """RoPE 'rotation companion' of a projection weight: per interleaved pair of output
    columns (a, b) -> (-b, a).  Exact signed column permutation (no matmul, no rounding)."""
    wp = w.reshape(w.shape[0], -1, 2)
    return jnp.stack([-wp[..., 1], wp[..., 0]], axis=-1).reshape(w.shape)


def init_params(key):
    def dense(k, fan_in, fan_out):
        return jax.random.normal(k, (fan_in, fan_out), jnp.float32) / np.sqrt(fan_in)

    keys = jax.random.split(key, 3 + N_LAYERS)
    params = {
        "emb": jax.random.normal(keys[0], (VOCAB, DIM), jnp.float32),
        "w_out": dense(keys[1], DIM, VOCAB),
        "final_norm": jnp.ones((1, DIM), jnp.float32) + 0.05 * jax.random.normal(keys[2], (1, DIM), jnp.float32),
        "layers": [],
    }
    for l in range(N_LAYERS):
        lk = jax.random.split(keys[3 + l], 9)
        params["layers"].append({
            "attn_norm": jnp.ones((1, DIM), jnp.float32) + 0.05 * jax.random.normal(lk[0], (1, DIM), jnp.float32),
            "ffn_norm": jnp.ones((1, DIM), jnp.float32) + 0.05 * jax.random.normal(lk[1], (1, DIM), jnp.float32),
            "wq": dense(lk[2], DIM, N_HEADS * HEAD_DIM),
            "wk": dense(lk[3], DIM, N_KV_HEADS * HEAD_DIM),
            "wv": dense(lk[4], DIM, N_KV_HEADS * HEAD_DIM),
            "wo": dense(lk[5], N_HEADS * HEAD_DIM, DIM),
            "w1": dense(lk[6], DIM, FFN_HIDDEN),
            "w2": dense(lk[7], FFN_HIDDEN, DIM),
            # w3 exists in FeedForward.__init__ but the reference forward never uses it.
            "w3": dense(lk[8], DIM, FFN_HIDDEN),
        })
    return params


def build_stacked(params):
    layers = params["layers"]

    def stack(name):
        return jnp.stack([lp[name] for lp in layers])

    wbig = []
    for lp in layers:
        w_qkv = jnp.concatenate([lp["wq"], lp["wk"], lp["wv"]], axis=1)                 # (D, 64)
        w_rot = jnp.concatenate([_rot_cols(lp["wq"]), _rot_cols(lp["wk"]),
                                 jnp.zeros((DIM, KV_DIM), jnp.float32)], axis=1)        # (D, 64)
        wbig.append(jnp.concatenate([w_qkv, w_rot], axis=1))                            # (D, 128)
    return {
        "emb": params["emb"],
        "w_out": params["w_out"],
        "final_norm": params["final_norm"],
        "attn_norm": stack("attn_norm"),
        "ffn_norm": stack("ffn_norm"),
        "wbig": jnp.stack(wbig),
        "wo": stack("wo"),
        "w1": stack("w1"),
        "w2": stack("w2"),
    }


# ---------------- plain-JAX reference (mirrors the PyTorch module exactly) ----------------
def _rmsnorm_ref(x, w):
    return w * (x * jnp.sqrt(jnp.mean(x * x, axis=-1, keepdims=True) + NORM_EPS))


def _rope_ref(x, cos, sin):
    xr = x.reshape(x.shape[:-1] + (HEAD_DIM // 2, 2))
    a, b = xr[..., 0], xr[..., 1]
    oa = a * cos - b * sin
    ob = a * sin + b * cos
    return jnp.stack([oa, ob], axis=-1).reshape(x.shape)


def transformer_forward_ref(params, tokens, start_pos, cache_k, cache_v):
    B = tokens.shape[0]
    h = jnp.take(params["emb"], tokens, axis=0)
    cos, sin = _rope_base(start_pos)
    new_ck, new_cv = [], []
    for l in range(N_LAYERS):
        lp = params["layers"][l]
        xn = _rmsnorm_ref(h, lp["attn_norm"])
        xq = (xn @ lp["wq"]).reshape(B, 1, N_HEADS, HEAD_DIM)
        xk = (xn @ lp["wk"]).reshape(B, 1, N_KV_HEADS, HEAD_DIM)
        xv = (xn @ lp["wv"]).reshape(B, 1, N_KV_HEADS, HEAD_DIM)
        xq = _rope_ref(xq, cos, sin)
        xk = _rope_ref(xk, cos, sin)
        ck = cache_k[l].at[:, start_pos].set(xk[:, 0])
        cv = cache_v[l].at[:, start_pos].set(xv[:, 0])
        keys = jnp.repeat(ck[:, :start_pos + 1], N_REP, axis=2).transpose(0, 2, 1, 3)
        vals = jnp.repeat(cv[:, :start_pos + 1], N_REP, axis=2).transpose(0, 2, 1, 3)
        q = xq.transpose(0, 2, 1, 3)
        scores = jnp.einsum("bhqd,bhkd->bhqk", q, keys) / math.sqrt(HEAD_DIM)
        p = jax.nn.softmax(scores, axis=-1)
        out = jnp.einsum("bhqk,bhkd->bhqd", p, vals)
        out = out.transpose(0, 2, 1, 3).reshape(B, 1, N_HEADS * HEAD_DIM)
        h = h + out @ lp["wo"]
        hn = _rmsnorm_ref(h, lp["ffn_norm"])
        t = hn @ lp["w1"]
        h = h + (t * jax.nn.sigmoid(t) * t) @ lp["w2"]
        new_ck.append(ck)
        new_cv.append(cv)
    hn = _rmsnorm_ref(h, params["final_norm"])
    logits = hn @ params["w_out"]
    return logits, jnp.stack(new_ck), jnp.stack(new_cv)


# ---------------- main ----------------
if __name__ == "__main__":
    key = jax.random.PRNGKey(0)
    pkey, tkey = jax.random.split(key)
    params = init_params(pkey)
    stacked = build_stacked(params)

    # kernel cache layout: (n_layers, batch*kv_head, max_seq, head_dim)
    # (a transposition/reshape of the PyTorch module's (batch, seq, kv_head, head_dim) state)
    cache_k_kern = jnp.zeros((N_LAYERS, BATCH * N_KV_HEADS, MAX_SEQ, HEAD_DIM), jnp.float32)
    cache_v_kern = jnp.zeros_like(cache_k_kern)
    cache_k_ref = jnp.zeros((N_LAYERS, BATCH, MAX_SEQ, N_KV_HEADS, HEAD_DIM), jnp.float32)
    cache_v_ref = jnp.zeros_like(cache_k_ref)

    n_steps = 4
    tok_keys = jax.random.split(tkey, n_steps)
    for step in range(n_steps):
        tokens = jax.random.randint(tok_keys[step], (BATCH, 1), 0, VOCAB, dtype=jnp.int32)
        logits, cache_k_kern, cache_v_kern = decode_step_pallas(
            stacked, tokens, step, cache_k_kern, cache_v_kern)
        logits = jax.block_until_ready(logits)
        logits_ref, cache_k_ref, cache_v_ref = transformer_forward_ref(
            params, tokens, step, cache_k_ref, cache_v_ref)

        lk = np.asarray(logits)
        lr = np.asarray(logits_ref)
        if not np.allclose(lk, lr, atol=1e-3, rtol=1e-3):
            err = float(np.max(np.abs(lk - lr)))
            raise AssertionError(f"Pallas/reference logits mismatch at step {step}: max abs err {err}")

        ck_t = np.asarray(cache_k_kern).reshape(
            N_LAYERS, BATCH, N_KV_HEADS, MAX_SEQ, HEAD_DIM).transpose(0, 1, 3, 2, 4)
        cv_t = np.asarray(cache_v_kern).reshape(
            N_LAYERS, BATCH, N_KV_HEADS, MAX_SEQ, HEAD_DIM).transpose(0, 1, 3, 2, 4)
        if not np.allclose(ck_t, np.asarray(cache_k_ref), atol=1e-3, rtol=1e-3):
            raise AssertionError(f"Pallas/reference K-cache mismatch at step {step}")
        if not np.allclose(cv_t, np.asarray(cache_v_ref), atol=1e-3, rtol=1e-3):
            raise AssertionError(f"Pallas/reference V-cache mismatch at step {step}")

    print("KERNEL_OK")
</pallas_src>

<mosaic_0001>
module attributes {stable_mosaic.version = 11 : i64} {
  func.func @_decode_step_kernel(%arg0: i32, %arg1: memref<1xi32, #tpu.memory_space<smem>>, %arg2: memref<2x32xf32, #tpu.memory_space<vmem>>, %arg3: memref<1x64xf32, #tpu.memory_space<vmem>>, %arg4: memref<1x64xf32, #tpu.memory_space<vmem>>, %arg5: memref<1x1x32xf32, #tpu.memory_space<vmem>>, %arg6: memref<1x32x128xf32, #tpu.memory_space<vmem>>, %arg7: memref<1x32x32xf32, #tpu.memory_space<vmem>>, %arg8: memref<1x1x32xf32, #tpu.memory_space<vmem>>, %arg9: memref<1x32x96xf32, #tpu.memory_space<vmem>>, %arg10: memref<1x96x32xf32, #tpu.memory_space<vmem>>, %arg11: memref<1x32xf32, #tpu.memory_space<vmem>>, %arg12: memref<32x64xf32, #tpu.memory_space<vmem>>, %arg13: memref<1x4x16x8xf32, #tpu.memory_space<vmem>>, %arg14: memref<1x4x16x8xf32, #tpu.memory_space<vmem>>, %arg15: memref<2x64xf32, #tpu.memory_space<vmem>>, %arg16: memref<1x4x16x8xf32, #tpu.memory_space<vmem>>, %arg17: memref<1x4x16x8xf32, #tpu.memory_space<vmem>>, %arg18: memref<2x32xf32, #tpu.memory_space<vmem>>, %arg19: memref<2x32xf32, #tpu.memory_space<vmem>>) attributes {dimension_semantics = [#tpu.dimension_semantics<arbitrary>], iteration_bounds = array<i64: 2>, scalar_prefetch = 0 : i64, scratch_operands = 2 : i64, tpu.core_type = #tpu.core_type<tc>, window_params = [{transform_indices = @transform_0, window_bounds = array<i64: 1>}, {pipeline_mode = #tpu.pipeline_mode<synchronous>, transform_indices = @transform_1, window_bounds = array<i64: 2, 32>}, {pipeline_mode = #tpu.pipeline_mode<synchronous>, transform_indices = @transform_2, window_bounds = array<i64: 1, 64>}, {pipeline_mode = #tpu.pipeline_mode<synchronous>, transform_indices = @transform_3, window_bounds = array<i64: 1, 64>}, {transform_indices = @transform_4, window_bounds = array<i64: 1, 1, 32>}, {transform_indices = @transform_5, window_bounds = array<i64: 1, 32, 128>}, {transform_indices = @transform_6, window_bounds = array<i64: 1, 32, 32>}, {transform_indices = @transform_7, window_bounds = array<i64: 1, 1, 32>}, {transform_indices = @transform_8, window_bounds = array<i64: 1, 32, 96>}, {transform_indices = @transform_9, window_bounds = array<i64: 1, 96, 32>}, {pipeline_mode = #tpu.pipeline_mode<synchronous>, transform_indices = @transform_10, window_bounds = array<i64: 1, 32>}, {pipeline_mode = #tpu.pipeline_mode<synchronous>, transform_indices = @transform_11, window_bounds = array<i64: 32, 64>}, {transform_indices = @transform_12, window_bounds = array<i64: 1, 4, 16, 8>}, {transform_indices = @transform_13, window_bounds = array<i64: 1, 4, 16, 8>}, {pipeline_mode = #tpu.pipeline_mode<synchronous>, transform_indices = @transform_14, window_bounds = array<i64: 2, 64>}, {transform_indices = @transform_15, window_bounds = array<i64: 1, 4, 16, 8>}, {transform_indices = @transform_16, window_bounds = array<i64: 1, 4, 16, 8>}]} {
    %c0 = arith.constant 0 : index
    %0 = memref.load %arg1[%c0] : memref<1xi32, #tpu.memory_space<smem>>
    %c0_i32 = arith.constant 0 : i32
    %1 = arith.cmpi eq, %arg0, %c0_i32 : i32
    %2 = arith.extui %1 : i1 to i32
    %c0_i32_0 = arith.constant 0 : i32
    %3 = arith.cmpi ne, %2, %c0_i32_0 : i32
    scf.if %3 {
      %c0_162 = arith.constant 0 : index
      %c0_163 = arith.constant 0 : index
      %320 = vector.load %arg2[%c0_162, %c0_163] : memref<2x32xf32, #tpu.memory_space<vmem>>, vector<2x32xf32>
      %c0_164 = arith.constant 0 : index
      %c0_165 = arith.constant 0 : index
      %321 = vector.load %arg18[%c0_164, %c0_165] : memref<2x32xf32, #tpu.memory_space<vmem>>, vector<2x32xf32>
      tpu.vector_store %arg18[%c0_164, %c0_165], %320 {strides = array<i32>} : memref<2x32xf32, #tpu.memory_space<vmem>>, vector<2x32xf32>,
    } else {
    }
    %c0_1 = arith.constant 0 : index
    %c0_2 = arith.constant 0 : index
    %4 = vector.load %arg18[%c0_1, %c0_2] : memref<2x32xf32, #tpu.memory_space<vmem>>, vector<2x32xf32>
    %c0_3 = arith.constant 0 : index
    %c0_4 = arith.constant 0 : index
    %c0_5 = arith.constant 0 : index
    %5 = vector.load %arg5[%c0_3, %c0_4, %c0_5] : memref<1x1x32xf32, #tpu.memory_space<vmem>>, vector<1x1x32xf32>
    %6 = vector.shape_cast %5 : vector<1x1x32xf32> to vector<1x32xf32>
    %7 = arith.mulf %4, %4 : vector<2x32xf32>
    %cst = arith.constant dense<0.000000e+00> : vector<2xf32>
    %8 = vector.multi_reduction <add>, %7, %cst [1] : vector<2x32xf32> to vector<2xf32>
    %9 = vector.shape_cast %8 : vector<2xf32> to vector<2x1xf32>
    %cst_6 = arith.constant 3.200000e+01 : f32
    %10 = vector.broadcast %cst_6 : f32 to vector<2x1xf32>
    %11 = arith.divf %9, %10 : vector<2x1xf32>
    %cst_7 = arith.constant 9.99999974E-6 : f32
    %12 = vector.broadcast %cst_7 : f32 to vector<2x1xf32>
    %13 = arith.addf %11, %12 : vector<2x1xf32>
    %14 = math.sqrt %13 : vector<2x1xf32>
    %15 = vector.broadcast %14 : vector<2x1xf32> to vector<2x32xf32>
    %16 = arith.mulf %4, %15 : vector<2x32xf32>
    %17 = vector.broadcast %6 : vector<1x32xf32> to vector<2x32xf32>
    %18 = arith.mulf %17, %16 : vector<2x32xf32>
    %c0_8 = arith.constant 0 : index
    %c0_9 = arith.constant 0 : index
    %c0_10 = arith.constant 0 : index
    %19 = vector.load %arg6[%c0_8, %c0_9, %c0_10] : memref<1x32x128xf32, #tpu.memory_space<vmem>>, vector<1x32x128xf32>
    %20 = vector.shape_cast %19 : vector<1x32x128xf32> to vector<32x128xf32>
    %cst_11 = arith.constant dense<0.000000e+00> : vector<2x128xf32>
    %21 = tpu.matmul %18, %20, %cst_11 {dimension_numbers = #tpu.dot_dimension_numbers<[1], [0], [0], [1], [0, 0, 1, 1], [], []>, precision = #tpu.contract_precision<fp32>} : vector<2x32xf32>, vector<32x128xf32>, vector<2x128xf32> -> vector<2x128xf32>
    %22 = vector.extract_strided_slice %21 {offsets = [0, 0], sizes = [2, 64], strides = [1, 1]} : vector<2x128xf32> to vector<2x64xf32>
    %c0_12 = arith.constant 0 : index
    %c0_13 = arith.constant 0 : index
    %23 = vector.load %arg3[%c0_12, %c0_13] : memref<1x64xf32, #tpu.memory_space<vmem>>, vector<1x64xf32>
    %24 = vector.broadcast %23 : vector<1x64xf32> to vector<2x64xf32>
    %25 = arith.mulf %22, %24 : vector<2x64xf32>
    %26 = vector.extract_strided_slice %21 {offsets = [0, 64], sizes = [2, 64], strides = [1, 1]} : vector<2x128xf32> to vector<2x64xf32>
    %c0_14 = arith.constant 0 : index
    %c0_15 = arith.constant 0 : index
    %27 = vector.load %arg4[%c0_14, %c0_15] : memref<1x64xf32, #tpu.memory_space<vmem>>, vector<1x64xf32>
    %28 = vector.broadcast %27 : vector<1x64xf32> to vector<2x64xf32>
    %29 = arith.mulf %26, %28 : vector<2x64xf32>
    %30 = arith.addf %25, %29 : vector<2x64xf32>
    %31 = vector.extract_strided_slice %30 {offsets = [0, 32], sizes = [1, 8], strides = [1, 1]} : vector<2x64xf32> to vector<1x8xf32>
    %32 = vector.extract_strided_slice %30 {offsets = [0, 48], sizes = [1, 8], strides = [1, 1]} : vector<2x64xf32> to vector<1x8xf32>
    %33 = tpu.iota {dimensions = array<i32: 0>} : vector<16x8xi32>
    %34 = vector.broadcast %0 : i32 to vector<16x8xi32>
    %35 = arith.cmpi eq, %33, %34 : vector<16x8xi32>
    %c0_16 = arith.constant 0 : index
    %c0_17 = arith.constant 0 : index
    %c0_18 = arith.constant 0 : index
    %c0_19 = arith.constant 0 : index
    %36 = vector.load %arg13[%c0_16, %c0_17, %c0_18, %c0_19] : memref<1x4x16x8xf32, #tpu.memory_space<vmem>>, vector<1x1x16x8xf32>
    %37 = vector.shape_cast %36 : vector<1x1x16x8xf32> to vector<16x8xf32>
    %38 = vector.shape_cast %31 : vector<1x8xf32> to vector<1x8xf32>
    %39 = vector.broadcast %38 : vector<1x8xf32> to vector<16x8xf32>
    %40 = arith.select %35, %39, %37 : vector<16x8xi1>, vector<16x8xf32>
    %41 = vector.broadcast %0 : i32 to vector<16x8xi32>
    %42 = arith.cmpi eq, %33, %41 : vector<16x8xi32>
    %c0_20 = arith.constant 0 : index
    %c0_21 = arith.constant 0 : index
    %c0_22 = arith.constant 0 : index
    %c0_23 = arith.constant 0 : index
    %43 = vector.load %arg14[%c0_20, %c0_21, %c0_22, %c0_23] : memref<1x4x16x8xf32, #tpu.memory_space<vmem>>, vector<1x1x16x8xf32>
    %44 = vector.shape_cast %43 : vector<1x1x16x8xf32> to vector<16x8xf32>
    %45 = vector.shape_cast %32 : vector<1x8xf32> to vector<1x8xf32>
    %46 = vector.broadcast %45 : vector<1x8xf32> to vector<16x8xf32>
    %47 = arith.select %42, %46, %44 : vector<16x8xi1>, vector<16x8xf32>
    %c0_24 = arith.constant 0 : index
    %c0_25 = arith.constant 0 : index
    %c0_26 = arith.constant 0 : index
    %c0_27 = arith.constant 0 : index
    %48 = vector.load %arg16[%c0_24, %c0_25, %c0_26, %c0_27] : memref<1x4x16x8xf32, #tpu.memory_space<vmem>>, vector<1x1x16x8xf32>
    %49 = vector.shape_cast %48 : vector<1x1x16x8xf32> to vector<16x8xf32>
    %50 = vector.shape_cast %40 : vector<16x8xf32> to vector<1x1x16x8xf32>
    tpu.vector_store %arg16[%c0_24, %c0_25, %c0_26, %c0_27], %50 {strides = array<i32>} : memref<1x4x16x8xf32, #tpu.memory_space<vmem>>, vector<1x1x16x8xf32>,
    %c0_28 = arith.constant 0 : index
    %c0_29 = arith.constant 0 : index
    %c0_30 = arith.constant 0 : index
    %c0_31 = arith.constant 0 : index
    %51 = vector.load %arg17[%c0_28, %c0_29, %c0_30, %c0_31] : memref<1x4x16x8xf32, #tpu.memory_space<vmem>>, vector<1x1x16x8xf32>
    %52 = vector.shape_cast %51 : vector<1x1x16x8xf32> to vector<16x8xf32>
    %53 = vector.shape_cast %47 : vector<16x8xf32> to vector<1x1x16x8xf32>
    tpu.vector_store %arg17[%c0_28, %c0_29, %c0_30, %c0_31], %53 {strides = array<i32>} : memref<1x4x16x8xf32, #tpu.memory_space<vmem>>, vector<1x1x16x8xf32>,
    %54 = vector.extract_strided_slice %30 {offsets = [0, 0], sizes = [1, 8], strides = [1, 1]} : vector<2x64xf32> to vector<1x8xf32>
    %cst_32 = arith.constant dense<0.000000e+00> : vector<1x16xf32>
    %55 = tpu.matmul %54, %40, %cst_32 {dimension_numbers = #tpu.dot_dimension_numbers<[1], [1], [0], [0], [0, 0, 1, 0], [], []>, precision = #tpu.contract_precision<fp32>} : vector<1x8xf32>, vector<16x8xf32>, vector<1x16xf32> -> vector<1x16xf32>
    %cst_33 = arith.constant 0.353553385 : f32
    %56 = vector.broadcast %cst_33 : f32 to vector<1x16xf32>
    %57 = arith.mulf %55, %56 : vector<1x16xf32>
    %58 = tpu.iota {dimensions = array<i32: 1>} : vector<1x16xi32>
    %59 = vector.broadcast %0 : i32 to vector<1x16xi32>
    %60 = arith.cmpi sle, %58, %59 : vector<1x16xi32>
    %cst_34 = arith.constant -1.000000e+30 : f32
    %61 = vector.broadcast %cst_34 : f32 to vector<1x16xf32>
    %62 = arith.select %60, %57, %61 : vector<1x16xi1>, vector<1x16xf32>
    %cst_35 = arith.constant dense<0xFF800000> : vector<1xf32>
    %63 = vector.multi_reduction <maximumf>, %62, %cst_35 [1] : vector<1x16xf32> to vector<1xf32>
    %64 = vector.shape_cast %63 : vector<1xf32> to vector<1x1xf32>
    %65 = vector.broadcast %64 : vector<1x1xf32> to vector<1x16xf32>
    %66 = arith.subf %62, %65 : vector<1x16xf32>
    %67 = math.exp %66 : vector<1x16xf32>
    %cst_36 = arith.constant dense<0.000000e+00> : vector<1xf32>
    %68 = vector.multi_reduction <add>, %67, %cst_36 [1] : vector<1x16xf32> to vector<1xf32>
    %69 = vector.shape_cast %68 : vector<1xf32> to vector<1x1xf32>
    %70 = vector.broadcast %69 : vector<1x1xf32> to vector<1x16xf32>
    %71 = arith.divf %67, %70 : vector<1x16xf32>
    %cst_37 = arith.constant dense<0.000000e+00> : vector<1x8xf32>
    %72 = tpu.matmul %71, %47, %cst_37 {dimension_numbers = #tpu.dot_dimension_numbers<[1], [0], [0], [1], [0, 0, 1, 1], [], []>, precision = #tpu.contract_precision<fp32>} : vector<1x16xf32>, vector<16x8xf32>, vector<1x8xf32> -> vector<1x8xf32>
    %c0_38 = arith.constant 0 : index
    %c0_39 = arith.constant 0 : index
    %73 = vector.load %arg19[%c0_38, %c0_39] : memref<2x32xf32, #tpu.memory_space<vmem>>, vector<1x8xf32>
    tpu.vector_store %arg19[%c0_38, %c0_39], %72 {strides = array<i32>} : memref<2x32xf32, #tpu.memory_space<vmem>>, vector<1x8xf32>,
    %74 = vector.extract_strided_slice %30 {offsets = [0, 8], sizes = [1, 8], strides = [1, 1]} : vector<2x64xf32> to vector<1x8xf32>
    %cst_40 = arith.constant dense<0.000000e+00> : vector<1x16xf32>
    %75 = tpu.matmul %74, %40, %cst_40 {dimension_numbers = #tpu.dot_dimension_numbers<[1], [1], [0], [0], [0, 0, 1, 0], [], []>, precision = #tpu.contract_precision<fp32>} : vector<1x8xf32>, vector<16x8xf32>, vector<1x16xf32> -> vector<1x16xf32>
    %cst_41 = arith.constant 0.353553385 : f32
    %76 = vector.broadcast %cst_41 : f32 to vector<1x16xf32>
    %77 = arith.mulf %75, %76 : vector<1x16xf32>
    %78 = tpu.iota {dimensions = array<i32: 1>} : vector<1x16xi32>
    %79 = vector.broadcast %0 : i32 to vector<1x16xi32>
    %80 = arith.cmpi sle, %78, %79 : vector<1x16xi32>
    %cst_42 = arith.constant -1.000000e+30 : f32
    %81 = vector.broadcast %cst_42 : f32 to vector<1x16xf32>
    %82 = arith.select %80, %77, %81 : vector<1x16xi1>, vector<1x16xf32>
    %cst_43 = arith.constant dense<0xFF800000> : vector<1xf32>
    %83 = vector.multi_reduction <maximumf>, %82, %cst_43 [1] : vector<1x16xf32> to vector<1xf32>
    %84 = vector.shape_cast %83 : vector<1xf32> to vector<1x1xf32>
    %85 = vector.broadcast %84 : vector<1x1xf32> to vector<1x16xf32>
    %86 = arith.subf %82, %85 : vector<1x16xf32>
    %87 = math.exp %86 : vector<1x16xf32>
    %cst_44 = arith.constant dense<0.000000e+00> : vector<1xf32>
    %88 = vector.multi_reduction <add>, %87, %cst_44 [1] : vector<1x16xf32> to vector<1xf32>
    %89 = vector.shape_cast %88 : vector<1xf32> to vector<1x1xf32>
    %90 = vector.broadcast %89 : vector<1x1xf32> to vector<1x16xf32>
    %91 = arith.divf %87, %90 : vector<1x16xf32>
    %cst_45 = arith.constant dense<0.000000e+00> : vector<1x8xf32>
    %92 = tpu.matmul %91, %47, %cst_45 {dimension_numbers = #tpu.dot_dimension_numbers<[1], [0], [0], [1], [0, 0, 1, 1], [], []>, precision = #tpu.contract_precision<fp32>} : vector<1x16xf32>, vector<16x8xf32>, vector<1x8xf32> -> vector<1x8xf32>
    %c0_46 = arith.constant 0 : index
    %c8 = arith.constant 8 : index
    %93 = vector.load %arg19[%c0_46, %c8] : memref<2x32xf32, #tpu.memory_space<vmem>>, vector<1x8xf32>
    tpu.vector_store %arg19[%c0_46, %c8], %92 {strides = array<i32>} : memref<2x32xf32, #tpu.memory_space<vmem>>, vector<1x8xf32>,
    %94 = vector.extract_strided_slice %30 {offsets = [0, 40], sizes = [1, 8], strides = [1, 1]} : vector<2x64xf32> to vector<1x8xf32>
    %95 = vector.extract_strided_slice %30 {offsets = [0, 56], sizes = [1, 8], strides = [1, 1]} : vector<2x64xf32> to vector<1x8xf32>
    %96 = tpu.iota {dimensions = array<i32: 0>} : vector<16x8xi32>
    %97 = vector.broadcast %0 : i32 to vector<16x8xi32>
    %98 = arith.cmpi eq, %96, %97 : vector<16x8xi32>
    %c0_47 = arith.constant 0 : index
    %c1 = arith.constant 1 : index
    %c0_48 = arith.constant 0 : index
    %c0_49 = arith.constant 0 : index
    %99 = vector.load %arg13[%c0_47, %c1, %c0_48, %c0_49] : memref<1x4x16x8xf32, #tpu.memory_space<vmem>>, vector<1x1x16x8xf32>
    %100 = vector.shape_cast %99 : vector<1x1x16x8xf32> to vector<16x8xf32>
    %101 = vector.shape_cast %94 : vector<1x8xf32> to vector<1x8xf32>
    %102 = vector.broadcast %101 : vector<1x8xf32> to vector<16x8xf32>
    %103 = arith.select %98, %102, %100 : vector<16x8xi1>, vector<16x8xf32>
    %104 = vector.broadcast %0 : i32 to vector<16x8xi32>
    %105 = arith.cmpi eq, %96, %104 : vector<16x8xi32>
    %c0_50 = arith.constant 0 : index
    %c1_51 = arith.constant 1 : index
    %c0_52 = arith.constant 0 : index
    %c0_53 = arith.constant 0 : index
    %106 = vector.load %arg14[%c0_50, %c1_51, %c0_52, %c0_53] : memref<1x4x16x8xf32, #tpu.memory_space<vmem>>, vector<1x1x16x8xf32>
    %107 = vector.shape_cast %106 : vector<1x1x16x8xf32> to vector<16x8xf32>
    %108 = vector.shape_cast %95 : vector<1x8xf32> to vector<1x8xf32>
    %109 = vector.broadcast %108 : vector<1x8xf32> to vector<16x8xf32>
    %110 = arith.select %105, %109, %107 : vector<16x8xi1>, vector<16x8xf32>
    %c0_54 = arith.constant 0 : index
    %c1_55 = arith.constant 1 : index
    %c0_56 = arith.constant 0 : index
    %c0_57 = arith.constant 0 : index
    %111 = vector.load %arg16[%c0_54, %c1_55, %c0_56, %c0_57] : memref<1x4x16x8xf32, #tpu.memory_space<vmem>>, vector<1x1x16x8xf32>
    %112 = vector.shape_cast %111 : vector<1x1x16x8xf32> to vector<16x8xf32>
    %113 = vector.shape_cast %103 : vector<16x8xf32> to vector<1x1x16x8xf32>
    tpu.vector_store %arg16[%c0_54, %c1_55, %c0_56, %c0_57], %113 {strides = array<i32>} : memref<1x4x16x8xf32, #tpu.memory_space<vmem>>, vector<1x1x16x8xf32>,
    %c0_58 = arith.constant 0 : index
    %c1_59 = arith.constant 1 : index
    %c0_60 = arith.constant 0 : index
    %c0_61 = arith.constant 0 : index
    %114 = vector.load %arg17[%c0_58, %c1_59, %c0_60, %c0_61] : memref<1x4x16x8xf32, #tpu.memory_space<vmem>>, vector<1x1x16x8xf32>
    %115 = vector.shape_cast %114 : vector<1x1x16x8xf32> to vector<16x8xf32>
    %116 = vector.shape_cast %110 : vector<16x8xf32> to vector<1x1x16x8xf32>
    tpu.vector_store %arg17[%c0_58, %c1_59, %c0_60, %c0_61], %116 {strides = array<i32>} : memref<1x4x16x8xf32, #tpu.memory_space<vmem>>, vector<1x1x16x8xf32>,
    %117 = vector.extract_strided_slice %30 {offsets = [0, 16], sizes = [1, 8], strides = [1, 1]} : vector<2x64xf32> to vector<1x8xf32>
    %cst_62 = arith.constant dense<0.000000e+00> : vector<1x16xf32>
    %118 = tpu.matmul %117, %103, %cst_62 {dimension_numbers = #tpu.dot_dimension_numbers<[1], [1], [0], [0], [0, 0, 1, 0], [], []>, precision = #tpu.contract_precision<fp32>} : vector<1x8xf32>, vector<16x8xf32>, vector<1x16xf32> -> vector<1x16xf32>
    %cst_63 = arith.constant 0.353553385 : f32
    %119 = vector.broadcast %cst_63 : f32 to vector<1x16xf32>
    %120 = arith.mulf %118, %119 : vector<1x16xf32>
    %121 = tpu.iota {dimensions = array<i32: 1>} : vector<1x16xi32>
    %122 = vector.broadcast %0 : i32 to vector<1x16xi32>
    %123 = arith.cmpi sle, %121, %122 : vector<1x16xi32>
    %cst_64 = arith.constant -1.000000e+30 : f32
    %124 = vector.broadcast %cst_64 : f32 to vector<1x16xf32>
    %125 = arith.select %123, %120, %124 : vector<1x16xi1>, vector<1x16xf32>
    %cst_65 = arith.constant dense<0xFF800000> : vector<1xf32>
    %126 = vector.multi_reduction <maximumf>, %125, %cst_65 [1] : vector<1x16xf32> to vector<1xf32>
    %127 = vector.shape_cast %126 : vector<1xf32> to vector<1x1xf32>
    %128 = vector.broadcast %127 : vector<1x1xf32> to vector<1x16xf32>
    %129 = arith.subf %125, %128 : vector<1x16xf32>
    %130 = math.exp %129 : vector<1x16xf32>
    %cst_66 = arith.constant dense<0.000000e+00> : vector<1xf32>
    %131 = vector.multi_reduction <add>, %130, %cst_66 [1] : vector<1x16xf32> to vector<1xf32>
    %132 = vector.shape_cast %131 : vector<1xf32> to vector<1x1xf32>
    %133 = vector.broadcast %132 : vector<1x1xf32> to vector<1x16xf32>
    %134 = arith.divf %130, %133 : vector<1x16xf32>
    %cst_67 = arith.constant dense<0.000000e+00> : vector<1x8xf32>
    %135 = tpu.matmul %134, %110, %cst_67 {dimension_numbers = #tpu.dot_dimension_numbers<[1], [0], [0], [1], [0, 0, 1, 1], [], []>, precision = #tpu.contract_precision<fp32>} : vector<1x16xf32>, vector<16x8xf32>, vector<1x8xf32> -> vector<1x8xf32>
    %c0_68 = arith.constant 0 : index
    %c16 = arith.constant 16 : index
    %136 = vector.load %arg19[%c0_68, %c16] : memref<2x32xf32, #tpu.memory_space<vmem>>, vector<1x8xf32>
    tpu.vector_store %arg19[%c0_68, %c16], %135 {strides = array<i32>} : memref<2x32xf32, #tpu.memory_space<vmem>>, vector<1x8xf32>,
    %137 = vector.extract_strided_slice %30 {offsets = [0, 24], sizes = [1, 8], strides = [1, 1]} : vector<2x64xf32> to vector<1x8xf32>
    %cst_69 = arith.constant dense<0.000000e+00> : vector<1x16xf32>
    %138 = tpu.matmul %137, %103, %cst_69 {dimension_numbers = #tpu.dot_dimension_numbers<[1], [1], [0], [0], [0, 0, 1, 0], [], []>, precision = #tpu.contract_precision<fp32>} : vector<1x8xf32>, vector<16x8xf32>, vector<1x16xf32> -> vector<1x16xf32>
    %cst_70 = arith.constant 0.353553385 : f32
    %139 = vector.broadcast %cst_70 : f32 to vector<1x16xf32>
    %140 = arith.mulf %138, %139 : vector<1x16xf32>
    %141 = tpu.iota {dimensions = array<i32: 1>} : vector<1x16xi32>
    %142 = vector.broadcast %0 : i32 to vector<1x16xi32>
    %143 = arith.cmpi sle, %141, %142 : vector<1x16xi32>
    %cst_71 = arith.constant -1.000000e+30 : f32
    %144 = vector.broadcast %cst_71 : f32 to vector<1x16xf32>
    %145 = arith.select %143, %140, %144 : vector<1x16xi1>, vector<1x16xf32>
    %cst_72 = arith.constant dense<0xFF800000> : vector<1xf32>
    %146 = vector.multi_reduction <maximumf>, %145, %cst_72 [1] : vector<1x16xf32> to vector<1xf32>
    %147 = vector.shape_cast %146 : vector<1xf32> to vector<1x1xf32>
    %148 = vector.broadcast %147 : vector<1x1xf32> to vector<1x16xf32>
    %149 = arith.subf %145, %148 : vector<1x16xf32>
    %150 = math.exp %149 : vector<1x16xf32>
    %cst_73 = arith.constant dense<0.000000e+00> : vector<1xf32>
    %151 = vector.multi_reduction <add>, %150, %cst_73 [1] : vector<1x16xf32> to vector<1xf32>
    %152 = vector.shape_cast %151 : vector<1xf32> to vector<1x1xf32>
    %153 = vector.broadcast %152 : vector<1x1xf32> to vector<1x16xf32>
    %154 = arith.divf %150, %153 : vector<1x16xf32>
    %cst_74 = arith.constant dense<0.000000e+00> : vector<1x8xf32>
    %155 = tpu.matmul %154, %110, %cst_74 {dimension_numbers = #tpu.dot_dimension_numbers<[1], [0], [0], [1], [0, 0, 1, 1], [], []>, precision = #tpu.contract_precision<fp32>} : vector<1x16xf32>, vector<16x8xf32>, vector<1x8xf32> -> vector<1x8xf32>
    %c0_75 = arith.constant 0 : index
    %c24 = arith.constant 24 : index
    %156 = vector.load %arg19[%c0_75, %c24] : memref<2x32xf32, #tpu.memory_space<vmem>>, vector<1x8xf32>
    tpu.vector_store %arg19[%c0_75, %c24], %155 {strides = array<i32>} : memref<2x32xf32, #tpu.memory_space<vmem>>, vector<1x8xf32>,
    %157 = vector.extract_strided_slice %30 {offsets = [1, 32], sizes = [1, 8], strides = [1, 1]} : vector<2x64xf32> to vector<1x8xf32>
    %158 = vector.extract_strided_slice %30 {offsets = [1, 48], sizes = [1, 8], strides = [1, 1]} : vector<2x64xf32> to vector<1x8xf32>
    %159 = tpu.iota {dimensions = array<i32: 0>} : vector<16x8xi32>
    %160 = vector.broadcast %0 : i32 to vector<16x8xi32>
    %161 = arith.cmpi eq, %159, %160 : vector<16x8xi32>
    %c0_76 = arith.constant 0 : index
    %c2 = arith.constant 2 : index
    %c0_77 = arith.constant 0 : index
    %c0_78 = arith.constant 0 : index
    %162 = vector.load %arg13[%c0_76, %c2, %c0_77, %c0_78] : memref<1x4x16x8xf32, #tpu.memory_space<vmem>>, vector<1x1x16x8xf32>
    %163 = vector.shape_cast %162 : vector<1x1x16x8xf32> to vector<16x8xf32>
    %164 = vector.shape_cast %157 : vector<1x8xf32> to vector<1x8xf32>
    %165 = vector.broadcast %164 : vector<1x8xf32> to vector<16x8xf32>
    %166 = arith.select %161, %165, %163 : vector<16x8xi1>, vector<16x8xf32>
    %167 = vector.broadcast %0 : i32 to vector<16x8xi32>
    %168 = arith.cmpi eq, %159, %167 : vector<16x8xi32>
    %c0_79 = arith.constant 0 : index
    %c2_80 = arith.constant 2 : index
    %c0_81 = arith.constant 0 : index
    %c0_82 = arith.constant 0 : index
    %169 = vector.load %arg14[%c0_79, %c2_80, %c0_81, %c0_82] : memref<1x4x16x8xf32, #tpu.memory_space<vmem>>, vector<1x1x16x8xf32>
    %170 = vector.shape_cast %169 : vector<1x1x16x8xf32> to vector<16x8xf32>
    %171 = vector.shape_cast %158 : vector<1x8xf32> to vector<1x8xf32>
    %172 = vector.broadcast %171 : vector<1x8xf32> to vector<16x8xf32>
    %173 = arith.select %168, %172, %170 : vector<16x8xi1>, vector<16x8xf32>
    %c0_83 = arith.constant 0 : index
    %c2_84 = arith.constant 2 : index
    %c0_85 = arith.constant 0 : index
    %c0_86 = arith.constant 0 : index
    %174 = vector.load %arg16[%c0_83, %c2_84, %c0_85, %c0_86] : memref<1x4x16x8xf32, #tpu.memory_space<vmem>>, vector<1x1x16x8xf32>
    %175 = vector.shape_cast %174 : vector<1x1x16x8xf32> to vector<16x8xf32>
    %176 = vector.shape_cast %166 : vector<16x8xf32> to vector<1x1x16x8xf32>
    tpu.vector_store %arg16[%c0_83, %c2_84, %c0_85, %c0_86], %176 {strides = array<i32>} : memref<1x4x16x8xf32, #tpu.memory_space<vmem>>, vector<1x1x16x8xf32>,
    %c0_87 = arith.constant 0 : index
    %c2_88 = arith.constant 2 : index
    %c0_89 = arith.constant 0 : index
    %c0_90 = arith.constant 0 : index
    %177 = vector.load %arg17[%c0_87, %c2_88, %c0_89, %c0_90] : memref<1x4x16x8xf32, #tpu.memory_space<vmem>>, vector<1x1x16x8xf32>
    %178 = vector.shape_cast %177 : vector<1x1x16x8xf32> to vector<16x8xf32>
    %179 = vector.shape_cast %173 : vector<16x8xf32> to vector<1x1x16x8xf32>
    tpu.vector_store %arg17[%c0_87, %c2_88, %c0_89, %c0_90], %179 {strides = array<i32>} : memref<1x4x16x8xf32, #tpu.memory_space<vmem>>, vector<1x1x16x8xf32>,
    %180 = vector.extract_strided_slice %30 {offsets = [1, 0], sizes = [1, 8], strides = [1, 1]} : vector<2x64xf32> to vector<1x8xf32>
    %cst_91 = arith.constant dense<0.000000e+00> : vector<1x16xf32>
    %181 = tpu.matmul %180, %166, %cst_91 {dimension_numbers = #tpu.dot_dimension_numbers<[1], [1], [0], [0], [0, 0, 1, 0], [], []>, precision = #tpu.contract_precision<fp32>} : vector<1x8xf32>, vector<16x8xf32>, vector<1x16xf32> -> vector<1x16xf32>
    %cst_92 = arith.constant 0.353553385 : f32
    %182 = vector.broadcast %cst_92 : f32 to vector<1x16xf32>
    %183 = arith.mulf %181, %182 : vector<1x16xf32>
    %184 = tpu.iota {dimensions = array<i32: 1>} : vector<1x16xi32>
    %185 = vector.broadcast %0 : i32 to vector<1x16xi32>
    %186 = arith.cmpi sle, %184, %185 : vector<1x16xi32>
    %cst_93 = arith.constant -1.000000e+30 : f32
    %187 = vector.broadcast %cst_93 : f32 to vector<1x16xf32>
    %188 = arith.select %186, %183, %187 : vector<1x16xi1>, vector<1x16xf32>
    %cst_94 = arith.constant dense<0xFF800000> : vector<1xf32>
    %189 = vector.multi_reduction <maximumf>, %188, %cst_94 [1] : vector<1x16xf32> to vector<1xf32>
    %190 = vector.shape_cast %189 : vector<1xf32> to vector<1x1xf32>
    %191 = vector.broadcast %190 : vector<1x1xf32> to vector<1x16xf32>
    %192 = arith.subf %188, %191 : vector<1x16xf32>
    %193 = math.exp %192 : vector<1x16xf32>
    %cst_95 = arith.constant dense<0.000000e+00> : vector<1xf32>
    %194 = vector.multi_reduction <add>, %193, %cst_95 [1] : vector<1x16xf32> to vector<1xf32>
    %195 = vector.shape_cast %194 : vector<1xf32> to vector<1x1xf32>
    %196 = vector.broadcast %195 : vector<1x1xf32> to vector<1x16xf32>
    %197 = arith.divf %193, %196 : vector<1x16xf32>
    %cst_96 = arith.constant dense<0.000000e+00> : vector<1x8xf32>
    %198 = tpu.matmul %197, %173, %cst_96 {dimension_numbers = #tpu.dot_dimension_numbers<[1], [0], [0], [1], [0, 0, 1, 1], [], []>, precision = #tpu.contract_precision<fp32>} : vector<1x16xf32>, vector<16x8xf32>, vector<1x8xf32> -> vector<1x8xf32>
    %c1_97 = arith.constant 1 : index
    %c0_98 = arith.constant 0 : index
    %199 = vector.load %arg19[%c1_97, %c0_98] : memref<2x32xf32, #tpu.memory_space<vmem>>, vector<1x8xf32>
    tpu.vector_store %arg19[%c1_97, %c0_98], %198 {strides = array<i32>} : memref<2x32xf32, #tpu.memory_space<vmem>>, vector<1x8xf32>,
    %200 = vector.extract_strided_slice %30 {offsets = [1, 8], sizes = [1, 8], strides = [1, 1]} : vector<2x64xf32> to vector<1x8xf32>
    %cst_99 = arith.constant dense<0.000000e+00> : vector<1x16xf32>
    %201 = tpu.matmul %200, %166, %cst_99 {dimension_numbers = #tpu.dot_dimension_numbers<[1], [1], [0], [0], [0, 0, 1, 0], [], []>, precision = #tpu.contract_precision<fp32>} : vector<1x8xf32>, vector<16x8xf32>, vector<1x16xf32> -> vector<1x16xf32>
    %cst_100 = arith.constant 0.353553385 : f32
    %202 = vector.broadcast %cst_100 : f32 to vector<1x16xf32>
    %203 = arith.mulf %201, %202 : vector<1x16xf32>
    %204 = tpu.iota {dimensions = array<i32: 1>} : vector<1x16xi32>
    %205 = vector.broadcast %0 : i32 to vector<1x16xi32>
    %206 = arith.cmpi sle, %204, %205 : vector<1x16xi32>
    %cst_101 = arith.constant -1.000000e+30 : f32
    %207 = vector.broadcast %cst_101 : f32 to vector<1x16xf32>
    %208 = arith.select %206, %203, %207 : vector<1x16xi1>, vector<1x16xf32>
    %cst_102 = arith.constant dense<0xFF800000> : vector<1xf32>
    %209 = vector.multi_reduction <maximumf>, %208, %cst_102 [1] : vector<1x16xf32> to vector<1xf32>
    %210 = vector.shape_cast %209 : vector<1xf32> to vector<1x1xf32>
    %211 = vector.broadcast %210 : vector<1x1xf32> to vector<1x16xf32>
    %212 = arith.subf %208, %211 : vector<1x16xf32>
    %213 = math.exp %212 : vector<1x16xf32>
    %cst_103 = arith.constant dense<0.000000e+00> : vector<1xf32>
    %214 = vector.multi_reduction <add>, %213, %cst_103 [1] : vector<1x16xf32> to vector<1xf32>
    %215 = vector.shape_cast %214 : vector<1xf32> to vector<1x1xf32>
    %216 = vector.broadcast %215 : vector<1x1xf32> to vector<1x16xf32>
    %217 = arith.divf %213, %216 : vector<1x16xf32>
    %cst_104 = arith.constant dense<0.000000e+00> : vector<1x8xf32>
    %218 = tpu.matmul %217, %173, %cst_104 {dimension_numbers = #tpu.dot_dimension_numbers<[1], [0], [0], [1], [0, 0, 1, 1], [], []>, precision = #tpu.contract_precision<fp32>} : vector<1x16xf32>, vector<16x8xf32>, vector<1x8xf32> -> vector<1x8xf32>
    %c1_105 = arith.constant 1 : index
    %c8_106 = arith.constant 8 : index
    %219 = vector.load %arg19[%c1_105, %c8_106] : memref<2x32xf32, #tpu.memory_space<vmem>>, vector<1x8xf32>
    tpu.vector_store %arg19[%c1_105, %c8_106], %218 {strides = array<i32>} : memref<2x32xf32, #tpu.memory_space<vmem>>, vector<1x8xf32>,
    %220 = vector.extract_strided_slice %30 {offsets = [1, 40], sizes = [1, 8], strides = [1, 1]} : vector<2x64xf32> to vector<1x8xf32>
    %221 = vector.extract_strided_slice %30 {offsets = [1, 56], sizes = [1, 8], strides = [1, 1]} : vector<2x64xf32> to vector<1x8xf32>
    %222 = tpu.iota {dimensions = array<i32: 0>} : vector<16x8xi32>
    %223 = vector.broadcast %0 : i32 to vector<16x8xi32>
    %224 = arith.cmpi eq, %222, %223 : vector<16x8xi32>
    %c0_107 = arith.constant 0 : index
    %c3 = arith.constant 3 : index
    %c0_108 = arith.constant 0 : index
    %c0_109 = arith.constant 0 : index
    %225 = vector.load %arg13[%c0_107, %c3, %c0_108, %c0_109] : memref<1x4x16x8xf32, #tpu.memory_space<vmem>>, vector<1x1x16x8xf32>
    %226 = vector.shape_cast %225 : vector<1x1x16x8xf32> to vector<16x8xf32>
    %227 = vector.shape_cast %220 : vector<1x8xf32> to vector<1x8xf32>
    %228 = vector.broadcast %227 : vector<1x8xf32> to vector<16x8xf32>
    %229 = arith.select %224, %228, %226 : vector<16x8xi1>, vector<16x8xf32>
    %230 = vector.broadcast %0 : i32 to vector<16x8xi32>
    %231 = arith.cmpi eq, %222, %230 : vector<16x8xi32>
    %c0_110 = arith.constant 0 : index
    %c3_111 = arith.constant 3 : index
    %c0_112 = arith.constant 0 : index
    %c0_113 = arith.constant 0 : index
    %232 = vector.load %arg14[%c0_110, %c3_111, %c0_112, %c0_113] : memref<1x4x16x8xf32, #tpu.memory_space<vmem>>, vector<1x1x16x8xf32>
    %233 = vector.shape_cast %232 : vector<1x1x16x8xf32> to vector<16x8xf32>
    %234 = vector.shape_cast %221 : vector<1x8xf32> to vector<1x8xf32>
    %235 = vector.broadcast %234 : vector<1x8xf32> to vector<16x8xf32>
    %236 = arith.select %231, %235, %233 : vector<16x8xi1>, vector<16x8xf32>
    %c0_114 = arith.constant 0 : index
    %c3_115 = arith.constant 3 : index
    %c0_116 = arith.constant 0 : index
    %c0_117 = arith.constant 0 : index
    %237 = vector.load %arg16[%c0_114, %c3_115, %c0_116, %c0_117] : memref<1x4x16x8xf32, #tpu.memory_space<vmem>>, vector<1x1x16x8xf32>
    %238 = vector.shape_cast %237 : vector<1x1x16x8xf32> to vector<16x8xf32>
    %239 = vector.shape_cast %229 : vector<16x8xf32> to vector<1x1x16x8xf32>
    tpu.vector_store %arg16[%c0_114, %c3_115, %c0_116, %c0_117], %239 {strides = array<i32>} : memref<1x4x16x8xf32, #tpu.memory_space<vmem>>, vector<1x1x16x8xf32>,
    %c0_118 = arith.constant 0 : index
    %c3_119 = arith.constant 3 : index
    %c0_120 = arith.constant 0 : index
    %c0_121 = arith.constant 0 : index
    %240 = vector.load %arg17[%c0_118, %c3_119, %c0_120, %c0_121] : memref<1x4x16x8xf32, #tpu.memory_space<vmem>>, vector<1x1x16x8xf32>
    %241 = vector.shape_cast %240 : vector<1x1x16x8xf32> to vector<16x8xf32>
    %242 = vector.shape_cast %236 : vector<16x8xf32> to vector<1x1x16x8xf32>
    tpu.vector_store %arg17[%c0_118, %c3_119, %c0_120, %c0_121], %242 {strides = array<i32>} : memref<1x4x16x8xf32, #tpu.memory_space<vmem>>, vector<1x1x16x8xf32>,
    %243 = vector.extract_strided_slice %30 {offsets = [1, 16], sizes = [1, 8], strides = [1, 1]} : vector<2x64xf32> to vector<1x8xf32>
    %cst_122 = arith.constant dense<0.000000e+00> : vector<1x16xf32>
    %244 = tpu.matmul %243, %229, %cst_122 {dimension_numbers = #tpu.dot_dimension_numbers<[1], [1], [0], [0], [0, 0, 1, 0], [], []>, precision = #tpu.contract_precision<fp32>} : vector<1x8xf32>, vector<16x8xf32>, vector<1x16xf32> -> vector<1x16xf32>
    %cst_123 = arith.constant 0.353553385 : f32
    %245 = vector.broadcast %cst_123 : f32 to vector<1x16xf32>
    %246 = arith.mulf %244, %245 : vector<1x16xf32>
    %247 = tpu.iota {dimensions = array<i32: 1>} : vector<1x16xi32>
    %248 = vector.broadcast %0 : i32 to vector<1x16xi32>
    %249 = arith.cmpi sle, %247, %248 : vector<1x16xi32>
    %cst_124 = arith.constant -1.000000e+30 : f32
    %250 = vector.broadcast %cst_124 : f32 to vector<1x16xf32>
    %251 = arith.select %249, %246, %250 : vector<1x16xi1>, vector<1x16xf32>
    %cst_125 = arith.constant dense<0xFF800000> : vector<1xf32>
    %252 = vector.multi_reduction <maximumf>, %251, %cst_125 [1] : vector<1x16xf32> to vector<1xf32>
    %253 = vector.shape_cast %252 : vector<1xf32> to vector<1x1xf32>
    %254 = vector.broadcast %253 : vector<1x1xf32> to vector<1x16xf32>
    %255 = arith.subf %251, %254 : vector<1x16xf32>
    %256 = math.exp %255 : vector<1x16xf32>
    %cst_126 = arith.constant dense<0.000000e+00> : vector<1xf32>
    %257 = vector.multi_reduction <add>, %256, %cst_126 [1] : vector<1x16xf32> to vector<1xf32>
    %258 = vector.shape_cast %257 : vector<1xf32> to vector<1x1xf32>
    %259 = vector.broadcast %258 : vector<1x1xf32> to vector<1x16xf32>
    %260 = arith.divf %256, %259 : vector<1x16xf32>
    %cst_127 = arith.constant dense<0.000000e+00> : vector<1x8xf32>
    %261 = tpu.matmul %260, %236, %cst_127 {dimension_numbers = #tpu.dot_dimension_numbers<[1], [0], [0], [1], [0, 0, 1, 1], [], []>, precision = #tpu.contract_precision<fp32>} : vector<1x16xf32>, vector<16x8xf32>, vector<1x8xf32> -> vector<1x8xf32>
    %c1_128 = arith.constant 1 : index
    %c16_129 = arith.constant 16 : index
    %262 = vector.load %arg19[%c1_128, %c16_129] : memref<2x32xf32, #tpu.memory_space<vmem>>, vector<1x8xf32>
    tpu.vector_store %arg19[%c1_128, %c16_129], %261 {strides = array<i32>} : memref<2x32xf32, #tpu.memory_space<vmem>>, vector<1x8xf32>,
    %263 = vector.extract_strided_slice %30 {offsets = [1, 24], sizes = [1, 8], strides = [1, 1]} : vector<2x64xf32> to vector<1x8xf32>
    %cst_130 = arith.constant dense<0.000000e+00> : vector<1x16xf32>
    %264 = tpu.matmul %263, %229, %cst_130 {dimension_numbers = #tpu.dot_dimension_numbers<[1], [1], [0], [0], [0, 0, 1, 0], [], []>, precision = #tpu.contract_precision<fp32>} : vector<1x8xf32>, vector<16x8xf32>, vector<1x16xf32> -> vector<1x16xf32>
    %cst_131 = arith.constant 0.353553385 : f32
    %265 = vector.broadcast %cst_131 : f32 to vector<1x16xf32>
    %266 = arith.mulf %264, %265 : vector<1x16xf32>
    %267 = tpu.iota {dimensions = array<i32: 1>} : vector<1x16xi32>
    %268 = vector.broadcast %0 : i32 to vector<1x16xi32>
    %269 = arith.cmpi sle, %267, %268 : vector<1x16xi32>
    %cst_132 = arith.constant -1.000000e+30 : f32
    %270 = vector.broadcast %cst_132 : f32 to vector<1x16xf32>
    %271 = arith.select %269, %266, %270 : vector<1x16xi1>, vector<1x16xf32>
    %cst_133 = arith.constant dense<0xFF800000> : vector<1xf32>
    %272 = vector.multi_reduction <maximumf>, %271, %cst_133 [1] : vector<1x16xf32> to vector<1xf32>
    %273 = vector.shape_cast %272 : vector<1xf32> to vector<1x1xf32>
    %274 = vector.broadcast %273 : vector<1x1xf32> to vector<1x16xf32>
    %275 = arith.subf %271, %274 : vector<1x16xf32>
    %276 = math.exp %275 : vector<1x16xf32>
    %cst_134 = arith.constant dense<0.000000e+00> : vector<1xf32>
    %277 = vector.multi_reduction <add>, %276, %cst_134 [1] : vector<1x16xf32> to vector<1xf32>
    %278 = vector.shape_cast %277 : vector<1xf32> to vector<1x1xf32>
    %279 = vector.broadcast %278 : vector<1x1xf32> to vector<1x16xf32>
    %280 = arith.divf %276, %279 : vector<1x16xf32>
    %cst_135 = arith.constant dense<0.000000e+00> : vector<1x8xf32>
    %281 = tpu.matmul %280, %236, %cst_135 {dimension_numbers = #tpu.dot_dimension_numbers<[1], [0], [0], [1], [0, 0, 1, 1], [], []>, precision = #tpu.contract_precision<fp32>} : vector<1x16xf32>, vector<16x8xf32>, vector<1x8xf32> -> vector<1x8xf32>
    %c1_136 = arith.constant 1 : index
    %c24_137 = arith.constant 24 : index
    %282 = vector.load %arg19[%c1_136, %c24_137] : memref<2x32xf32, #tpu.memory_space<vmem>>, vector<1x8xf32>
    tpu.vector_store %arg19[%c1_136, %c24_137], %281 {strides = array<i32>} : memref<2x32xf32, #tpu.memory_space<vmem>>, vector<1x8xf32>,
    %c0_138 = arith.constant 0 : index
    %c0_139 = arith.constant 0 : index
    %283 = vector.load %arg19[%c0_138, %c0_139] : memref<2x32xf32, #tpu.memory_space<vmem>>, vector<2x32xf32>
    %c0_140 = arith.constant 0 : index
    %c0_141 = arith.constant 0 : index
    %c0_142 = arith.constant 0 : index
    %284 = vector.load %arg7[%c0_140, %c0_141, %c0_142] : memref<1x32x32xf32, #tpu.memory_space<vmem>>, vector<1x32x32xf32>
    %285 = vector.shape_cast %284 : vector<1x32x32xf32> to vector<32x32xf32>
    %cst_143 = arith.constant dense<0.000000e+00> : vector<2x32xf32>
    %286 = tpu.matmul %283, %285, %cst_143 {dimension_numbers = #tpu.dot_dimension_numbers<[1], [0], [0], [1], [0, 0, 1, 1], [], []>, precision = #tpu.contract_precision<fp32>} : vector<2x32xf32>, vector<32x32xf32>, vector<2x32xf32> -> vector<2x32xf32>
    %287 = arith.addf %4, %286 : vector<2x32xf32>
    %c0_144 = arith.constant 0 : index
    %c0_145 = arith.constant 0 : index
    %c0_146 = arith.constant 0 : index
    %288 = vector.load %arg8[%c0_144, %c0_145, %c0_146] : memref<1x1x32xf32, #tpu.memory_space<vmem>>, vector<1x1x32xf32>
    %289 = vector.shape_cast %288 : vector<1x1x32xf32> to vector<1x32xf32>
    %290 = arith.mulf %287, %287 : vector<2x32xf32>
    %cst_147 = arith.constant dense<0.000000e+00> : vector<2xf32>
    %291 = vector.multi_reduction <add>, %290, %cst_147 [1] : vector<2x32xf32> to vector<2xf32>
    %292 = vector.shape_cast %291 : vector<2xf32> to vector<2x1xf32>
    %cst_148 = arith.constant 3.200000e+01 : f32
    %293 = vector.broadcast %cst_148 : f32 to vector<2x1xf32>
    %294 = arith.divf %292, %293 : vector<2x1xf32>
    %cst_149 = arith.constant 9.99999974E-6 : f32
    %295 = vector.broadcast %cst_149 : f32 to vector<2x1xf32>
    %296 = arith.addf %294, %295 : vector<2x1xf32>
    %297 = math.sqrt %296 : vector<2x1xf32>
    %298 = vector.broadcast %297 : vector<2x1xf32> to vector<2x32xf32>
    %299 = arith.mulf %287, %298 : vector<2x32xf32>
    %300 = vector.broadcast %289 : vector<1x32xf32> to vector<2x32xf32>
    %301 = arith.mulf %300, %299 : vector<2x32xf32>
    %c0_150 = arith.constant 0 : index
    %c0_151 = arith.constant 0 : index
    %c0_152 = arith.constant 0 : index
    %302 = vector.load %arg9[%c0_150, %c0_151, %c0_152] : memref<1x32x96xf32, #tpu.memory_space<vmem>>, vector<1x32x96xf32>
    %303 = vector.shape_cast %302 : vector<1x32x96xf32> to vector<32x96xf32>
    %cst_153 = arith.constant dense<0.000000e+00> : vector<2x96xf32>
    %304 = tpu.matmul %301, %303, %cst_153 {dimension_numbers = #tpu.dot_dimension_numbers<[1], [0], [0], [1], [0, 0, 1, 1], [], []>, precision = #tpu.contract_precision<fp32>} : vector<2x32xf32>, vector<32x96xf32>, vector<2x96xf32> -> vector<2x96xf32>
    %305 = arith.negf %304 : vector<2x96xf32>
    %306 = math.exp %305 : vector<2x96xf32>
    %cst_154 = arith.constant 1.000000e+00 : f32
    %307 = vector.broadcast %cst_154 : f32 to vector<2x96xf32>
    %308 = arith.addf %307, %306 : vector<2x96xf32>
    %309 = arith.divf %307, %308 : vector<2x96xf32>
    %310 = arith.mulf %304, %309 : vector<2x96xf32>
    %311 = arith.mulf %310, %304 : vector<2x96xf32>
    %c0_155 = arith.constant 0 : index
    %c0_156 = arith.constant 0 : index
    %c0_157 = arith.constant 0 : index
    %312 = vector.load %arg10[%c0_155, %c0_156, %c0_157] : memref<1x96x32xf32, #tpu.memory_space<vmem>>, vector<1x96x32xf32>
    %313 = vector.shape_cast %312 : vector<1x96x32xf32> to vector<96x32xf32>
    %cst_158 = arith.constant dense<0.000000e+00> : vector<2x32xf32>
    %314 = tpu.matmul %311, %313, %cst_158 {dimension_numbers = #tpu.dot_dimension_numbers<[1], [0], [0], [1], [0, 0, 1, 1], [], []>, precision = #tpu.contract_precision<fp32>} : vector<2x96xf32>, vector<96x32xf32>, vector<2x32xf32> -> vector<2x32xf32>
    %315 = arith.addf %287, %314 : vector<2x32xf32>
    %c0_159 = arith.constant 0 : index
    %c0_160 = arith.constant 0 : index
    %316 = vector.load %arg18[%c0_159, %c0_160] : memref<2x32xf32, #tpu.memory_space<vmem>>, vector<2x32xf32>
    tpu.vector_store %arg18[%c0_159, %c0_160], %315 {strides = array<i32>} : memref<2x32xf32, #tpu.memory_space<vmem>>, vector<2x32xf32>,
    %c1_i32 = arith.constant 1 : i32
    %317 = arith.cmpi eq, %arg0, %c1_i32 : i32
    %318 = arith.extui %317 : i1 to i32
    %c0_i32_161 = arith.constant 0 : i32
    %319 = arith.cmpi ne, %318, %c0_i32_161 : i32
    scf.if %319 {
      %c0_162 = arith.constant 0 : index
      %c0_163 = arith.constant 0 : index
      %320 = vector.load %arg11[%c0_162, %c0_163] : memref<1x32xf32, #tpu.memory_space<vmem>>, vector<1x32xf32>
      %321 = arith.mulf %315, %315 : vector<2x32xf32>
      %cst_164 = arith.constant dense<0.000000e+00> : vector<2xf32>
      %322 = vector.multi_reduction <add>, %321, %cst_164 [1] : vector<2x32xf32> to vector<2xf32>
      %323 = vector.shape_cast %322 : vector<2xf32> to vector<2x1xf32>
      %cst_165 = arith.constant 3.200000e+01 : f32
      %324 = vector.broadcast %cst_165 : f32 to vector<2x1xf32>
      %325 = arith.divf %323, %324 : vector<2x1xf32>
      %cst_166 = arith.constant 9.99999974E-6 : f32
      %326 = vector.broadcast %cst_166 : f32 to vector<2x1xf32>
      %327 = arith.addf %325, %326 : vector<2x1xf32>
      %328 = math.sqrt %327 : vector<2x1xf32>
      %329 = vector.broadcast %328 : vector<2x1xf32> to vector<2x32xf32>
      %330 = arith.mulf %315, %329 : vector<2x32xf32>
      %331 = vector.broadcast %320 : vector<1x32xf32> to vector<2x32xf32>
      %332 = arith.mulf %331, %330 : vector<2x32xf32>
      %c0_167 = arith.constant 0 : index
      %c0_168 = arith.constant 0 : index
      %333 = vector.load %arg12[%c0_167, %c0_168] : memref<32x64xf32, #tpu.memory_space<vmem>>, vector<32x64xf32>
      %cst_169 = arith.constant dense<0.000000e+00> : vector<2x64xf32>
      %334 = tpu.matmul %332, %333, %cst_169 {dimension_numbers = #tpu.dot_dimension_numbers<[1], [0], [0], [1], [0, 0, 1, 1], [], []>, precision = #tpu.contract_precision<fp32>} : vector<2x32xf32>, vector<32x64xf32>, vector<2x64xf32> -> vector<2x64xf32>
      %c0_170 = arith.constant 0 : index
      %c0_171 = arith.constant 0 : index
      %335 = vector.load %arg15[%c0_170, %c0_171] : memref<2x64xf32, #tpu.memory_space<vmem>>, vector<2x64xf32>
      tpu.vector_store %arg15[%c0_170, %c0_171], %334 {strides = array<i32>} : memref<2x64xf32, #tpu.memory_space<vmem>>, vector<2x64xf32>,
    } else {
    }
    return
  }
  func.func @transform_0(%arg0: i32) -> i32 {
    %c0_i32 = arith.constant 0 : i32
    %c0_i32_0 = arith.constant 0 : i32
    return %c0_i32 : i32
  }
  func.func @transform_1(%arg0: i32) -> (i32, i32) {
    %c0_i32 = arith.constant 0 : i32
    %c0_i32_0 = arith.constant 0 : i32
    %c0_i32_1 = arith.constant 0 : i32
    return %c0_i32, %c0_i32_0 : i32, i32
  }
  func.func @transform_2(%arg0: i32) -> (i32, i32) {
    %c0_i32 = arith.constant 0 : i32
    %c0_i32_0 = arith.constant 0 : i32
    %c0_i32_1 = arith.constant 0 : i32
    return %c0_i32, %c0_i32_0 : i32, i32
  }
  func.func @transform_3(%arg0: i32) -> (i32, i32) {
    %c0_i32 = arith.constant 0 : i32
    %c0_i32_0 = arith.constant 0 : i32
    %c0_i32_1 = arith.constant 0 : i32
    return %c0_i32, %c0_i32_0 : i32, i32
  }
  func.func @transform_4(%arg0: i32) -> (i32, i32, i32) {
    %c0_i32 = arith.constant 0 : i32
    %c0_i32_0 = arith.constant 0 : i32
    %c0_i32_1 = arith.constant 0 : i32
    return %arg0, %c0_i32, %c0_i32_0 : i32, i32, i32
  }
  func.func @transform_5(%arg0: i32) -> (i32, i32, i32) {
    %c0_i32 = arith.constant 0 : i32
    %c0_i32_0 = arith.constant 0 : i32
    %c0_i32_1 = arith.constant 0 : i32
    return %arg0, %c0_i32, %c0_i32_0 : i32, i32, i32
  }
  func.func @transform_6(%arg0: i32) -> (i32, i32, i32) {
    %c0_i32 = arith.constant 0 : i32
    %c0_i32_0 = arith.constant 0 : i32
    %c0_i32_1 = arith.constant 0 : i32
    return %arg0, %c0_i32, %c0_i32_0 : i32, i32, i32
  }
  func.func @transform_7(%arg0: i32) -> (i32, i32, i32) {
    %c0_i32 = arith.constant 0 : i32
    %c0_i32_0 = arith.constant 0 : i32
    %c0_i32_1 = arith.constant 0 : i32
    return %arg0, %c0_i32, %c0_i32_0 : i32, i32, i32
  }
  func.func @transform_8(%arg0: i32) -> (i32, i32, i32) {
    %c0_i32 = arith.constant 0 : i32
    %c0_i32_0 = arith.constant 0 : i32
    %c0_i32_1 = arith.constant 0 : i32
    return %arg0, %c0_i32, %c0_i32_0 : i32, i32, i32
  }
  func.func @transform_9(%arg0: i32) -> (i32, i32, i32) {
    %c0_i32 = arith.constant 0 : i32
    %c0_i32_0 = arith.constant 0 : i32
    %c0_i32_1 = arith.constant 0 : i32
    return %arg0, %c0_i32, %c0_i32_0 : i32, i32, i32
  }
  func.func @transform_10(%arg0: i32) -> (i32, i32) {
    %c0_i32 = arith.constant 0 : i32
    %c0_i32_0 = arith.constant 0 : i32
    %c0_i32_1 = arith.constant 0 : i32
    return %c0_i32, %c0_i32_0 : i32, i32
  }
  func.func @transform_11(%arg0: i32) -> (i32, i32) {
    %c0_i32 = arith.constant 0 : i32
    %c0_i32_0 = arith.constant 0 : i32
    %c0_i32_1 = arith.constant 0 : i32
    return %c0_i32, %c0_i32_0 : i32, i32
  }
  func.func @transform_12(%arg0: i32) -> (i32, i32, i32, i32) {
    %c0_i32 = arith.constant 0 : i32
    %c0_i32_0 = arith.constant 0 : i32
    %c0_i32_1 = arith.constant 0 : i32
    %c0_i32_2 = arith.constant 0 : i32
    return %arg0, %c0_i32, %c0_i32_0, %c0_i32_1 : i32, i32, i32, i32
  }
  func.func @transform_13(%arg0: i32) -> (i32, i32, i32, i32) {
    %c0_i32 = arith.constant 0 : i32
    %c0_i32_0 = arith.constant 0 : i32
    %c0_i32_1 = arith.constant 0 : i32
    %c0_i32_2 = arith.constant 0 : i32
    return %arg0, %c0_i32, %c0_i32_0, %c0_i32_1 : i32, i32, i32, i32
  }
  func.func @transform_14(%arg0: i32) -> (i32, i32) {
    %c0_i32 = arith.constant 0 : i32
    %c0_i32_0 = arith.constant 0 : i32
    %c0_i32_1 = arith.constant 0 : i32
    return %c0_i32, %c0_i32_0 : i32, i32
  }
  func.func @transform_15(%arg0: i32) -> (i32, i32, i32, i32) {
    %c0_i32 = arith.constant 0 : i32
    %c0_i32_0 = arith.constant 0 : i32
    %c0_i32_1 = arith.constant 0 : i32
    %c0_i32_2 = arith.constant 0 : i32
    return %arg0, %c0_i32, %c0_i32_0, %c0_i32_1 : i32, i32, i32, i32
  }
  func.func @transform_16(%arg0: i32) -> (i32, i32, i32, i32) {
    %c0_i32 = arith.constant 0 : i32
    %c0_i32_0 = arith.constant 0 : i32
    %c0_i32_1 = arith.constant 0 : i32
    %c0_i32_2 = arith.constant 0 : i32
    return %arg0, %c0_i32, %c0_i32_0, %c0_i32_1 : i32, i32, i32, i32
  }
}

</mosaic_0001>

<bundles_post_ra>
// kernel: tile.30
= control target key start
LH: loop header
LB: loop body
LE: loop exit
PB: predicated region body
PF: predicated region fallthrough
CT: control target
= control target key end

     0   :  { %s22_s0 = inlined_call_operand.vmem [shape: f32[8], index: 0, kind: input, shape index: {}]   ;;  %s23_s1 = inlined_call_operand.vmem [shape: f32[2,8], index: 1, kind: output, shape index: {}]  }
   0x1   :  { %v4_v0 = vld [vmem:[%s22_s0] ss:$0 sm:$0xff] }
   0x2   :  { %5 = vst [vmem:[%s23_s1] sm:$0x3] %v4_v0 }

// kernel: tile.25
= control target key start
LH: loop header
LB: loop body
LE: loop exit
PB: predicated region body
PF: predicated region fallthrough
CT: control target
= control target key end

     0   :  { %vm8_vm0 = vcmask 15360   ;;  %s40_s8 = smov 2   ;;  %s41_s9 = smov 4   ;;  %vm14_vm1 = vcmask 64560   ;;  %vm20_vm2 = vcmask 48160   ;;  %vm26_vm3 = vcmask 31760   ;;  %s58_s0 = inlined_call_operand.vmem [shape: f32[4,2], index: 0, kind: input, shape index: {}]   ;;  %s59_s1 = inlined_call_operand.vmem [shape: f32[8], index: 1, kind: output, shape index: {}]  }
   0x1   :  { %v5_v0 = vld [vmem:[%s58_s0] sm:$0xf]  ;;  %s39_s0 = smov 6  }
   0x2   :  { %6 = vst [vmem:[#allocation1] sm:$0xf] %v5_v0 }
   0x9   :  { %v11_v1 = vld [vmem:[#allocation1 + $0x3] sm:$0x1]   ;;  %v23_v2 = vld [vmem:[#allocation1 + $0x1] sm:$0x1]   ;;  %v7_v3 = vld [vmem:[#allocation1] sm:$0x1]  }
   0xa   :  { %12 = vrot.lane.b32.xlu0 %v11_v1, %s39_s0  ;;  %24 = vrot.lane.b32.xlu1 %v23_v2, %s40_s8  ;;  %v17_v4 = vld [vmem:[#allocation1 + $0x2] sm:$0x1]   ;;  %9 = vst.msk [vmem:[#allocation0] sm:$0x1] %vm8_vm0, %v7_v3  }
   0xe   :  { %18 = vrot.lane.b32.xlu0 %v17_v4, %s41_s9 }
  0x7c   :  { %v13_v5 = vpop.permute.xlu0 %12   ;;  %v25_v6 = vpop.permute.xlu1 %24  }
  0x7d   :  { %15 = vst.msk [vmem:[#allocation0] sm:$0x1] %vm14_vm1, %v13_v5  }
  0x80   :  { %v19_v7 = vpop.permute.xlu0 %18  }
  0x81   :  { %21 = vst.msk [vmem:[#allocation0] sm:$0x1] %vm20_vm2, %v19_v7  }
  0x82   :  { %27 = vst.msk [vmem:[#allocation0] sm:$0x1] %vm26_vm3, %v25_v6  }
  0x89   :  { %v32_v8 = vld [vmem:[#allocation0] sm:$0x1] }
  0x8a   :  { %35 = vst [vmem:[%s59_s1] sm:$0x1] %v32_v8 }

// kernel: tile.31
= control target key start
LH: loop header
LB: loop body
LE: loop exit
PB: predicated region body
PF: predicated region fallthrough
CT: control target
= control target key end

     0   :  { %vm8_vm0 = vcmask 64512   ;;  %vm14_vm1 = vcmask 130112   ;;  %s42_s0 = inlined_call_operand.vmem [shape: f32[2,8], index: 0, kind: input, shape index: {}]   ;;  %s43_s1 = inlined_call_operand.vmem [shape: f32[16], index: 1, kind: output, shape index: {}]  }
   0x1   :  { %v5_v0 = vld [vmem:[%s42_s0] sm:$0x3]  ;;  %s25_s0 = smov 8  }
   0x2   :  { %6 = vst [vmem:[#allocation1] sm:$0x3] %v5_v0 }
   0x9   :  { %v11_v1 = vld [vmem:[#allocation1 + $0x1] sm:$0x1]   ;;  %v7_v2 = vld [vmem:[#allocation1] sm:$0x1]  }
   0xa   :  { %12 = vrot.lane.b32.xlu0 %v11_v1, %s25_s0  ;;  %9 = vst.msk [vmem:[#allocation0] sm:$0x1] %vm8_vm0, %v7_v2  }
  0x7c   :  { %v13_v3 = vpop.permute.xlu0 %12  }
  0x7d   :  { %15 = vst.msk [vmem:[#allocation0] sm:$0x1] %vm14_vm1, %v13_v3  }
  0x84   :  { %v20_v4 = vld [vmem:[#allocation0] sm:$0x1] }
  0x85   :  { %23 = vst [vmem:[%s43_s1] sm:$0x1] %v20_v4 }

// kernel: tile.26
= control target key start
LH: loop header
LB: loop body
LE: loop exit
PB: predicated region body
PF: predicated region fallthrough
CT: control target
= control target key end

     0   :  { %s22_s0 = inlined_call_operand.vmem [shape: f32[8], index: 0, kind: input, shape index: {}]   ;;  %s23_s1 = inlined_call_operand.vmem [shape: f32[4,8], index: 1, kind: output, shape index: {}]  }
   0x1   :  { %v4_v0 = vld [vmem:[%s22_s0] ss:$0 sm:$0xff] }
   0x2   :  { %5 = vst [vmem:[%s23_s1] sm:$0xf] %v4_v0 }

// kernel: tile.27
= control target key start
LH: loop header
LB: loop body
LE: loop exit
PB: predicated region body
PF: predicated region fallthrough
CT: control target
= control target key end

     0   :  { %vm8_vm0 = vcmask 64512   ;;  %s40_s8 = smov 8   ;;  %s41_s9 = smov 16   ;;  %vm14_vm1 = vcmask 261312   ;;  %vm20_vm2 = vcmask 195712   ;;  %vm26_vm3 = vcmask 130112   ;;  %s58_s0 = inlined_call_operand.vmem [shape: f32[4,8], index: 0, kind: input, shape index: {}]   ;;  %s59_s1 = inlined_call_operand.vmem [shape: f32[32], index: 1, kind: output, shape index: {}]  }
   0x1   :  { %v5_v0 = vld [vmem:[%s58_s0] sm:$0xf]  ;;  %s39_s0 = smov 24  }
   0x2   :  { %6 = vst [vmem:[#allocation1] sm:$0xf] %v5_v0 }
   0x9   :  { %v11_v1 = vld [vmem:[#allocation1 + $0x3] sm:$0x1]   ;;  %v23_v2 = vld [vmem:[#allocation1 + $0x1] sm:$0x1]   ;;  %v7_v3 = vld [vmem:[#allocation1] sm:$0x1]  }
   0xa   :  { %12 = vrot.lane.b32.xlu0 %v11_v1, %s39_s0  ;;  %24 = vrot.lane.b32.xlu1 %v23_v2, %s40_s8  ;;  %v17_v4 = vld [vmem:[#allocation1 + $0x2] sm:$0x1]   ;;  %9 = vst.msk [vmem:[#allocation0] sm:$0x1] %vm8_vm0, %v7_v3  }
   0xe   :  { %18 = vrot.lane.b32.xlu0 %v17_v4, %s41_s9 }
  0x7c   :  { %v13_v5 = vpop.permute.xlu0 %12   ;;  %v25_v6 = vpop.permute.xlu1 %24  }
  0x7d   :  { %15 = vst.msk [vmem:[#allocation0] sm:$0x1] %vm14_vm1, %v13_v5  }
  0x80   :  { %v19_v7 = vpop.permute.xlu0 %18  }
  0x81   :  { %21 = vst.msk [vmem:[#allocation0] sm:$0x1] %vm20_vm2, %v19_v7  }
  0x82   :  { %27 = vst.msk [vmem:[#allocation0] sm:$0x1] %vm26_vm3, %v25_v6  }
  0x89   :  { %v32_v8 = vld [vmem:[#allocation0] sm:$0x1] }
  0x8a   :  { %35 = vst [vmem:[%s59_s1] sm:$0x1] %v32_v8 }

// kernel: decode_step_pallas.1
= control target key start
LH: loop header
LB: loop body
LE: loop exit
PB: predicated region body
PF: predicated region fallthrough
CT: control target
= control target key end

     0   :  { %s15019_s0 = inlined_call_operand.<no memory space> [shape: s32[1], index: 0, kind: input, shape index: {}]   ;;  %s15020_s1 = inlined_call_operand.vmem [shape: f32[2,32], index: 1, kind: input, shape index: {}]   ;;  %s15021_s2 = inlined_call_operand.vmem [shape: f32[1,64], index: 2, kind: input, shape index: {}]   ;;  %s15022_s3 = inlined_call_operand.vmem [shape: f32[1,64], index: 3, kind: input, shape index: {}]   ;;  %s15023_s4 = inlined_call_operand.vmem [shape: f32[2,1,32], index: 4, kind: input, shape index: {}]   ;;  %s15024_s5 = inlined_call_operand.vmem [shape: f32[2,32,128], index: 5, kind: input, shape index: {}]   ;;  %s15025_s6 = inlined_call_operand.vmem [shape: f32[2,32,32], index: 6, kind: input, shape index: {}]   ;;  %s15026_s7 = inlined_call_operand.vmem [shape: f32[2,1,32], index: 7, kind: input, shape index: {}]   ;;  %s15027_s8 = inlined_call_operand.vmem [shape: f32[2,32,96], index: 8, kind: input, shape index: {}]   ;;  %s15028_s9 = inlined_call_operand.vmem [shape: f32[2,96,32], index: 9, kind: input, shape index: {}]   ;;  %s15029_s10 = inlined_call_operand.vmem [shape: f32[1,32], index: 10, kind: input, shape index: {}]   ;;  %s15030_s11 = inlined_call_operand.vmem [shape: f32[32,64], index: 11, kind: input, shape index: {}]   ;;  %s15031_s12 = inlined_call_operand.vmem [shape: f32[2,4,16,8], index: 12, kind: input, shape index: {}, may-alias: {12,15}]   ;;  %s15032_s13 = inlined_call_operand.vmem [shape: f32[2,4,16,8], index: 13, kind: input, shape index: {}, may-alias: {13,16}]   ;;  %s15033_s14 = inlined_call_operand.hbm [shape: f32[2,64], index: 14, kind: output, shape index: {0}]   ;;  %s15034_s15 = inlined_call_operand.vmem [shape: f32[2,4,16,8], index: 15, kind: output, shape index: {1}, may-alias: {12,15}]   ;;  %s15035_s16 = inlined_call_operand.vmem [shape: f32[2,4,16,8], index: 16, kind: output, shape index: {2}, may-alias: {13,16}]  }
   0x1   :  { %15038 = sst [smem:[#allocation9_spill]] %s15019_s0 }
   0x2   :  { %15039 = sst [smem:[#allocation10_spill]] %s15021_s2 }
   0x3   :  { %15040 = sst [smem:[#allocation11_spill]] %s15024_s5 }
   0x4   :  { %15041 = sst [smem:[#allocation12_spill]] %s15025_s6 }
   0x5   :  { %15042 = sst [smem:[#allocation13_spill]] %s15027_s8 }
   0x6   :  { %15043 = sst [smem:[#allocation14_spill]] %s15029_s10 }
   0x7   :  { %15044 = sst [smem:[#allocation15_spill]] %s15030_s11 }
   0x8   :  { %15045 = sst [smem:[#allocation16_spill]] %s15033_s14 }
   0x9   :  { %s15046_s23 = sld [smem:[#allocation9_spill]] }
   0xf   :  { %22 = sst [smem:[#allocation4]] %s15046_s23 }
  0x10   :  { %23 = vsyncpa [#allocation6], 0  ;;  %s13175_s24 = smov 0  }
  0x11 LB: > { %15047 = sst [smem:[#allocation8_spill]] %s13065_s24  ;;  %s13181_s25 = sadd.s32 4294967295, %s13065_s24   ;;  %s13065_s24 = sphi %s13175_s24, %s29_s24  }
  0x12   : > { %p11310_p0 = scmp.ge.s32.totalorder %s13065_s24, 1  ;;  %p530_p1 = scmp.lt.s32.totalorder %s13065_s24, 3 }
  0x14   : > { %p531_p2 = pnand %p11310_p0, %p530_p1 }
  0x15   : > { %p616_p3 = scmp.lt.s32.totalorder (!%p531_p2), %s13181_s25, 1  ;;  %s13186_s26 = sld [smem:[#allocation4]] (!%p531_p2) }
  0x16   : > { %534 = sbr.rel (%p531_p2) target bundleno = 6793 (0x1a89), region = 76  ;;  %s15048_s5 = sld [smem:[#allocation11_spill]] (!%p531_p2) }
  0x17   : > { %s15049_s6 = sld [smem:[#allocation12_spill]] (!%p531_p2)  ;;  %p11326_p4 = scmp.ne.s32.totalorder (!%p531_p2), %s13181_s25, 0 }
  0x18   : > { %s15050_s8 = sld [smem:[#allocation13_spill]] (!%p531_p2) }
  0x1b   : > { %s13189_s27 = scalar_select %p616_p3, %s13181_s25, 1 }
  0x1d   : > { %s11362_s0 = sshll.u32 %s13189_s27, 5  ;;  %s12953_s30 = smul.u32 96, %s13189_s27 }
  0x1e   : > { %s13199_s19 = scalar_lea.vmem %s15048_s5, %s11362_s0  ;;  %s13204_s22 = scalar_lea.vmem %s15049_s6, %s11362_s0 }
  0x1f   : > { %s13213_s10 = scalar_lea.vmem %s15050_s8, %s11362_s0  ;;  %s11365_s11 = sshll.u32 %s13189_s27, 6 }
  0x20   : > { %s13220_s18 = scalar_lea.vmem %s15031_s12, %s11365_s11  ;;  %s13225_s21 = scalar_lea.vmem %s15032_s13, %s11365_s11 }
  0x21   : > { %s13230_s23 = scalar_lea.vmem %s15028_s9, %s12953_s30  ;;  %s13235_s29 = scalar_lea.vmem %s15034_s15, %s11365_s11 }
  0x22   : > { %s13240_s2 = scalar_lea.vmem %s15035_s16, %s11365_s11  ;;  %666 = sbr.rel (%p11326_p4) target bundleno = 41 (0x29), region = 80 }
  0x27   : > { %v667_v0 = vld [vmem:[%s15020_s1] sm:$0x3]  ;;  %vm668_vm0 = vcmask 254976  }
  0x28   : > { %669 = vst.msk [vmem:[#allocation2] sm:$0x3] %vm668_vm0, %v667_v0 }
  0x29 PF: > { %vm673_vm1 = vcmask 254976   ;;  %v698_v4 = vld [vmem:[%s13199_s19 + $0x18] sm:$0xff]  ;;  %v697_v6 = vld [vmem:[%s13199_s19 + $0x10] sm:$0xff]  ;;  %v696_v9 = vld [vmem:[%s13199_s19 + $0x8] sm:$0xff]  ;;  %v13067_v18 = vmov 0.0   ;;  %vm13068_vm2 = vmmov 0   ;;  %s15051_s28 = scalar_lea.vmem %s15023_s4, %s13189_s27 }
  0x2a   : > { %v13252_v5 = vand.u32 4294901760, %v698_v4  ;;  %v13258_v8 = vand.u32 4294901760, %v697_v6  ;;  %v13265_v12 = vand.u32 4294901760, %v696_v9  ;;  %v695_v13 = vld [vmem:[%s13199_s19] sm:$0xff]  ;;  %11866 = vmatprep.subr.mxu1 %v13067_v18  ;;  %11855 = vmatprep.subr.mxu0 %v13067_v18  ;;  %s13069_s11 = smov 64   ;;  %vm699_vm5 = vcmask 261120  }
  0x2b   : > { %v13275_v17 = vand.u32 4294901760, %v695_v13  ;;  %11874 = vmatprep.mubr.msk.f32.mxu1 %vm13068_vm2, %v13067_v18  ;;  %11863 = vmatprep.mubr.msk.f32.mxu0 %vm13068_vm2, %v13067_v18  ;;  %v11329_v29 = vld [vmem:[%s15022_s3] ss:$0 sm:$0xff]  ;;  %v1234_v47 = vld [vmem:[%s13225_s21 + $0x8] sm:$0xff]  ;;  %s13070_s20 = smov 48   ;;  %s13071_s24 = smov 32  }
  0x2c   : > { %v13256_v7 = vsub.f32 %v698_v4, %v13252_v5  ;;  %v13263_v11 = vsub.f32 %v697_v6, %v13258_v8  ;;  %v13273_v16 = vsub.f32 %v696_v9, %v13265_v12  ;;  %11856 = vmatpush3.msra.mxu0 %v13252_v5  ;;  %v11327_v37 = vld [vmem:[%s15051_s28] ss:$0 sm:$0xff]  ;;  %v1218_v4 = vld [vmem:[%s13220_s18 + $0x8] sm:$0xff]  ;;  %v1211_v6 = vlaneseq  ;;  %s15052_s5 = sld [smem:[#allocation10_spill]]  ;;  %s13072_s17 = smov 96  }
  0x2d   : > { %v13283_v22 = vsub.f32 %v695_v13, %v13275_v17  ;;  %11857 = vmatprep.subr.mxu0 %v13067_v18  ;;  %v1233_v48 = vld [vmem:[%s13225_s21] sm:$0xff]  ;;  %vm1253_vm8 = vcmask 64512   ;;  %vm1737_vm10 = vcmask 122880   ;;  %s13074_s6 = smov 120   ;;  %s13075_s8 = smov 40   ;;  %vm1749_vm11 = vcmask 130048  }
  0x2e   : > { %v809_v10 = vand.u32 4294901760, %v13256_v7  ;;  %v816_v15 = vand.u32 4294901760, %v13263_v11  ;;  %v823_v21 = vand.u32 4294901760, %v13273_v16  ;;  %11858 = vmatpush3.msra.mxu0 %v13258_v8  ;;  %vm2212_vm12 = vcmask 57344   ;;  %s13077_s30 = smov 112   ;;  %s13078_s19 = smov 56  }
  0x2f   : > { %v13246_v1 = vld [vmem:[#allocation2] sm:$0x3]  ;;  %v830_v25 = vand.u32 4294901760, %v13283_v22  ;;  %11859 = vmatprep.subr.mxu0 %v13067_v18  ;;  %s13079_s28 = smov 72   ;;  %s13080_s14 = smov 104   ;;  %vm3156_vm13 = vcmask 122944  }
  0x30   : > { %v672_v2 = vmul.f32 %v13246_v1, %v13246_v1  ;;  %v810_v14 = vsub.f32 %v13256_v7, %v809_v10  ;;  %v817_v20 = vsub.f32 %v13263_v11, %v816_v15  ;;  %v824_v24 = vsub.f32 %v13273_v16, %v823_v21  ;;  %11860 = vmatpush3.msra.mxu0 %v13265_v12  ;;  %p11356_p5 = scmp.ne.s32.totalorder %s13181_s25, 1 }
  0x31   : > { %v831_v27 = vsub.f32 %v13283_v22, %v830_v25  ;;  %11861 = vmatprep.subr.mxu0 %v13067_v18  ;;  %vm4152_vm14 = vcmask 188544   ;;  %vm5096_vm15 = vcmask 254144  }
  0x32   : > { %v674_v3 = vsel %vm673_vm1, %v672_v2, 0.0  ;;  %v811_v19 = vand.u32 4294901760, %v810_v14  ;;  %v818_v23 = vand.u32 4294901760, %v817_v20  ;;  %v825_v26 = vand.u32 4294901760, %v824_v24  ;;  %11862 = vmatpush3.msra.mxu0 %v13275_v17 }
  0x33   : > { %675 = vadd.xlane.f32.xlu0 %v674_v3  ;;  %v832_v28 = vand.u32 4294901760, %v831_v27  ;;  %11877 = vmatprep.subr.mxu0 %v13067_v18 }
  0x34   : > { %11867 = vmatpush3.msra.mxu1 %v811_v19 }
  0x35   : > { %11868 = vmatprep.subr.mxu1 %v13067_v18 }
  0x36   : > { %11869 = vmatpush3.msra.mxu1 %v818_v23 }
  0x37   : > { %11870 = vmatprep.subr.mxu1 %v13067_v18 }
  0x38   : > { %11871 = vmatpush3.msra.mxu1 %v825_v26 }
  0x39   : > { %11872 = vmatprep.subr.mxu1 %v13067_v18 }
  0x3a   : > { %11873 = vmatpush3.msra.mxu1 %v832_v28 }
  0x3b   : > { %11888 = vmatprep.subr.mxu1 %v13067_v18 }
  0x49   : > { %1202 = vrot.lane.b32.xlu0 %v11329_v29, %s13069_s11 }
  0x4d   : > { %1239 = vrot.lane.b32.xlu0 %v1234_v47, %s13070_s20 }
  0x51   : > { %1237 = vrot.lane.b32.xlu0 %v1233_v48, %s13070_s20 }
  0xbc   : > { %v676_v30 = vpop.xlane.xlu0 %675 }
  0xbd   : > { %v678_v31 = vmul.f32 0.03125, %v676_v30 }
  0xbf   : > { %v679_v32 = vadd.f32 1e-05, %v678_v31 }
  0xc1   : > { %12988 = vrsqrt.f32 %v679_v32  ;;  %vm682_vm3 = vcmp.eq.f32.partialorder %v679_v32, inf  ;;  %v685_v35 = vand.u32 2147483648, %v679_v32  ;;  %vm684_vm4 = vcmp.eq.f32.partialorder %v679_v32, 0.0 }
  0xce   : > { %v12989_v33 = vpop.eup %12988 }
  0xcf   : > { %v681_v34 = vmul.f32 %v12989_v33, %v679_v32 }
  0xd1   : > { %v683_v36 = vsel %vm682_vm3, %v679_v32, %v681_v34 }
  0xd2   : > { %v686_v38 = vsel %vm684_vm4, %v685_v35, %v683_v36  ;;  %vm10001_vm4 = vcmask 785408  }
  0xd3   : > { %v687_v39 = vmul.f32 %v686_v38, %v13246_v1  ;;  %v1203_v1 = vpop.permute.xlu0 %1202 }
  0xd5   : > { %v694_v40 = vmul.f32 %v11327_v37, %v687_v39 }
  0xd7   : > { %v701_v41 = vsel %vm699_vm5, %v694_v40, 0 }
  0xd8   : > { %v772_v42 = vand.u32 4294901760, %v701_v41 }
  0xda   : > { %v773_v43 = vsub.f32 %v701_v41, %v772_v42  ;;  %11875 = vmatmul.mubr.f32.vlgmr.msra.gmra.mxu1 %v772_v42 }
  0xdb   : > { %11889 = vmatpush3.msra.mxu1 %v13252_v5  ;;  %11896 = vmatprep.mubr.msk.f32.mxu1 %vm13068_vm2, %v13067_v18 }
  0xdc   : > { %11890 = vmatprep.subr.mxu1 %v13067_v18  ;;  %v774_v44 = vand.u32 4294901760, %v773_v43 }
  0xdd   : > { %11891 = vmatpush3.msra.mxu1 %v13258_v8 }
  0xde   : > { %11892 = vmatprep.subr.mxu1 %v13067_v18  ;;  %v775_v45 = vsub.f32 %v773_v43, %v774_v44 }
  0xdf   : > { %11893 = vmatpush3.msra.mxu1 %v13265_v12 }
  0xe0   : > { %11894 = vmatprep.subr.mxu1 %v13067_v18  ;;  %v776_v46 = vand.u32 4294901760, %v775_v45 }
  0xe1   : > { %11895 = vmatpush3.msra.mxu1 %v13275_v17 }
  0xe2   : > { %11897 = vmatmul.mubr.f32.vlgmr.msra.gmra.mxu1 %v774_v44  ;;  %11910 = vmatprep.subr.mxu1 %v13067_v18 }
  0xe3   : > { %11864 = vmatmul.mubr.f32.vlgmr.msra.gmra.mxu0 %v776_v46  ;;  %11911 = vmatpush3.msra.mxu1 %v13252_v5  ;;  %v1217_v5 = vld [vmem:[%s13220_s18] sm:$0xff] }
  0xe4   : > { %11878 = vmatpush3.msra.mxu0 %v13256_v7  ;;  %11912 = vmatprep.subr.mxu1 %v13067_v18  ;;  %v13378_v7 = vshrl.u32 %v1211_v6, 7 }
  0xe5   : > { %11879 = vmatprep.subr.mxu0 %v13067_v18  ;;  %11913 = vmatpush3.msra.mxu1 %v13258_v8  ;;  %v11328_v8 = vld [vmem:[%s15052_s5] ss:$0 sm:$0xff] }
  0xe6   : > { %11880 = vmatpush3.msra.mxu0 %v13263_v11  ;;  %11914 = vmatprep.subr.mxu1 %v13067_v18  ;;  %v1213_v9 = vadd.s32 8, %v13378_v7  ;;  %v1221_v11 = vsub.s32 0, %v13378_v7 }
  0xe7   : > { %11881 = vmatprep.subr.mxu0 %v13067_v18  ;;  %11915 = vmatpush3.msra.mxu1 %v13265_v12  ;;  %v13386_v12 = vstv %s13186_s26  ;;  %s13073_s26 = smov 80  }
  0xe8   : > { %11882 = vmatpush3.msra.mxu0 %v13273_v16  ;;  %11916 = vmatprep.subr.mxu1 %v13067_v18  ;;  %vm13391_vm6 = vcmp.eq.s32.totalorder %v1213_v9, %v13386_v12  ;;  %vm13404_vm7 = vcmp.eq.s32.totalorder %v13378_v7, %v13386_v12 }
  0xe9   : > { %11883 = vmatprep.subr.mxu0 %v13067_v18  ;;  %11885 = vmatprep.mubr.msk.f32.mxu0 %vm13068_vm2, %v13067_v18 }
  0xea   : > { %11884 = vmatpush3.msra.mxu0 %v13283_v22  ;;  %11917 = vmatpush3.msra.mxu1 %v13275_v17 }
  0xeb   : > { %11918 = vmatprep.mubr.msk.f32.mxu1 %vm13068_vm2, %v13067_v18  ;;  %11886 = vmatmul.mubr.f32.vlgmr.msra.gmra.mxu0 %v773_v43 }
  0xec   : > { %11899 = vmatprep.subr.mxu0 %v13067_v18  ;;  %11919 = vmatmul.mubr.f32.vlgmr.msra.gmra.mxu1 %v772_v42 }
  0xed   : > { %11900 = vmatpush3.msra.mxu0 %v809_v10  ;;  %11907 = vmatprep.mubr.msk.f32.mxu0 %vm13068_vm2, %v13067_v18 }
  0xee   : > { %11901 = vmatprep.subr.mxu0 %v13067_v18  ;;  %11928 = vmatprep.subr.mxu1 %v13067_v18 }
  0xef   : > { %11902 = vmatpush3.msra.mxu0 %v816_v15  ;;  %11932 = vmatprep.mubr.msk.f32.mxu1 %vm13068_vm2, %v13067_v18 }
  0xf0   : > { %11903 = vmatprep.subr.mxu0 %v13067_v18 }
  0xf1   : > { %11904 = vmatpush3.msra.mxu0 %v823_v21 }
  0xf2   : > { %11905 = vmatprep.subr.mxu0 %v13067_v18 }
  0xf3   : > { %11906 = vmatpush3.msra.mxu0 %v830_v25 }
  0xf4   : > { %11908 = vmatmul.mubr.f32.vlgmr.msra.gmra.mxu0 %v772_v42  ;;  %11921 = vmatprep.subr.mxu0 %v13067_v18 }
  0xf5   : > { %11925 = vmatprep.mubr.msk.f32.mxu0 %vm13068_vm2, %v13067_v18 }
 0x19a   : > { %v869_v49 = vpop.f32.mrf.mxu1 }
 0x19c   : > { %v11876_v50 = vpop.f32.mrf.mxu1 }
 0x1a2   : > { %v1026_v51 = vpop.f32.mrf.mxu1 }
 0x1a3   : > { %v778_v52 = vpop.f32.mrf.mxu0 }
 0x1a4   : > { %v11898_v53 = vpop.f32.mrf.mxu1  ;;  %v870_v57 = vadd.f32 %v869_v49, %v778_v52 }
 0x1a5   : > { %v11865_v54 = vpop.f32.mrf.mxu0 }
 0x1ab   : > { %v949_v55 = vpop.f32.mrf.mxu0 }
 0x1ac   : > { %v1184_v56 = vpop.f32.mrf.mxu1  ;;  %v950_v60 = vadd.f32 %v949_v55, %v870_v57 }
 0x1ad   : > { %v11887_v58 = vpop.f32.mrf.mxu0 }
 0x1ae   : > { %v11920_v59 = vpop.f32.mrf.mxu1  ;;  %v1027_v61 = vadd.f32 %v1026_v51, %v950_v60 }
 0x1b4   : > { %v1109_v62 = vpop.f32.mrf.mxu0 }
 0x1b5   : > { %v1110_v63 = vadd.f32 %v1109_v62, %v1027_v61 }
 0x1b6   : > { %v11909_v0 = vpop.f32.mrf.mxu0 }
 0x1b7   : > { %v1185_v2 = vadd.f32 %v1184_v56, %v1110_v63  ;;  %v1734_v56 = vand.u32 127, %v1211_v6 }
 0x1b9   : > { %v1205_v3 = vmul.f32 %v1203_v1, %v1185_v2  ;;  %v1195_v10 = vmul.f32 %v11328_v8, %v1185_v2  ;;  %vm13482_vm9 = vcmp.le.s32.totalorder %v1734_v56, %v13386_v12  ;;  %v1240_v1 = vpop.permute.xlu0 %1239 }
 0x1bb   : > { %1207 = vrot.lane.b32.xlu1 %v1205_v3, %s13069_s11  ;;  %s13076_s11 = smov 88  }
 0x1bf   : > { %1227 = vrot.lane.b32.xlu1 %v1218_v4, %s13071_s24 }
 0x1c3   : > { %1225 = vrot.lane.b32.xlu1 %v1217_v5, %s13071_s24 }
 0x22d   : > { %v1208_v13 = vpop.permute.xlu1 %1207 }
 0x22e   : > { %v13388_v14 = vadd.f32 %v1208_v13, %v1195_v10 }
 0x230   : > { %v13396_v16 = vrot.slane %v13388_v14, %v1221_v11  ;;  %v1267_v23 = vsel %vm1253_vm8, %v13388_v14, 0 }
 0x231   : > { %v1228_v17 = vpop.permute.xlu1 %1227  ;;  %v1340_v24 = vand.u32 4294901760, %v1267_v23 }
 0x232   : > { %v1232_v19 = vsel %vm13391_vm6, %v13396_v16, %v1228_v17  ;;  %v1244_v2 = vsel %vm13391_vm6, %v13396_v16, %v1240_v1 }
 0x233   : > { %1249 = vrot.lane.b32.xlu1 %v1232_v19, %s13072_s17  ;;  %v1341_v25 = vsub.f32 %v1267_v23, %v1340_v24  ;;  %v1238_v19 = vpop.permute.xlu0 %1237 }
 0x235   : > { %v1226_v20 = vpop.permute.xlu1 %1225  ;;  %v1342_v28 = vand.u32 4294901760, %v1341_v25 }
 0x236   : > { %v1231_v22 = vsel %vm13404_vm7, %v13396_v16, %v1226_v20  ;;  %v1243_v20 = vsel %vm13404_vm7, %v13396_v16, %v1238_v19 }
 0x237   : > { %1247 = vrot.lane.b32.xlu1 %v1231_v22, %s13072_s17  ;;  %v1343_v33 = vsub.f32 %v1341_v25, %v1342_v28 }
 0x239   : > { %v1344_v38 = vand.u32 4294901760, %v1343_v33 }
 0x2a5   : > { %v1250_v26 = vpop.permute.xlu1 %1249 }
 0x2a6   : > { %1255 = vst.msk [vmem:[%s13235_s29 + $0x8] sm:$0xff] %vm1253_vm8, %v1250_v26  ;;  %v1271_v27 = vsel %vm1253_vm8, %v1250_v26, 0 }
 0x2a7   : > { %v13417_v29 = vand.u32 4294901760, %v1271_v27 }
 0x2a9   : > { %v13420_v30 = vsub.f32 %v1271_v27, %v13417_v29  ;;  %11922 = vmatpush3.xpose.msra.mxu0 %v13417_v29  ;;  %v1248_v31 = vpop.permute.xlu1 %1247 }
 0x2aa   : > { %1254 = vst.msk [vmem:[%s13235_s29] sm:$0xff] %vm1253_vm8, %v1248_v31  ;;  %v1269_v32 = vsel %vm1253_vm8, %v1248_v31, 0  ;;  %11923 = vmatprep.subr.mxu0 %v13067_v18 }
 0x2ab   : > { %v13428_v34 = vand.u32 4294901760, %v13420_v30  ;;  %v13430_v35 = vand.u32 4294901760, %v1269_v32 }
 0x2ad   : > { %v13433_v36 = vsub.f32 %v1269_v32, %v13430_v35  ;;  %11924 = vmatpush3.xpose.msra.mxu0 %v13430_v35  ;;  %v1382_v37 = vsub.f32 %v13420_v30, %v13428_v34 }
 0x2ae   : > { %11935 = vmatprep.subr.mxu0 %v13067_v18 }
 0x2af   : > { %v13440_v39 = vand.u32 4294901760, %v13433_v36  ;;  %v13442_v40 = vand.u32 4294901760, %v1382_v37 }
 0x2b0   : > { %11926 = vmatmul.mubr.f32.vlgmr.msra.gmra.mxu0 %v1344_v38 }
 0x2b1   : > { %11929 = vmatpush3.xpose.msra.mxu1 %v13442_v40  ;;  %11936 = vmatpush3.xpose.msra.mxu0 %v13420_v30  ;;  %v1389_v41 = vsub.f32 %v13433_v36, %v13440_v39  ;;  %v11331_v22 = vld [vmem:[%s13220_s18 + $0x18] sm:$0xff]  ;;  %v11330_v23 = vld [vmem:[%s13220_s18 + $0x10] sm:$0xff] }
 0x2b2   : > { %11930 = vmatprep.subr.mxu1 %v13067_v18  ;;  %11937 = vmatprep.subr.mxu0 %v13067_v18 }
 0x2b3   : > { %v13450_v42 = vand.u32 4294901760, %v1389_v41  ;;  %11939 = vmatprep.mubr.msk.f32.mxu0 %vm13068_vm2, %v13067_v18 }
 0x2b5   : > { %11931 = vmatpush3.xpose.msra.mxu1 %v13450_v42  ;;  %11938 = vmatpush3.xpose.msra.mxu0 %v13433_v36 }
 0x2b6   : > { %11942 = vmatprep.subr.mxu1 %v13067_v18  ;;  %11949 = vmatprep.subr.mxu0 %v13067_v18 }
 0x2b8   : > { %11933 = vmatmul.mubr.f32.vlgmr.msra.gmra.mxu1 %v1340_v24  ;;  %11940 = vmatmul.mubr.f32.vlgmr.msra.gmra.mxu0 %v1341_v25 }
 0x2b9   : > { %11943 = vmatpush3.xpose.msra.mxu1 %v13417_v29  ;;  %11950 = vmatpush3.xpose.msra.mxu0 %v13428_v34 }
 0x2ba   : > { %11944 = vmatprep.subr.mxu1 %v13067_v18  ;;  %11951 = vmatprep.subr.mxu0 %v13067_v18 }
 0x2bb   : > { %11946 = vmatprep.mubr.msk.f32.mxu1 %vm13068_vm2, %v13067_v18  ;;  %11953 = vmatprep.mubr.msk.f32.mxu0 %vm13068_vm2, %v13067_v18 }
 0x2bd   : > { %11945 = vmatpush3.xpose.msra.mxu1 %v13430_v35  ;;  %11952 = vmatpush3.xpose.msra.mxu0 %v13440_v39 }
 0x2be   : > { %11956 = vmatprep.subr.mxu1 %v13067_v18  ;;  %11963 = vmatprep.subr.mxu0 %v13067_v18 }
 0x2c0   : > { %11947 = vmatmul.mubr.f32.vlgmr.msra.gmra.mxu1 %v1342_v28  ;;  %11954 = vmatmul.mubr.f32.vlgmr.msra.gmra.mxu0 %v1340_v24 }
 0x2c1   : > { %11957 = vmatpush3.xpose.msra.mxu1 %v13417_v29  ;;  %11960 = vmatprep.mubr.msk.f32.mxu1 %vm13068_vm2, %v13067_v18 }
 0x2c2   : > { %11958 = vmatprep.subr.mxu1 %v13067_v18  ;;  %11967 = vmatprep.mubr.msk.f32.mxu0 %vm13068_vm2, %v13067_v18 }
 0x2c5   : > { %11959 = vmatpush3.xpose.msra.mxu1 %v13430_v35 }
 0x2c6   : > { %11970 = vmatprep.subr.mxu1 %v13067_v18 }
 0x2c8   : > { %11961 = vmatmul.mubr.f32.vlgmr.msra.gmra.mxu1 %v1340_v24 }
 0x2c9   : > { %11974 = vmatprep.mubr.msk.f32.mxu1 %vm13068_vm2, %v13067_v18 }
 0x370   : > { %v1346_v43 = vpop.f32.mrf.mxu0 }
 0x372   : > { %v11927_v44 = vpop.f32.mrf.mxu0 }
 0x378   : > { %v1427_v45 = vpop.f32.mrf.mxu1  ;;  %v1503_v46 = vpop.f32.mrf.mxu0 }
 0x379   : > { %v1428_v49 = vadd.f32 %v1427_v45, %v1346_v43 }
 0x37a   : > { %v11934_v47 = vpop.f32.mrf.mxu1  ;;  %v11941_v48 = vpop.f32.mrf.mxu0 }
 0x37b   : > { %v1504_v52 = vadd.f32 %v1503_v46, %v1428_v49 }
 0x380   : > { %v1578_v50 = vpop.f32.mrf.mxu1  ;;  %v1655_v51 = vpop.f32.mrf.mxu0 }
 0x381   : > { %v1579_v55 = vadd.f32 %v1578_v50, %v1504_v52 }
 0x382   : > { %v11948_v53 = vpop.f32.mrf.mxu1  ;;  %v11955_v54 = vpop.f32.mrf.mxu0 }
 0x383   : > { %v1656_v57 = vadd.f32 %v1655_v51, %v1579_v55 }
 0x388   : > { %v1728_v58 = vpop.f32.mrf.mxu1 }
 0x389   : > { %v1729_v59 = vadd.f32 %v1728_v58, %v1656_v57 }
 0x38a   : > { %v11962_v60 = vpop.f32.mrf.mxu1 }
 0x38b   : > { %v1732_v62 = vmul.f32 0.35355338, %v1729_v59 }
 0x38d   : > { %v1736_v63 = vsel %vm13482_vm9, %v1732_v62, -1e+30 }
 0x38e   : > { %v1738_v0 = vsel %vm1737_vm10, %v1736_v63, -inf }
 0x38f   : > { %1739 = vmax.xlane.f32.xlu1 %v1738_v0 }
 0x3a0   : > { %1260 = vrot.lane.b32.xlu1 %v1244_v2, %s13073_s26 }
 0x3a4   : > { %2214 = vrot.lane.b32.xlu1 %v13388_v14, %s13074_s6 }
 0x418   : > { %v1740_v3 = vpop.xlane.xlu1 %1739 }
 0x419   : > { %v1741_v4 = vsub.f32 %v1736_v63, %v1740_v3 }
 0x41b   : > { %v1742_v5 = vmul.f32 1.442695, %v1741_v4 }
 0x41c   : > { %v1261_v6 = vpop.permute.xlu1 %1260 }
 0x41d   : > { %12990 = vpow2.f32 %v1742_v5  ;;  %1265 = vst.msk [vmem:[%s13240_s2 + $0x8] sm:$0xff] %vm1253_vm8, %v1261_v6  ;;  %v13497_v8 = vand.u32 4294901760, %v1261_v6 }
 0x41f   : > { %v13500_v9 = vsub.f32 %v1261_v6, %v13497_v8  ;;  %11964 = vmatpush3.msra.mxu0 %v13497_v8 }
 0x420   : > { %11965 = vmatprep.subr.mxu0 %v13067_v18  ;;  %v2215_v44 = vpop.permute.xlu1 %2214 }
 0x421   : > { %v13505_v10 = vand.u32 4294901760, %v13500_v9  ;;  %v2216_v47 = vsel %vm1253_vm8, %v2215_v44, 0 }
 0x422   : > { %v2285_v49 = vand.u32 4294901760, %v2216_v47 }
 0x423   : > { %v1862_v11 = vsub.f32 %v13500_v9, %v13505_v10 }
 0x424   : > { %v2286_v50 = vsub.f32 %v2216_v47, %v2285_v49 }
 0x425   : > { %v13509_v12 = vand.u32 4294901760, %v1862_v11 }
 0x427   : > { %11971 = vmatpush3.msra.mxu1 %v13509_v12 }
 0x428   : > { %11972 = vmatprep.subr.mxu1 %v13067_v18 }
 0x42a   : > { %v12991_v13 = vpop.eup %12990 }
 0x42b   : > { %v1744_v17 = vsel %vm1737_vm10, %v12991_v13, 0.0 }
 0x42c   : > { %1745 = vadd.xlane.f32.xlu0 %v1744_v17 }
 0x442   : > { %1258 = vrot.lane.b32.xlu0 %v1243_v20, %s13073_s26 }
 0x446   : > { %3165 = vrot.lane.b32.xlu0 %v11331_v22, %s13075_s8 }
 0x44a   : > { %3163 = vrot.lane.b32.xlu0 %v11330_v23, %s13075_s8 }
 0x4b5   : > { %v1746_v24 = vpop.xlane.xlu0 %1745 }
 0x4b6   : > { %12992 = vrcp.f32 %v1746_v24 }
 0x4b9   : > { %v1259_v25 = vpop.permute.xlu0 %1258 }
 0x4ba   : > { %1264 = vst.msk [vmem:[%s13240_s2] sm:$0xff] %vm1253_vm8, %v1259_v25  ;;  %v13524_v26 = vand.u32 4294901760, %v1259_v25 }
 0x4bc   : > { %v13527_v27 = vsub.f32 %v1259_v25, %v13524_v26  ;;  %11966 = vmatpush3.msra.mxu0 %v13524_v26 }
 0x4bd   : > { %11977 = vmatprep.subr.mxu0 %v13067_v18 }
 0x4be   : > { %v13532_v28 = vand.u32 4294901760, %v13527_v27 }
 0x4c0   : > { %v1869_v31 = vsub.f32 %v13527_v27, %v13532_v28 }
 0x4c2   : > { %v13536_v32 = vand.u32 4294901760, %v1869_v31 }
 0x4c3   : > { %v12993_v33 = vpop.eup %12992 }
 0x4c4   : > { %11973 = vmatpush3.msra.mxu1 %v13536_v32  ;;  %v1748_v37 = vmul.f32 %v12993_v33, %v12991_v13 }
 0x4c5   : > { %11984 = vmatprep.subr.mxu1 %v13067_v18 }
 0x4c6   : > { %v1751_v38 = vsel %vm1749_vm11, %v1748_v37, 0  ;;  %v3166_v37 = vpop.permute.xlu0 %3165 }
 0x4c7   : > { %v1820_v41 = vand.u32 4294901760, %v1751_v38 }
 0x4c9   : > { %v1821_v43 = vsub.f32 %v1751_v38, %v1820_v41  ;;  %11975 = vmatmul.mubr.f32.vlgmr.msra.gmra.mxu1 %v1820_v41  ;;  %v3170_v38 = vsel %vm13391_vm6, %v13396_v16, %v3166_v37 }
 0x4ca   : > { %11985 = vmatpush3.msra.mxu1 %v13497_v8  ;;  %11988 = vmatprep.mubr.msk.f32.mxu1 %vm13068_vm2, %v13067_v18 }
 0x4cb   : > { %11986 = vmatprep.subr.mxu1 %v13067_v18  ;;  %v1822_v45 = vand.u32 4294901760, %v1821_v43 }
 0x4cc   : > { %11987 = vmatpush3.msra.mxu1 %v13524_v26 }
 0x4cd   : > { %11998 = vmatprep.subr.mxu1 %v13067_v18  ;;  %11989 = vmatmul.mubr.f32.vlgmr.msra.gmra.mxu1 %v1822_v45  ;;  %v1823_v46 = vsub.f32 %v1821_v43, %v1822_v45 }
 0x4ce   : > { %11999 = vmatpush3.msra.mxu1 %v13497_v8  ;;  %12002 = vmatprep.mubr.msk.f32.mxu1 %vm13068_vm2, %v13067_v18 }
 0x4cf   : > { %12000 = vmatprep.subr.mxu1 %v13067_v18  ;;  %v1824_v48 = vand.u32 4294901760, %v1823_v46 }
 0x4d0   : > { %12001 = vmatpush3.msra.mxu1 %v13524_v26 }
 0x4d1   : > { %12012 = vmatprep.subr.mxu1 %v13067_v18  ;;  %11968 = vmatmul.mubr.f32.vlgmr.msra.gmra.mxu0 %v1824_v48  ;;  %v3164_v48 = vpop.permute.xlu0 %3163 }
 0x4d2   : > { %11978 = vmatpush3.msra.mxu0 %v13500_v9  ;;  %12003 = vmatmul.mubr.f32.vlgmr.msra.gmra.mxu1 %v1820_v41 }
 0x4d3   : > { %12013 = vmatpush3.xpose.msra.mxu1 %v13442_v40  ;;  %11979 = vmatprep.subr.mxu0 %v13067_v18  ;;  %v2287_v40 = vand.u32 4294901760, %v2286_v50 }
 0x4d4   : > { %11980 = vmatpush3.msra.mxu0 %v13527_v27  ;;  %11981 = vmatprep.mubr.msk.f32.mxu0 %vm13068_vm2, %v13067_v18 }
 0x4d5   : > { %11991 = vmatprep.subr.mxu0 %v13067_v18  ;;  %12014 = vmatprep.subr.mxu1 %v13067_v18 }
 0x4d6   : > { %11982 = vmatmul.mubr.f32.vlgmr.msra.gmra.mxu0 %v1821_v43  ;;  %12016 = vmatprep.mubr.msk.f32.mxu1 %vm13068_vm2, %v13067_v18 }
 0x4d7   : > { %11992 = vmatpush3.msra.mxu0 %v13505_v10  ;;  %12015 = vmatpush3.xpose.msra.mxu1 %v13450_v42  ;;  %v2288_v42 = vsub.f32 %v2286_v50, %v2287_v40 }
 0x4d8   : > { %11993 = vmatprep.subr.mxu0 %v13067_v18  ;;  %11995 = vmatprep.mubr.msk.f32.mxu0 %vm13068_vm2, %v13067_v18 }
 0x4d9   : > { %11994 = vmatpush3.msra.mxu0 %v13532_v28  ;;  %12026 = vmatprep.subr.mxu1 %v13067_v18  ;;  %v2289_v51 = vand.u32 4294901760, %v2288_v42 }
 0x4da   : > { %12005 = vmatprep.subr.mxu0 %v13067_v18  ;;  %12017 = vmatmul.mubr.f32.vlgmr.msra.gmra.mxu1 %v2285_v49 }
 0x4db   : > { %11996 = vmatmul.mubr.f32.vlgmr.msra.gmra.mxu0 %v1820_v41  ;;  %12027 = vmatpush3.xpose.msra.mxu1 %v13417_v29 }
 0x4dc   : > { %12006 = vmatpush3.xpose.msra.mxu0 %v13417_v29  ;;  %12028 = vmatprep.subr.mxu1 %v13067_v18 }
 0x4dd   : > { %12007 = vmatprep.subr.mxu0 %v13067_v18  ;;  %12009 = vmatprep.mubr.msk.f32.mxu0 %vm13068_vm2, %v13067_v18 }
 0x4de   : > { %12030 = vmatprep.mubr.msk.f32.mxu1 %vm13068_vm2, %v13067_v18 }
 0x4df   : > { %12029 = vmatpush3.xpose.msra.mxu1 %v13430_v35 }
 0x4e0   : > { %12008 = vmatpush3.xpose.msra.mxu0 %v13430_v35  ;;  %12040 = vmatprep.subr.mxu1 %v13067_v18 }
 0x4e1   : > { %12019 = vmatprep.subr.mxu0 %v13067_v18 }
 0x4e2   : > { %12031 = vmatmul.mubr.f32.vlgmr.msra.gmra.mxu1 %v2287_v40  ;;  %v11332_v40 = vld [vmem:[%s13225_s21 + $0x10] sm:$0xff] }
 0x4e3   : > { %12010 = vmatmul.mubr.f32.vlgmr.msra.gmra.mxu0 %v2289_v51  ;;  %12041 = vmatpush3.xpose.msra.mxu1 %v13417_v29 }
 0x4e4   : > { %12020 = vmatpush3.xpose.msra.mxu0 %v13420_v30  ;;  %12042 = vmatprep.subr.mxu1 %v13067_v18 }
 0x4e5   : > { %12021 = vmatprep.subr.mxu0 %v13067_v18  ;;  %12023 = vmatprep.mubr.msk.f32.mxu0 %vm13068_vm2, %v13067_v18 }
 0x4e6   : > { %12044 = vmatprep.mubr.msk.f32.mxu1 %vm13068_vm2, %v13067_v18 }
 0x4e7   : > { %12043 = vmatpush3.xpose.msra.mxu1 %v13430_v35 }
 0x4e8   : > { %12022 = vmatpush3.xpose.msra.mxu0 %v13433_v36  ;;  %12054 = vmatprep.subr.mxu1 %v13067_v18 }
 0x4e9   : > { %12033 = vmatprep.subr.mxu0 %v13067_v18 }
 0x4ea   : > { %12045 = vmatmul.mubr.f32.vlgmr.msra.gmra.mxu1 %v2285_v49 }
 0x4eb   : > { %12024 = vmatmul.mubr.f32.vlgmr.msra.gmra.mxu0 %v2286_v50  ;;  %12055 = vmatpush3.msra.mxu1 %v13509_v12  ;;  %v11333_v50 = vld [vmem:[%s13225_s21 + $0x18] sm:$0xff] }
 0x4ec   : > { %12034 = vmatpush3.xpose.msra.mxu0 %v13428_v34  ;;  %12056 = vmatprep.subr.mxu1 %v13067_v18 }
 0x4ed   : > { %12057 = vmatpush3.msra.mxu1 %v13536_v32  ;;  %12035 = vmatprep.subr.mxu0 %v13067_v18 }
 0x4ee   : > { %12037 = vmatprep.mubr.msk.f32.mxu0 %vm13068_vm2, %v13067_v18  ;;  %12058 = vmatprep.mubr.msk.f32.mxu1 %vm13068_vm2, %v13067_v18 }
 0x4ef   : > { %12068 = vmatprep.subr.mxu1 %v13067_v18 }
 0x4f0   : > { %12036 = vmatpush3.xpose.msra.mxu0 %v13440_v39 }
 0x4f1   : > { %12047 = vmatprep.subr.mxu0 %v13067_v18 }
 0x4f3   : > { %12038 = vmatmul.mubr.f32.vlgmr.msra.gmra.mxu0 %v2285_v49  ;;  %v3169_v49 = vsel %vm13404_vm7, %v13396_v16, %v3164_v48 }
 0x4f4   : > { %12048 = vmatpush3.msra.mxu0 %v13497_v8  ;;  %12051 = vmatprep.mubr.msk.f32.mxu0 %vm13068_vm2, %v13067_v18 }
 0x4f5   : > { %12049 = vmatprep.subr.mxu0 %v13067_v18 }
 0x4f6   : > { %12050 = vmatpush3.msra.mxu0 %v13524_v26 }
 0x4f7   : > { %12061 = vmatprep.subr.mxu0 %v13067_v18 }
 0x589   : > { %v1907_v29 = vpop.f32.mrf.mxu1 }
 0x58b   : > { %v11976_v30 = vpop.f32.mrf.mxu1 }
 0x58d   : > { %v2058_v34 = vpop.f32.mrf.mxu1 }
 0x58f   : > { %v11990_v35 = vpop.f32.mrf.mxu1 }
 0x591   : > { %v1826_v36 = vpop.f32.mrf.mxu0 }
 0x592   : > { %v2208_v39 = vpop.f32.mrf.mxu1  ;;  %v1908_v54 = vadd.f32 %v1907_v29, %v1826_v36 }
 0x593   : > { %v11969_v52 = vpop.f32.mrf.mxu0 }
 0x594   : > { %v12004_v53 = vpop.f32.mrf.mxu1 }
 0x596   : > { %v1983_v55 = vpop.f32.mrf.mxu0 }
 0x597   : > { %v1984_v56 = vadd.f32 %v1983_v55, %v1908_v54 }
 0x598   : > { %v11983_v57 = vpop.f32.mrf.mxu0 }
 0x599   : > { %v2059_v58 = vadd.f32 %v2058_v34, %v1984_v56 }
 0x59a   : > { %v2372_v59 = vpop.f32.mrf.mxu1 }
 0x59b   : > { %v2135_v60 = vpop.f32.mrf.mxu0 }
 0x59c   : > { %v2136_v62 = vadd.f32 %v2135_v60, %v2059_v58  ;;  %v12018_v63 = vpop.f32.mrf.mxu1 }
 0x59d   : > { %v11997_v0 = vpop.f32.mrf.mxu0 }
 0x59e   : > { %v2209_v1 = vadd.f32 %v2208_v39, %v2136_v62 }
 0x5a0   : > { %2213 = vst.msk [vmem:[#allocation3] sm:$0x1] %vm2212_vm12, %v2209_v1 }
 0x5a2   : > { %v2523_v2 = vpop.f32.mrf.mxu1 }
 0x5a3   : > { %v2291_v3 = vpop.f32.mrf.mxu0 }
 0x5a4   : > { %v12032_v4 = vpop.f32.mrf.mxu1  ;;  %v2373_v12 = vadd.f32 %v2372_v59, %v2291_v3 }
 0x5a5   : > { %v12011_v5 = vpop.f32.mrf.mxu0 }
 0x5aa   : > { %v2673_v6 = vpop.f32.mrf.mxu1 }
 0x5ab   : > { %v2448_v11 = vpop.f32.mrf.mxu0 }
 0x5ac   : > { %v12046_v13 = vpop.f32.mrf.mxu1  ;;  %v2449_v19 = vadd.f32 %v2448_v11, %v2373_v12 }
 0x5ad   : > { %v12025_v17 = vpop.f32.mrf.mxu0 }
 0x5ae   : > { %v2524_v20 = vadd.f32 %v2523_v2, %v2449_v19 }
 0x5b3   : > { %v2600_v22 = vpop.f32.mrf.mxu0 }
 0x5b4   : > { %v2601_v23 = vadd.f32 %v2600_v22, %v2524_v20 }
 0x5b5   : > { %v12039_v24 = vpop.f32.mrf.mxu0 }
 0x5b6   : > { %v2674_v25 = vadd.f32 %v2673_v6, %v2601_v23 }
 0x5b8   : > { %v2677_v31 = vmul.f32 0.35355338, %v2674_v25 }
 0x5ba   : > { %v2678_v32 = vsel %vm13482_vm9, %v2677_v31, -1e+30 }
 0x5bb   : > { %v2679_v33 = vsel %vm1737_vm10, %v2678_v32, -inf }
 0x5bc   : > { %2680 = vmax.xlane.f32.xlu1 %v2679_v33 }
 0x5cd   : > { %3188 = vrot.lane.b32.xlu1 %v3170_v38, %s13076_s11 }
 0x5d1   : > { %3206 = vrot.lane.b32.xlu1 %v13388_v14, %s13077_s30 }
 0x645   : > { %v2681_v41 = vpop.xlane.xlu1 %2680 }
 0x646   : > { %v2682_v43 = vsub.f32 %v2678_v32, %v2681_v41 }
 0x648   : > { %v2683_v44 = vmul.f32 1.442695, %v2682_v43 }
 0x649   : > { %v3189_v45 = vpop.permute.xlu1 %3188 }
 0x64a   : > { %12994 = vpow2.f32 %v2683_v44  ;;  %11335 = vst.msk [vmem:[%s13235_s29 + $0x18] sm:$0xff] %vm1253_vm8, %v3189_v45  ;;  %v3212_v29 = vsel %vm1253_vm8, %v3189_v45, 0 }
 0x64b   : > { %v13638_v30 = vand.u32 4294901760, %v3212_v29 }
 0x64d   : > { %v13642_v39 = vsub.f32 %v3212_v29, %v13638_v30  ;;  %v3207_v58 = vpop.permute.xlu1 %3206 }
 0x64e   : > { %v3208_v0 = vsel %vm1253_vm8, %v3207_v58, 0 }
 0x64f   : > { %v13648_v55 = vand.u32 4294901760, %v13642_v39  ;;  %v3281_v2 = vand.u32 4294901760, %v3208_v0 }
 0x651   : > { %v3323_v63 = vsub.f32 %v13642_v39, %v13648_v55 }
 0x653   : > { %v13671_v3 = vand.u32 4294901760, %v3323_v63 }
 0x657   : > { %v12995_v46 = vpop.eup %12994 }
 0x658   : > { %v2685_v47 = vsel %vm1737_vm10, %v12995_v46, 0.0 }
 0x659   : > { %2686 = vadd.xlane.f32.xlu0 %v2685_v47 }
 0x66f   : > { %3186 = vrot.lane.b32.xlu0 %v3169_v49, %s13076_s11 }
 0x673   : > { %3178 = vrot.lane.b32.xlu0 %v11333_v50, %s13078_s19 }
 0x677   : > { %3176 = vrot.lane.b32.xlu0 %v11332_v40, %s13078_s19 }
 0x6e2   : > { %v2687_v42 = vpop.xlane.xlu0 %2686 }
 0x6e3   : > { %12996 = vrcp.f32 %v2687_v42 }
 0x6e6   : > { %v3187_v51 = vpop.permute.xlu0 %3186 }
 0x6e7   : > { %11334 = vst.msk [vmem:[%s13235_s29 + $0x10] sm:$0xff] %vm1253_vm8, %v3187_v51  ;;  %v3210_v34 = vsel %vm1253_vm8, %v3187_v51, 0 }
 0x6e8   : > { %v13644_v52 = vand.u32 4294901760, %v3210_v34 }
 0x6ea   : > { %v13651_v56 = vsub.f32 %v3210_v34, %v13644_v52  ;;  %v3179_v58 = vpop.permute.xlu0 %3178 }
 0x6ec   : > { %v13659_v60 = vand.u32 4294901760, %v13651_v56 }
 0x6ee   : > { %v3330_v4 = vsub.f32 %v13651_v56, %v13659_v60 }
 0x6f0   : > { %v12997_v35 = vpop.eup %12996 }
 0x6f1   : > { %v2689_v36 = vmul.f32 %v12997_v35, %v12995_v46 }
 0x6f3   : > { %v2691_v53 = vsel %vm1749_vm11, %v2689_v36, 0 }
 0x6f4   : > { %v2760_v54 = vand.u32 4294901760, %v2691_v53 }
 0x6f6   : > { %v2761_v57 = vsub.f32 %v2691_v53, %v2760_v54  ;;  %12059 = vmatmul.mubr.f32.vlgmr.msra.gmra.mxu1 %v2760_v54 }
 0x6f7   : > { %12069 = vmatpush3.msra.mxu1 %v13497_v8  ;;  %12072 = vmatprep.mubr.msk.f32.mxu1 %vm13068_vm2, %v13067_v18 }
 0x6f8   : > { %12070 = vmatprep.subr.mxu1 %v13067_v18  ;;  %v2762_v59 = vand.u32 4294901760, %v2761_v57 }
 0x6f9   : > { %12071 = vmatpush3.msra.mxu1 %v13524_v26 }
 0x6fa   : > { %12082 = vmatprep.subr.mxu1 %v13067_v18  ;;  %12073 = vmatmul.mubr.f32.vlgmr.msra.gmra.mxu1 %v2762_v59  ;;  %v2763_v62 = vsub.f32 %v2761_v57, %v2762_v59  ;;  %v3183_v59 = vsel %vm13391_vm6, %v13396_v16, %v3179_v58 }
 0x6fb   : > { %12083 = vmatpush3.msra.mxu1 %v13497_v8  ;;  %12086 = vmatprep.mubr.msk.f32.mxu1 %vm13068_vm2, %v13067_v18  ;;  %v3282_v8 = vsub.f32 %v3208_v0, %v3281_v2 }
 0x6fc   : > { %12084 = vmatprep.subr.mxu1 %v13067_v18  ;;  %v2764_v1 = vand.u32 4294901760, %v2763_v62 }
 0x6fd   : > { %12085 = vmatpush3.msra.mxu1 %v13524_v26  ;;  %v13683_v26 = vand.u32 4294901760, %v3330_v4 }
 0x6fe   : > { %12096 = vmatprep.subr.mxu1 %v13067_v18  ;;  %12052 = vmatmul.mubr.f32.vlgmr.msra.gmra.mxu0 %v2764_v1 }
 0x6ff   : > { %12062 = vmatpush3.msra.mxu0 %v13500_v9  ;;  %12087 = vmatmul.mubr.f32.vlgmr.msra.gmra.mxu1 %v2760_v54  ;;  %v3283_v9 = vand.u32 4294901760, %v3282_v8 }
 0x700   : > { %12097 = vmatpush3.xpose.msra.mxu1 %v13671_v3  ;;  %12063 = vmatprep.subr.mxu0 %v13067_v18 }
 0x701   : > { %12064 = vmatpush3.msra.mxu0 %v13527_v27  ;;  %12065 = vmatprep.mubr.msk.f32.mxu0 %vm13068_vm2, %v13067_v18 }
 0x702   : > { %12075 = vmatprep.subr.mxu0 %v13067_v18  ;;  %12098 = vmatprep.subr.mxu1 %v13067_v18 }
 0x703   : > { %12066 = vmatmul.mubr.f32.vlgmr.msra.gmra.mxu0 %v2761_v57  ;;  %12100 = vmatprep.mubr.msk.f32.mxu1 %vm13068_vm2, %v13067_v18 }
 0x704   : > { %12076 = vmatpush3.msra.mxu0 %v13505_v10  ;;  %12099 = vmatpush3.xpose.msra.mxu1 %v13683_v26  ;;  %v3284_v10 = vsub.f32 %v3282_v8, %v3283_v9 }
 0x705   : > { %12077 = vmatprep.subr.mxu0 %v13067_v18  ;;  %12079 = vmatprep.mubr.msk.f32.mxu0 %vm13068_vm2, %v13067_v18 }
 0x706   : > { %12078 = vmatpush3.msra.mxu0 %v13532_v28  ;;  %12110 = vmatprep.subr.mxu1 %v13067_v18  ;;  %v3285_v27 = vand.u32 4294901760, %v3284_v10 }
 0x707   : > { %12089 = vmatprep.subr.mxu0 %v13067_v18  ;;  %12101 = vmatmul.mubr.f32.vlgmr.msra.gmra.mxu1 %v3281_v2 }
 0x708   : > { %12080 = vmatmul.mubr.f32.vlgmr.msra.gmra.mxu0 %v2760_v54  ;;  %12111 = vmatpush3.xpose.msra.mxu1 %v13638_v30 }
 0x709   : > { %12090 = vmatpush3.xpose.msra.mxu0 %v13638_v30  ;;  %12112 = vmatprep.subr.mxu1 %v13067_v18 }
 0x70a   : > { %12091 = vmatprep.subr.mxu0 %v13067_v18  ;;  %12093 = vmatprep.mubr.msk.f32.mxu0 %vm13068_vm2, %v13067_v18 }
 0x70b   : > { %12114 = vmatprep.mubr.msk.f32.mxu1 %vm13068_vm2, %v13067_v18 }
 0x70c   : > { %12113 = vmatpush3.xpose.msra.mxu1 %v13644_v52 }
 0x70d   : > { %12092 = vmatpush3.xpose.msra.mxu0 %v13644_v52  ;;  %12124 = vmatprep.subr.mxu1 %v13067_v18 }
 0x70e   : > { %12103 = vmatprep.subr.mxu0 %v13067_v18 }
 0x70f   : > { %12115 = vmatmul.mubr.f32.vlgmr.msra.gmra.mxu1 %v3283_v9 }
 0x710   : > { %12094 = vmatmul.mubr.f32.vlgmr.msra.gmra.mxu0 %v3285_v27  ;;  %12125 = vmatpush3.xpose.msra.mxu1 %v13638_v30 }
 0x711   : > { %12104 = vmatpush3.xpose.msra.mxu0 %v13642_v39  ;;  %12126 = vmatprep.subr.mxu1 %v13067_v18 }
 0x712   : > { %12105 = vmatprep.subr.mxu0 %v13067_v18  ;;  %12107 = vmatprep.mubr.msk.f32.mxu0 %vm13068_vm2, %v13067_v18 }
 0x713   : > { %12128 = vmatprep.mubr.msk.f32.mxu1 %vm13068_vm2, %v13067_v18 }
 0x714   : > { %12127 = vmatpush3.xpose.msra.mxu1 %v13644_v52 }
 0x715   : > { %12106 = vmatpush3.xpose.msra.mxu0 %v13651_v56  ;;  %12138 = vmatprep.subr.mxu1 %v13067_v18 }
 0x716   : > { %12117 = vmatprep.subr.mxu0 %v13067_v18 }
 0x717   : > { %12129 = vmatmul.mubr.f32.vlgmr.msra.gmra.mxu1 %v3281_v2 }
 0x718   : > { %12108 = vmatmul.mubr.f32.vlgmr.msra.gmra.mxu0 %v3282_v8  ;;  %12142 = vmatprep.mubr.msk.f32.mxu1 %vm13068_vm2, %v13067_v18 }
 0x719   : > { %12118 = vmatpush3.xpose.msra.mxu0 %v13648_v55  ;;  %12121 = vmatprep.mubr.msk.f32.mxu0 %vm13068_vm2, %v13067_v18 }
 0x71a   : > { %12119 = vmatprep.subr.mxu0 %v13067_v18 }
 0x71d   : > { %12120 = vmatpush3.xpose.msra.mxu0 %v13659_v60 }
 0x71e   : > { %12131 = vmatprep.subr.mxu0 %v13067_v18 }
 0x720   : > { %12122 = vmatmul.mubr.f32.vlgmr.msra.gmra.mxu0 %v3281_v2 }
 0x721   : > { %12135 = vmatprep.mubr.msk.f32.mxu0 %vm13068_vm2, %v13067_v18 }
 0x7b6   : > { %v2847_v28 = vpop.f32.mrf.mxu1 }
 0x7b8   : > { %v12060_v5 = vpop.f32.mrf.mxu1 }
 0x7b9   : > { %v3177_v5 = vpop.permute.xlu0 %3176 }
 0x7ba   : > { %v2998_v6 = vpop.f32.mrf.mxu1 }
 0x7bc   : > { %v12074_v11 = vpop.f32.mrf.mxu1 }
 0x7bd   : > { %v11339_v11 = vld [vmem:[%s13220_s18 + $0x28] sm:$0xff] }
 0x7be   : > { %v2766_v12 = vpop.f32.mrf.mxu0 }
 0x7bf   : > { %v2848_v13 = vadd.f32 %v2847_v28, %v2766_v12  ;;  %v3148_v17 = vpop.f32.mrf.mxu1  ;;  %v11338_v12 = vld [vmem:[%s13220_s18 + $0x20] sm:$0xff] }
 0x7c0   : > { %v12053_v19 = vpop.f32.mrf.mxu0 }
 0x7c1   : > { %v12088_v20 = vpop.f32.mrf.mxu1 }
 0x7c3   : > { %v2923_v22 = vpop.f32.mrf.mxu0 }
 0x7c4   : > { %v2924_v23 = vadd.f32 %v2923_v22, %v2848_v13 }
 0x7c5   : > { %v12067_v24 = vpop.f32.mrf.mxu0 }
 0x7c6   : > { %v2999_v25 = vadd.f32 %v2998_v6, %v2924_v23  ;;  %v3182_v6 = vsel %vm13404_vm7, %v13396_v16, %v3177_v5 }
 0x7c7   : > { %v3368_v31 = vpop.f32.mrf.mxu1 }
 0x7c8   : > { %v3075_v32 = vpop.f32.mrf.mxu0 }
 0x7c9   : > { %v3076_v33 = vadd.f32 %v3075_v32, %v2999_v25  ;;  %v12102_v37 = vpop.f32.mrf.mxu1 }
 0x7ca   : > { %v12081_v38 = vpop.f32.mrf.mxu0 }
 0x7cb   : > { %v13729_v41 = vadd.f32 %v3148_v17, %v3076_v33 }
 0x7cf   : > { %v3519_v43 = vpop.f32.mrf.mxu1 }
 0x7d0   : > { %v3287_v44 = vpop.f32.mrf.mxu0 }
 0x7d1   : > { %v12116_v45 = vpop.f32.mrf.mxu1  ;;  %v3369_v49 = vadd.f32 %v3368_v31, %v3287_v44 }
 0x7d2   : > { %v12095_v46 = vpop.f32.mrf.mxu0 }
 0x7d7   : > { %v3669_v47 = vpop.f32.mrf.mxu1 }
 0x7d8   : > { %v3444_v48 = vpop.f32.mrf.mxu0 }
 0x7d9   : > { %v12130_v50 = vpop.f32.mrf.mxu1  ;;  %v3445_v42 = vadd.f32 %v3444_v48, %v3369_v49 }
 0x7da   : > { %v12109_v40 = vpop.f32.mrf.mxu0 }
 0x7db   : > { %v3520_v51 = vadd.f32 %v3519_v43, %v3445_v42 }
 0x7e0   : > { %v3596_v29 = vpop.f32.mrf.mxu0 }
 0x7e1   : > { %v3597_v34 = vadd.f32 %v3596_v29, %v3520_v51 }
 0x7e2   : > { %v12123_v35 = vpop.f32.mrf.mxu0 }
 0x7e3   : > { %v3670_v36 = vadd.f32 %v3669_v47, %v3597_v34 }
 0x7e5   : > { %v3673_v53 = vmul.f32 0.35355338, %v3670_v36 }
 0x7e7   : > { %v3674_v54 = vsel %vm13482_vm9, %v3673_v53, -1e+30 }
 0x7e8   : > { %v3675_v57 = vsel %vm1737_vm10, %v3674_v54, -inf }
 0x7e9   : > { %3676 = vmax.xlane.f32.xlu1 %v3675_v57 }
 0x7fa   : > { %3199 = vrot.lane.b32.xlu1 %v3183_v59, %s13079_s28 }
 0x7fe   : > { %4154 = vrot.lane.b32.xlu1 %v13388_v14, %s13080_s14 }
 0x872   : > { %v3677_v62 = vpop.xlane.xlu1 %3676 }
 0x873   : > { %v3678_v63 = vsub.f32 %v3674_v54, %v3677_v62 }
 0x875   : > { %v3679_v0 = vmul.f32 1.442695, %v3678_v63 }
 0x876   : > { %v3200_v1 = vpop.permute.xlu1 %3199 }
 0x877   : > { %12998 = vpow2.f32 %v3679_v0  ;;  %11337 = vst.msk [vmem:[%s13240_s2 + $0x18] sm:$0xff] %vm1253_vm8, %v3200_v1  ;;  %v13742_v2 = vand.u32 4294901760, %v3200_v1 }
 0x879   : > { %v13745_v4 = vsub.f32 %v3200_v1, %v13742_v2  ;;  %12132 = vmatpush3.msra.mxu0 %v13742_v2 }
 0x87a   : > { %12133 = vmatprep.subr.mxu0 %v13067_v18  ;;  %v4155_v37 = vpop.permute.xlu1 %4154 }
 0x87b   : > { %v13750_v8 = vand.u32 4294901760, %v13745_v4  ;;  %v4156_v44 = vsel %vm1253_vm8, %v4155_v37, 0 }
 0x87c   : > { %v4225_v46 = vand.u32 4294901760, %v4156_v44 }
 0x87d   : > { %v3798_v9 = vsub.f32 %v13745_v4, %v13750_v8 }
 0x87e   : > { %v4226_v47 = vsub.f32 %v4156_v44, %v4225_v46 }
 0x87f   : > { %v13754_v10 = vand.u32 4294901760, %v3798_v9 }
 0x881   : > { %12139 = vmatpush3.msra.mxu1 %v13754_v10 }
 0x882   : > { %12140 = vmatprep.subr.mxu1 %v13067_v18 }
 0x884   : > { %v12999_v27 = vpop.eup %12998 }
 0x885   : > { %v3681_v28 = vsel %vm1737_vm10, %v12999_v27, 0.0 }
 0x886   : > { %3682 = vadd.xlane.f32.xlu0 %v3681_v28 }
 0x89c   : > { %3197 = vrot.lane.b32.xlu0 %v3182_v6, %s13079_s28 }
 0x8a0   : > { %5109 = vrot.lane.b32.xlu0 %v11339_v11, %s13071_s24 }
 0x8a4   : > { %5107 = vrot.lane.b32.xlu0 %v11338_v12, %s13071_s24 }
 0x90f   : > { %v3683_v13 = vpop.xlane.xlu0 %3682 }
 0x910   : > { %13000 = vrcp.f32 %v3683_v13 }
 0x913   : > { %v3198_v17 = vpop.permute.xlu0 %3197 }
 0x914   : > { %11336 = vst.msk [vmem:[%s13240_s2 + $0x10] sm:$0xff] %vm1253_vm8, %v3198_v17  ;;  %v13769_v19 = vand.u32 4294901760, %v3198_v17 }
 0x916   : > { %v13772_v20 = vsub.f32 %v3198_v17, %v13769_v19  ;;  %12134 = vmatpush3.msra.mxu0 %v13769_v19 }
 0x917   : > { %12145 = vmatprep.subr.mxu0 %v13067_v18 }
 0x918   : > { %v13777_v16 = vand.u32 4294901760, %v13772_v20 }
 0x91a   : > { %v3805_v22 = vsub.f32 %v13772_v20, %v13777_v16 }
 0x91c   : > { %v13781_v23 = vand.u32 4294901760, %v3805_v22 }
 0x91d   : > { %v13001_v24 = vpop.eup %13000 }
 0x91e   : > { %12141 = vmatpush3.msra.mxu1 %v13781_v23  ;;  %v3685_v25 = vmul.f32 %v13001_v24, %v12999_v27 }
 0x91f   : > { %12152 = vmatprep.subr.mxu1 %v13067_v18 }
 0x920   : > { %v3687_v31 = vsel %vm1749_vm11, %v3685_v25, 0  ;;  %v5103_v25 = vsub.s32 1, %v13378_v7 }
 0x921   : > { %v3756_v32 = vand.u32 4294901760, %v3687_v31 }
 0x923   : > { %v3757_v33 = vsub.f32 %v3687_v31, %v3756_v32  ;;  %12143 = vmatmul.mubr.f32.vlgmr.msra.gmra.mxu1 %v3756_v32  ;;  %v5110_v31 = vpop.permute.xlu0 %5109 }
 0x924   : > { %12153 = vmatpush3.msra.mxu1 %v13742_v2  ;;  %12156 = vmatprep.mubr.msk.f32.mxu1 %vm13068_vm2, %v13067_v18 }
 0x925   : > { %12154 = vmatprep.subr.mxu1 %v13067_v18  ;;  %v3758_v38 = vand.u32 4294901760, %v3757_v33 }
 0x926   : > { %12155 = vmatpush3.msra.mxu1 %v13769_v19 }
 0x927   : > { %12166 = vmatprep.subr.mxu1 %v13067_v18  ;;  %12157 = vmatmul.mubr.f32.vlgmr.msra.gmra.mxu1 %v3758_v38  ;;  %v3759_v43 = vsub.f32 %v3757_v33, %v3758_v38  ;;  %v5108_v37 = vpop.permute.xlu0 %5107 }
 0x928   : > { %12167 = vmatpush3.msra.mxu1 %v13742_v2  ;;  %12170 = vmatprep.mubr.msk.f32.mxu1 %vm13068_vm2, %v13067_v18 }
 0x929   : > { %12168 = vmatprep.subr.mxu1 %v13067_v18  ;;  %v3760_v45 = vand.u32 4294901760, %v3759_v43  ;;  %v11341_v43 = vld [vmem:[%s13225_s21 + $0x28] sm:$0xff] }
 0x92a   : > { %12169 = vmatpush3.msra.mxu1 %v13769_v19 }
 0x92b   : > { %12180 = vmatprep.subr.mxu1 %v13067_v18  ;;  %12136 = vmatmul.mubr.f32.vlgmr.msra.gmra.mxu0 %v3760_v45 }
 0x92c   : > { %12146 = vmatpush3.msra.mxu0 %v13745_v4  ;;  %12171 = vmatmul.mubr.f32.vlgmr.msra.gmra.mxu1 %v3756_v32 }
 0x92d   : > { %12181 = vmatpush3.xpose.msra.mxu1 %v13671_v3  ;;  %12147 = vmatprep.subr.mxu0 %v13067_v18  ;;  %v4227_v3 = vand.u32 4294901760, %v4226_v47 }
 0x92e   : > { %12148 = vmatpush3.msra.mxu0 %v13772_v20  ;;  %12149 = vmatprep.mubr.msk.f32.mxu0 %vm13068_vm2, %v13067_v18 }
 0x92f   : > { %12159 = vmatprep.subr.mxu0 %v13067_v18  ;;  %12182 = vmatprep.subr.mxu1 %v13067_v18 }
 0x930   : > { %12150 = vmatmul.mubr.f32.vlgmr.msra.gmra.mxu0 %v3757_v33  ;;  %12184 = vmatprep.mubr.msk.f32.mxu1 %vm13068_vm2, %v13067_v18 }
 0x931   : > { %12160 = vmatpush3.msra.mxu0 %v13750_v8  ;;  %12183 = vmatpush3.xpose.msra.mxu1 %v13683_v26  ;;  %v4228_v26 = vsub.f32 %v4226_v47, %v4227_v3 }
 0x932   : > { %12161 = vmatprep.subr.mxu0 %v13067_v18  ;;  %12163 = vmatprep.mubr.msk.f32.mxu0 %vm13068_vm2, %v13067_v18 }
 0x933   : > { %12162 = vmatpush3.msra.mxu0 %v13777_v16  ;;  %12194 = vmatprep.subr.mxu1 %v13067_v18  ;;  %v4229_v48 = vand.u32 4294901760, %v4228_v26 }
 0x934   : > { %12173 = vmatprep.subr.mxu0 %v13067_v18  ;;  %12185 = vmatmul.mubr.f32.vlgmr.msra.gmra.mxu1 %v4225_v46 }
 0x935   : > { %12164 = vmatmul.mubr.f32.vlgmr.msra.gmra.mxu0 %v3756_v32  ;;  %12195 = vmatpush3.xpose.msra.mxu1 %v13638_v30  ;;  %v13866_v32 = vrot.slane %v13388_v14, %v5103_v25 }
 0x936   : > { %12174 = vmatpush3.xpose.msra.mxu0 %v13638_v30  ;;  %12196 = vmatprep.subr.mxu1 %v13067_v18 }
 0x937   : > { %12175 = vmatprep.subr.mxu0 %v13067_v18  ;;  %12177 = vmatprep.mubr.msk.f32.mxu0 %vm13068_vm2, %v13067_v18  ;;  %v5114_v33 = vsel %vm13391_vm6, %v13866_v32, %v5110_v31  ;;  %v5113_v38 = vsel %vm13404_vm7, %v13866_v32, %v5108_v37 }
 0x938   : > { %12198 = vmatprep.mubr.msk.f32.mxu1 %vm13068_vm2, %v13067_v18 }
 0x939   : > { %12197 = vmatpush3.xpose.msra.mxu1 %v13644_v52 }
 0x93a   : > { %12176 = vmatpush3.xpose.msra.mxu0 %v13644_v52  ;;  %12208 = vmatprep.subr.mxu1 %v13067_v18 }
 0x93b   : > { %12187 = vmatprep.subr.mxu0 %v13067_v18 }
 0x93c   : > { %12199 = vmatmul.mubr.f32.vlgmr.msra.gmra.mxu1 %v4227_v3 }
 0x93d   : > { %12178 = vmatmul.mubr.f32.vlgmr.msra.gmra.mxu0 %v4229_v48  ;;  %12209 = vmatpush3.xpose.msra.mxu1 %v13638_v30 }
 0x93e   : > { %12188 = vmatpush3.xpose.msra.mxu0 %v13642_v39  ;;  %12210 = vmatprep.subr.mxu1 %v13067_v18 }
 0x93f   : > { %12189 = vmatprep.subr.mxu0 %v13067_v18  ;;  %12191 = vmatprep.mubr.msk.f32.mxu0 %vm13068_vm2, %v13067_v18 }
 0x940   : > { %12212 = vmatprep.mubr.msk.f32.mxu1 %vm13068_vm2, %v13067_v18 }
 0x941   : > { %12211 = vmatpush3.xpose.msra.mxu1 %v13644_v52 }
 0x942   : > { %12190 = vmatpush3.xpose.msra.mxu0 %v13651_v56  ;;  %12222 = vmatprep.subr.mxu1 %v13067_v18 }
 0x943   : > { %12201 = vmatprep.subr.mxu0 %v13067_v18 }
 0x944   : > { %12213 = vmatmul.mubr.f32.vlgmr.msra.gmra.mxu1 %v4225_v46 }
 0x945   : > { %12192 = vmatmul.mubr.f32.vlgmr.msra.gmra.mxu0 %v4226_v47  ;;  %12223 = vmatpush3.msra.mxu1 %v13754_v10 }
 0x946   : > { %12202 = vmatpush3.xpose.msra.mxu0 %v13648_v55  ;;  %12224 = vmatprep.subr.mxu1 %v13067_v18 }
 0x947   : > { %12225 = vmatpush3.msra.mxu1 %v13781_v23  ;;  %12203 = vmatprep.subr.mxu0 %v13067_v18 }
 0x948   : > { %12205 = vmatprep.mubr.msk.f32.mxu0 %vm13068_vm2, %v13067_v18  ;;  %12226 = vmatprep.mubr.msk.f32.mxu1 %vm13068_vm2, %v13067_v18 }
 0x949   : > { %12236 = vmatprep.subr.mxu1 %v13067_v18 }
 0x94a   : > { %12204 = vmatpush3.xpose.msra.mxu0 %v13659_v60 }
 0x94b   : > { %12215 = vmatprep.subr.mxu0 %v13067_v18 }
 0x94d   : > { %12206 = vmatmul.mubr.f32.vlgmr.msra.gmra.mxu0 %v4225_v46 }
 0x94e   : > { %12216 = vmatpush3.msra.mxu0 %v13742_v2  ;;  %12219 = vmatprep.mubr.msk.f32.mxu0 %vm13068_vm2, %v13067_v18 }
 0x94f   : > { %12217 = vmatprep.subr.mxu0 %v13067_v18 }
 0x950   : > { %12218 = vmatpush3.msra.mxu0 %v13769_v19 }
 0x951   : > { %12229 = vmatprep.subr.mxu0 %v13067_v18 }
 0x9e3   : > { %v3843_v30 = vpop.f32.mrf.mxu1 }
 0x9e5   : > { %v12144_v39 = vpop.f32.mrf.mxu1 }
 0x9e7   : > { %v3994_v52 = vpop.f32.mrf.mxu1 }
 0x9e9   : > { %v12158_v55 = vpop.f32.mrf.mxu1 }
 0x9eb   : > { %v3762_v56 = vpop.f32.mrf.mxu0 }
 0x9ec   : > { %v3844_v60 = vadd.f32 %v3843_v30, %v3762_v56  ;;  %v4144_v49 = vpop.f32.mrf.mxu1 }
 0x9ed   : > { %v12137_v50 = vpop.f32.mrf.mxu0 }
 0x9ee   : > { %v12172_v40 = vpop.f32.mrf.mxu1 }
 0x9f0   : > { %v3919_v42 = vpop.f32.mrf.mxu0 }
 0x9f1   : > { %v3920_v51 = vadd.f32 %v3919_v42, %v3844_v60 }
 0x9f2   : > { %v12151_v29 = vpop.f32.mrf.mxu0 }
 0x9f3   : > { %v3995_v34 = vadd.f32 %v3994_v52, %v3920_v51 }
 0x9f4   : > { %v4312_v35 = vpop.f32.mrf.mxu1 }
 0x9f5   : > { %v4071_v36 = vpop.f32.mrf.mxu0 }
 0x9f6   : > { %v4072_v53 = vadd.f32 %v4071_v36, %v3995_v34  ;;  %v12186_v54 = vpop.f32.mrf.mxu1  ;;  %v13903_v34 = vrot.slane %v13388_v14, 1 }
 0x9f7   : > { %v12165_v57 = vpop.f32.mrf.mxu0 }
 0x9f8   : > { %v13859_v58 = vadd.f32 %v4144_v49, %v4072_v53  ;;  %v5151_v14 = vsel %vm1253_vm8, %v13903_v34, 0 }
 0x9fc   : > { %v4463_v59 = vpop.f32.mrf.mxu1 }
 0x9fd   : > { %v4231_v62 = vpop.f32.mrf.mxu0 }
 0x9fe   : > { %v12200_v63 = vpop.f32.mrf.mxu1  ;;  %v4313_v10 = vadd.f32 %v4312_v35, %v4231_v62 }
 0x9ff   : > { %v12179_v0 = vpop.f32.mrf.mxu0 }
 0xa04   : > { %v4613_v1 = vpop.f32.mrf.mxu1 }
 0xa05   : > { %v4388_v9 = vpop.f32.mrf.mxu0 }
 0xa06   : > { %v12214_v27 = vpop.f32.mrf.mxu1  ;;  %v4389_v5 = vadd.f32 %v4388_v9, %v4313_v10 }
 0xa07   : > { %v12193_v28 = vpop.f32.mrf.mxu0 }
 0xa08   : > { %v4464_v6 = vadd.f32 %v4463_v59, %v4389_v5 }
 0xa0d   : > { %v4540_v11 = vpop.f32.mrf.mxu0 }
 0xa0e   : > { %v4541_v12 = vadd.f32 %v4540_v11, %v4464_v6 }
 0xa0f   : > { %v12207_v13 = vpop.f32.mrf.mxu0 }
 0xa10   : > { %v4614_v17 = vadd.f32 %v4613_v1, %v4541_v12 }
 0xa12   : > { %v4617_v22 = vmul.f32 0.35355338, %v4614_v17 }
 0xa14   : > { %v4618_v23 = vsel %vm13482_vm9, %v4617_v22, -1e+30 }
 0xa15   : > { %v4619_v24 = vsel %vm1737_vm10, %v4618_v23, -inf }
 0xa16   : > { %4620 = vmax.xlane.f32.xlu1 %v4619_v24 }
 0xa27   : > { %5132 = vrot.lane.b32.xlu1 %v5114_v33, %s13072_s17 }
 0xa2b   : > { %5130 = vrot.lane.b32.xlu1 %v5113_v38, %s13072_s17 }
 0xa2f   : > { %5122 = vrot.lane.b32.xlu1 %v11341_v43, %s13070_s20 }
 0xa9f   : > { %v4621_v7 = vpop.xlane.xlu1 %4620 }
 0xaa0   : > { %v4622_v44 = vsub.f32 %v4618_v23, %v4621_v7 }
 0xaa2   : > { %v4623_v45 = vmul.f32 1.442695, %v4622_v44 }
 0xaa3   : > { %v5133_v46 = vpop.permute.xlu1 %5132 }
 0xaa4   : > { %13002 = vpow2.f32 %v4623_v45  ;;  %11343 = vst.msk [vmem:[%s13235_s29 + $0x28] sm:$0xff] %vm1253_vm8, %v5133_v46  ;;  %v5155_v30 = vsel %vm1253_vm8, %v5133_v46, 0 }
 0xaa5   : > { %v13884_v39 = vand.u32 4294901760, %v5155_v30 }
 0xaa7   : > { %v5131_v47 = vpop.permute.xlu1 %5130  ;;  %v13888_v60 = vsub.f32 %v5155_v30, %v13884_v39 }
 0xaa8   : > { %11342 = vst.msk [vmem:[%s13235_s29 + $0x20] sm:$0xff] %vm1253_vm8, %v5131_v47  ;;  %v5153_v52 = vsel %vm1253_vm8, %v5131_v47, 0 }
 0xaa9   : > { %v13890_v49 = vand.u32 4294901760, %v5153_v52  ;;  %v13894_v42 = vand.u32 4294901760, %v13888_v60 }
 0xaab   : > { %v13897_v51 = vsub.f32 %v5153_v52, %v13890_v49  ;;  %v5266_v54 = vsub.f32 %v13888_v60, %v13894_v42 }
 0xaad   : > { %v13908_v36 = vand.u32 4294901760, %v13897_v51  ;;  %v13921_v59 = vand.u32 4294901760, %v5266_v54 }
 0xaaf   : > { %v5273_v62 = vsub.f32 %v13897_v51, %v13908_v36 }
 0xab1   : > { %v13003_v3 = vpop.eup %13002 }
 0xab2   : > { %v4625_v26 = vsel %vm1737_vm10, %v13003_v3, 0.0 }
 0xab3   : > { %4626 = vadd.xlane.f32.xlu0 %v4625_v26 }
 0xb3c   : > { %v4627_v48 = vpop.xlane.xlu0 %4626 }
 0xb3d   : > { %13004 = vrcp.f32 %v4627_v48 }
 0xb4a   : > { %v13005_v55 = vpop.eup %13004 }
 0xb4b   : > { %v4629_v56 = vmul.f32 %v13005_v55, %v13003_v3 }
 0xb4d   : > { %v4631_v50 = vsel %vm1749_vm11, %v4629_v56, 0 }
 0xb4e   : > { %v4700_v40 = vand.u32 4294901760, %v4631_v50 }
 0xb50   : > { %v4701_v29 = vsub.f32 %v4631_v50, %v4700_v40  ;;  %12227 = vmatmul.mubr.f32.vlgmr.msra.gmra.mxu1 %v4700_v40 }
 0xb51   : > { %12237 = vmatpush3.msra.mxu1 %v13742_v2  ;;  %12240 = vmatprep.mubr.msk.f32.mxu1 %vm13068_vm2, %v13067_v18 }
 0xb52   : > { %12238 = vmatprep.subr.mxu1 %v13067_v18  ;;  %v4702_v35 = vand.u32 4294901760, %v4701_v29 }
 0xb53   : > { %12239 = vmatpush3.msra.mxu1 %v13769_v19 }
 0xb54   : > { %12250 = vmatprep.subr.mxu1 %v13067_v18  ;;  %12241 = vmatmul.mubr.f32.vlgmr.msra.gmra.mxu1 %v4702_v35  ;;  %v4703_v53 = vsub.f32 %v4701_v29, %v4702_v35  ;;  %v11340_v35 = vld [vmem:[%s13225_s21 + $0x20] sm:$0xff] }
 0xb55   : > { %12251 = vmatpush3.msra.mxu1 %v13742_v2  ;;  %12254 = vmatprep.mubr.msk.f32.mxu1 %vm13068_vm2, %v13067_v18  ;;  %v5224_v2 = vand.u32 4294901760, %v5151_v14 }
 0xb56   : > { %12252 = vmatprep.subr.mxu1 %v13067_v18  ;;  %v4704_v57 = vand.u32 4294901760, %v4703_v53  ;;  %v5123_v53 = vpop.permute.xlu1 %5122 }
 0xb57   : > { %12253 = vmatpush3.msra.mxu1 %v13769_v19  ;;  %v13933_v19 = vand.u32 4294901760, %v5273_v62  ;;  %v5225_v63 = vsub.f32 %v5151_v14, %v5224_v2  ;;  %v5127_v54 = vsel %vm13391_vm6, %v13866_v32, %v5123_v53 }
 0xb58   : > { %12264 = vmatprep.subr.mxu1 %v13067_v18  ;;  %12220 = vmatmul.mubr.f32.vlgmr.msra.gmra.mxu0 %v4704_v57 }
 0xb59   : > { %12230 = vmatpush3.msra.mxu0 %v13745_v4  ;;  %12255 = vmatmul.mubr.f32.vlgmr.msra.gmra.mxu1 %v4700_v40  ;;  %v5226_v4 = vand.u32 4294901760, %v5225_v63 }
 0xb5a   : > { %12265 = vmatpush3.xpose.msra.mxu1 %v13921_v59  ;;  %12231 = vmatprep.subr.mxu0 %v13067_v18 }
 0xb5b   : > { %12232 = vmatpush3.msra.mxu0 %v13772_v20  ;;  %12233 = vmatprep.mubr.msk.f32.mxu0 %vm13068_vm2, %v13067_v18 }
 0xb5c   : > { %12243 = vmatprep.subr.mxu0 %v13067_v18  ;;  %12266 = vmatprep.subr.mxu1 %v13067_v18 }
 0xb5d   : > { %12234 = vmatmul.mubr.f32.vlgmr.msra.gmra.mxu0 %v4701_v29  ;;  %12268 = vmatprep.mubr.msk.f32.mxu1 %vm13068_vm2, %v13067_v18 }
 0xb5e   : > { %12244 = vmatpush3.msra.mxu0 %v13750_v8  ;;  %12267 = vmatpush3.xpose.msra.mxu1 %v13933_v19  ;;  %v5227_v8 = vsub.f32 %v5225_v63, %v5226_v4 }
 0xb5f   : > { %12245 = vmatprep.subr.mxu0 %v13067_v18  ;;  %12247 = vmatprep.mubr.msk.f32.mxu0 %vm13068_vm2, %v13067_v18 }
 0xb60   : > { %12246 = vmatpush3.msra.mxu0 %v13777_v16  ;;  %12278 = vmatprep.subr.mxu1 %v13067_v18  ;;  %v5228_v20 = vand.u32 4294901760, %v5227_v8 }
 0xb61   : > { %12257 = vmatprep.subr.mxu0 %v13067_v18  ;;  %12269 = vmatmul.mubr.f32.vlgmr.msra.gmra.mxu1 %v5224_v2 }
 0xb62   : > { %12248 = vmatmul.mubr.f32.vlgmr.msra.gmra.mxu0 %v4700_v40  ;;  %12279 = vmatpush3.xpose.msra.mxu1 %v13884_v39 }
 0xb63   : > { %12258 = vmatpush3.xpose.msra.mxu0 %v13884_v39  ;;  %12280 = vmatprep.subr.mxu1 %v13067_v18 }
 0xb64   : > { %12259 = vmatprep.subr.mxu0 %v13067_v18  ;;  %12261 = vmatprep.mubr.msk.f32.mxu0 %vm13068_vm2, %v13067_v18 }
 0xb65   : > { %12282 = vmatprep.mubr.msk.f32.mxu1 %vm13068_vm2, %v13067_v18 }
 0xb66   : > { %12281 = vmatpush3.xpose.msra.mxu1 %v13890_v49 }
 0xb67   : > { %12260 = vmatpush3.xpose.msra.mxu0 %v13890_v49  ;;  %12292 = vmatprep.subr.mxu1 %v13067_v18 }
 0xb68   : > { %12271 = vmatprep.subr.mxu0 %v13067_v18 }
 0xb69   : > { %12283 = vmatmul.mubr.f32.vlgmr.msra.gmra.mxu1 %v5226_v4 }
 0xb6a   : > { %12262 = vmatmul.mubr.f32.vlgmr.msra.gmra.mxu0 %v5228_v20  ;;  %12293 = vmatpush3.xpose.msra.mxu1 %v13884_v39 }
 0xb6b   : > { %12272 = vmatpush3.xpose.msra.mxu0 %v13888_v60  ;;  %12294 = vmatprep.subr.mxu1 %v13067_v18 }
 0xb6c   : > { %12273 = vmatprep.subr.mxu0 %v13067_v18  ;;  %12275 = vmatprep.mubr.msk.f32.mxu0 %vm13068_vm2, %v13067_v18 }
 0xb6d   : > { %12296 = vmatprep.mubr.msk.f32.mxu1 %vm13068_vm2, %v13067_v18 }
 0xb6e   : > { %12295 = vmatpush3.xpose.msra.mxu1 %v13890_v49 }
 0xb6f   : > { %12274 = vmatpush3.xpose.msra.mxu0 %v13897_v51  ;;  %12306 = vmatprep.subr.mxu1 %v13067_v18 }
 0xb70   : > { %12285 = vmatprep.subr.mxu0 %v13067_v18 }
 0xb71   : > { %12297 = vmatmul.mubr.f32.vlgmr.msra.gmra.mxu1 %v5224_v2 }
 0xb72   : > { %12276 = vmatmul.mubr.f32.vlgmr.msra.gmra.mxu0 %v5225_v63  ;;  %12310 = vmatprep.mubr.msk.f32.mxu1 %vm13068_vm2, %v13067_v18 }
 0xb73   : > { %12286 = vmatpush3.xpose.msra.mxu0 %v13894_v42  ;;  %12289 = vmatprep.mubr.msk.f32.mxu0 %vm13068_vm2, %v13067_v18 }
 0xb74   : > { %12287 = vmatprep.subr.mxu0 %v13067_v18 }
 0xb77   : > { %12288 = vmatpush3.xpose.msra.mxu0 %v13908_v36 }
 0xb78   : > { %12299 = vmatprep.subr.mxu0 %v13067_v18 }
 0xb7a   : > { %12290 = vmatmul.mubr.f32.vlgmr.msra.gmra.mxu0 %v5224_v2 }
 0xb7b   : > { %12303 = vmatprep.mubr.msk.f32.mxu0 %vm13068_vm2, %v13067_v18 }
 0xc10   : > { %v4787_v16 = vpop.f32.mrf.mxu1 }
 0xc12   : > { %v12228_v0 = vpop.f32.mrf.mxu1 }
 0xc14   : > { %v4938_v1 = vpop.f32.mrf.mxu1 }
 0xc16   : > { %v12242_v9 = vpop.f32.mrf.mxu1 }
 0xc18   : > { %v4706_v10 = vpop.f32.mrf.mxu0 }
 0xc19   : > { %v4788_v27 = vadd.f32 %v4787_v16, %v4706_v10  ;;  %v5088_v28 = vpop.f32.mrf.mxu1 }
 0xc1a   : > { %v12221_v5 = vpop.f32.mrf.mxu0 }
 0xc1b   : > { %v12256_v6 = vpop.f32.mrf.mxu1 }
 0xc1d   : > { %v4863_v11 = vpop.f32.mrf.mxu0 }
 0xc1e   : > { %v4864_v12 = vadd.f32 %v4863_v11, %v4788_v27  ;;  %v11347_v27 = vld [vmem:[%s13220_s18 + $0x38] sm:$0xff] }
 0xc1f   : > { %v12235_v13 = vpop.f32.mrf.mxu0 }
 0xc20   : > { %v4939_v17 = vadd.f32 %v4938_v1, %v4864_v12 }
 0xc21   : > { %v5311_v22 = vpop.f32.mrf.mxu1 }
 0xc22   : > { %v5015_v23 = vpop.f32.mrf.mxu0 }
 0xc23   : > { %v5016_v24 = vadd.f32 %v5015_v23, %v4939_v17  ;;  %v12270_v25 = vpop.f32.mrf.mxu1 }
 0xc24   : > { %v12249_v31 = vpop.f32.mrf.mxu0 }
 0xc25   : > { %v13979_v33 = vadd.f32 %v5088_v28, %v5016_v24  ;;  %v11346_v28 = vld [vmem:[%s13220_s18 + $0x30] sm:$0xff]  ;;  %s13081_s18 = smov 16  }
 0xc29   : > { %v5462_v37 = vpop.f32.mrf.mxu1 }
 0xc2a   : > { %v5230_v38 = vpop.f32.mrf.mxu0 }
 0xc2b   : > { %v12284_v43 = vpop.f32.mrf.mxu1  ;;  %v5312_v46 = vadd.f32 %v5311_v22, %v5230_v38 }
 0xc2c   : > { %v12263_v7 = vpop.f32.mrf.mxu0 }
 0xc31   : > { %v5612_v44 = vpop.f32.mrf.mxu1 }
 0xc32   : > { %v5387_v45 = vpop.f32.mrf.mxu0 }
 0xc33   : > { %v12298_v47 = vpop.f32.mrf.mxu1  ;;  %v5388_v26 = vadd.f32 %v5387_v45, %v5312_v46 }
 0xc34   : > { %v12277_v3 = vpop.f32.mrf.mxu0 }
 0xc35   : > { %v5463_v48 = vadd.f32 %v5462_v37, %v5388_v26 }
 0xc3a   : > { %v5539_v30 = vpop.f32.mrf.mxu0 }
 0xc3b   : > { %v5540_v52 = vadd.f32 %v5539_v30, %v5463_v48 }
 0xc3c   : > { %v12291_v55 = vpop.f32.mrf.mxu0 }
 0xc3d   : > { %v5613_v56 = vadd.f32 %v5612_v44, %v5540_v52 }
 0xc3f   : > { %v5616_v50 = vmul.f32 0.35355338, %v5613_v56 }
 0xc41   : > { %v5617_v40 = vsel %vm13482_vm9, %v5616_v50, -1e+30 }
 0xc42   : > { %v5618_v29 = vsel %vm1737_vm10, %v5617_v40, -inf }
 0xc43   : > { %5619 = vmax.xlane.f32.xlu0 %v5618_v29 }
 0xc59   : > { %5120 = vrot.lane.b32.xlu0 %v11340_v35, %s13070_s20  ;;  %s15060_s20 = sld [smem:[#allocation15_spill]] (!%p11356_p5) }
 0xc5d   : > { %5143 = vrot.lane.b32.xlu0 %v5127_v54, %s13073_s26 }
 0xccc   : > { %v5620_v14 = vpop.xlane.xlu0 %5619 }
 0xccd   : > { %v5621_v57 = vsub.f32 %v5617_v40, %v5620_v14 }
 0xccf   : > { %v5622_v62 = vmul.f32 1.442695, %v5621_v57 }
 0xcd0   : > { %v5121_v2 = vpop.permute.xlu0 %5120 }
 0xcd1   : > { %13006 = vpow2.f32 %v5622_v62  ;;  %v5126_v63 = vsel %vm13404_vm7, %v13866_v32, %v5121_v2 }
 0xcd2   : > { %5141 = vrot.lane.b32.xlu0 %v5126_v63, %s13073_s26 }
 0xcd4   : > { %v5144_v4 = vpop.permute.xlu0 %5143 }
 0xcd5   : > { %11345 = vst.msk [vmem:[%s13240_s2 + $0x28] sm:$0xff] %vm1253_vm8, %v5144_v4  ;;  %v13996_v8 = vand.u32 4294901760, %v5144_v4 }
 0xcd6   : > { %6092 = vrot.lane.b32.xlu0 %v13903_v34, %s13074_s6 }
 0xcd7   : > { %v14001_v20 = vsub.f32 %v5144_v4, %v13996_v8  ;;  %12300 = vmatpush3.msra.mxu0 %v13996_v8 }
 0xcd8   : > { %12301 = vmatprep.subr.mxu0 %v13067_v18 }
 0xcd9   : > { %v14006_v16 = vand.u32 4294901760, %v14001_v20 }
 0xcdb   : > { %v5741_v0 = vsub.f32 %v14001_v20, %v14006_v16 }
 0xcdd   : > { %v14010_v1 = vand.u32 4294901760, %v5741_v0 }
 0xcde   : > { %v13007_v9 = vpop.eup %13006 }
 0xcdf   : > { %12307 = vmatpush3.msra.mxu1 %v14010_v1  ;;  %v5624_v10 = vsel %vm1737_vm10, %v13007_v9, 0.0 }
 0xce0   : > { %5625 = vadd.xlane.f32.xlu1 %v5624_v10  ;;  %12308 = vmatprep.subr.mxu1 %v13067_v18 }
 0xcf1   : > { %7042 = vrot.lane.b32.xlu1 %v11347_v27, %s13075_s8 }
 0xcf5   : > { %7040 = vrot.lane.b32.xlu1 %v11346_v28, %s13075_s8 }
 0xd44   : > { %v5142_v5 = vpop.permute.xlu0 %5141 }
 0xd45   : > { %11344 = vst.msk [vmem:[%s13240_s2 + $0x20] sm:$0xff] %vm1253_vm8, %v5142_v5  ;;  %v14021_v6 = vand.u32 4294901760, %v5142_v5 }
 0xd47   : > { %v14024_v11 = vsub.f32 %v5142_v5, %v14021_v6  ;;  %12302 = vmatpush3.msra.mxu0 %v14021_v6 }
 0xd48   : > { %12313 = vmatprep.subr.mxu0 %v13067_v18  ;;  %v6093_v38 = vpop.permute.xlu0 %6092 }
 0xd49   : > { %v14029_v12 = vand.u32 4294901760, %v14024_v11  ;;  %v6094_v44 = vsel %vm1253_vm8, %v6093_v38, 0 }
 0xd4a   : > { %v6163_v46 = vand.u32 4294901760, %v6094_v44 }
 0xd4b   : > { %v5748_v13 = vsub.f32 %v14024_v11, %v14029_v12 }
 0xd4c   : > { %v6164_v47 = vsub.f32 %v6094_v44, %v6163_v46 }
 0xd4d   : > { %v14033_v17 = vand.u32 4294901760, %v5748_v13 }
 0xd4f   : > { %12309 = vmatpush3.msra.mxu1 %v14033_v17 }
 0xd50   : > { %12320 = vmatprep.subr.mxu1 %v13067_v18 }
 0xd69   : > { %v5626_v22 = vpop.xlane.xlu1 %5625 }
 0xd6a   : > { %13008 = vrcp.f32 %v5626_v22 }
 0xd77   : > { %v13009_v23 = vpop.eup %13008 }
 0xd78   : > { %v5628_v24 = vmul.f32 %v13009_v23, %v13007_v9 }
 0xd7a   : > { %v5630_v25 = vsel %vm1749_vm11, %v5628_v24, 0 }
 0xd7b   : > { %v5699_v31 = vand.u32 4294901760, %v5630_v25 }
 0xd7d   : > { %v5700_v37 = vsub.f32 %v5630_v25, %v5699_v31  ;;  %12311 = vmatmul.mubr.f32.vlgmr.msra.gmra.mxu1 %v5699_v31 }
 0xd7e   : > { %12321 = vmatpush3.msra.mxu1 %v13996_v8  ;;  %12324 = vmatprep.mubr.msk.f32.mxu1 %vm13068_vm2, %v13067_v18 }
 0xd7f   : > { %12322 = vmatprep.subr.mxu1 %v13067_v18  ;;  %v5701_v43 = vand.u32 4294901760, %v5700_v37 }
 0xd80   : > { %12323 = vmatpush3.msra.mxu1 %v14021_v6 }
 0xd81   : > { %12334 = vmatprep.subr.mxu1 %v13067_v18  ;;  %12325 = vmatmul.mubr.f32.vlgmr.msra.gmra.mxu1 %v5701_v43  ;;  %v5702_v7 = vsub.f32 %v5700_v37, %v5701_v43 }
 0xd82   : > { %12335 = vmatpush3.msra.mxu1 %v13996_v8  ;;  %12338 = vmatprep.mubr.msk.f32.mxu1 %vm13068_vm2, %v13067_v18 }
 0xd83   : > { %12336 = vmatprep.subr.mxu1 %v13067_v18  ;;  %v5703_v45 = vand.u32 4294901760, %v5702_v7  ;;  %v11349_v7 = vld [vmem:[%s13225_s21 + $0x38] sm:$0xff] }
 0xd84   : > { %12337 = vmatpush3.msra.mxu1 %v14021_v6 }
 0xd85   : > { %12348 = vmatprep.subr.mxu1 %v13067_v18  ;;  %12304 = vmatmul.mubr.f32.vlgmr.msra.gmra.mxu0 %v5703_v45 }
 0xd86   : > { %12314 = vmatpush3.msra.mxu0 %v14001_v20  ;;  %12339 = vmatmul.mubr.f32.vlgmr.msra.gmra.mxu1 %v5699_v31 }
 0xd87   : > { %12349 = vmatpush3.xpose.msra.mxu1 %v13921_v59  ;;  %12315 = vmatprep.subr.mxu0 %v13067_v18  ;;  %v6165_v59 = vand.u32 4294901760, %v6164_v47 }
 0xd88   : > { %12316 = vmatpush3.msra.mxu0 %v14024_v11  ;;  %12317 = vmatprep.mubr.msk.f32.mxu0 %vm13068_vm2, %v13067_v18 }
 0xd89   : > { %12327 = vmatprep.subr.mxu0 %v13067_v18  ;;  %12350 = vmatprep.subr.mxu1 %v13067_v18 }
 0xd8a   : > { %12318 = vmatmul.mubr.f32.vlgmr.msra.gmra.mxu0 %v5700_v37  ;;  %12352 = vmatprep.mubr.msk.f32.mxu1 %vm13068_vm2, %v13067_v18 }
 0xd8b   : > { %12328 = vmatpush3.msra.mxu0 %v14006_v16  ;;  %12351 = vmatpush3.xpose.msra.mxu1 %v13933_v19  ;;  %v6166_v19 = vsub.f32 %v6164_v47, %v6165_v59 }
 0xd8c   : > { %12329 = vmatprep.subr.mxu0 %v13067_v18  ;;  %12331 = vmatprep.mubr.msk.f32.mxu0 %vm13068_vm2, %v13067_v18 }
 0xd8d   : > { %12330 = vmatpush3.msra.mxu0 %v14029_v12  ;;  %12362 = vmatprep.subr.mxu1 %v13067_v18  ;;  %v6167_v3 = vand.u32 4294901760, %v6166_v19 }
 0xd8e   : > { %12341 = vmatprep.subr.mxu0 %v13067_v18  ;;  %12353 = vmatmul.mubr.f32.vlgmr.msra.gmra.mxu1 %v6163_v46 }
 0xd8f   : > { %12332 = vmatmul.mubr.f32.vlgmr.msra.gmra.mxu0 %v5699_v31  ;;  %12363 = vmatpush3.xpose.msra.mxu1 %v13884_v39  ;;  %v7043_v31 = vpop.permute.xlu1 %7042 }
 0xd90   : > { %12342 = vmatpush3.xpose.msra.mxu0 %v13884_v39  ;;  %12364 = vmatprep.subr.mxu1 %v13067_v18  ;;  %v7047_v37 = vsel %vm13391_vm6, %v13866_v32, %v7043_v31 }
 0xd91   : > { %12343 = vmatprep.subr.mxu0 %v13067_v18  ;;  %12345 = vmatprep.mubr.msk.f32.mxu0 %vm13068_vm2, %v13067_v18 }
 0xd92   : > { %12366 = vmatprep.mubr.msk.f32.mxu1 %vm13068_vm2, %v13067_v18 }
 0xd93   : > { %12365 = vmatpush3.xpose.msra.mxu1 %v13890_v49  ;;  %v7041_v38 = vpop.permute.xlu1 %7040 }
 0xd94   : > { %12344 = vmatpush3.xpose.msra.mxu0 %v13890_v49  ;;  %12376 = vmatprep.subr.mxu1 %v13067_v18  ;;  %v7046_v43 = vsel %vm13404_vm7, %v13866_v32, %v7041_v38 }
 0xd95   : > { %12355 = vmatprep.subr.mxu0 %v13067_v18 }
 0xd96   : > { %12367 = vmatmul.mubr.f32.vlgmr.msra.gmra.mxu1 %v6165_v59 }
 0xd97   : > { %12346 = vmatmul.mubr.f32.vlgmr.msra.gmra.mxu0 %v6167_v3  ;;  %12377 = vmatpush3.xpose.msra.mxu1 %v13884_v39 }
 0xd98   : > { %12356 = vmatpush3.xpose.msra.mxu0 %v13888_v60  ;;  %12378 = vmatprep.subr.mxu1 %v13067_v18 }
 0xd99   : > { %12357 = vmatprep.subr.mxu0 %v13067_v18  ;;  %12359 = vmatprep.mubr.msk.f32.mxu0 %vm13068_vm2, %v13067_v18 }
 0xd9a   : > { %12380 = vmatprep.mubr.msk.f32.mxu1 %vm13068_vm2, %v13067_v18 }
 0xd9b   : > { %12379 = vmatpush3.xpose.msra.mxu1 %v13890_v49 }
 0xd9c   : > { %12358 = vmatpush3.xpose.msra.mxu0 %v13897_v51  ;;  %12390 = vmatprep.subr.mxu1 %v13067_v18 }
 0xd9d   : > { %12369 = vmatprep.subr.mxu0 %v13067_v18 }
 0xd9e   : > { %12381 = vmatmul.mubr.f32.vlgmr.msra.gmra.mxu1 %v6163_v46 }
 0xd9f   : > { %12360 = vmatmul.mubr.f32.vlgmr.msra.gmra.mxu0 %v6164_v47  ;;  %12391 = vmatpush3.msra.mxu1 %v14010_v1 }
 0xda0   : > { %12370 = vmatpush3.xpose.msra.mxu0 %v13894_v42  ;;  %12392 = vmatprep.subr.mxu1 %v13067_v18 }
 0xda1   : > { %12393 = vmatpush3.msra.mxu1 %v14033_v17  ;;  %12371 = vmatprep.subr.mxu0 %v13067_v18 }
 0xda2   : > { %12373 = vmatprep.mubr.msk.f32.mxu0 %vm13068_vm2, %v13067_v18  ;;  %12394 = vmatprep.mubr.msk.f32.mxu1 %vm13068_vm2, %v13067_v18 }
 0xda3   : > { %12404 = vmatprep.subr.mxu1 %v13067_v18 }
 0xda4   : > { %12372 = vmatpush3.xpose.msra.mxu0 %v13908_v36 }
 0xda5   : > { %12383 = vmatprep.subr.mxu0 %v13067_v18 }
 0xda7   : > { %12374 = vmatmul.mubr.f32.vlgmr.msra.gmra.mxu0 %v6163_v46 }
 0xda8   : > { %12384 = vmatpush3.msra.mxu0 %v13996_v8  ;;  %12387 = vmatprep.mubr.msk.f32.mxu0 %vm13068_vm2, %v13067_v18 }
 0xda9   : > { %12385 = vmatprep.subr.mxu0 %v13067_v18 }
 0xdaa   : > { %12386 = vmatpush3.msra.mxu0 %v14021_v6 }
 0xdab   : > { %12397 = vmatprep.subr.mxu0 %v13067_v18 }
 0xe3d   : > { %v5786_v39 = vpop.f32.mrf.mxu1 }
 0xe3f   : > { %v12312_v60 = vpop.f32.mrf.mxu1 }
 0xe41   : > { %v5937_v49 = vpop.f32.mrf.mxu1 }
 0xe43   : > { %v12326_v42 = vpop.f32.mrf.mxu1 }
 0xe45   : > { %v5705_v51 = vpop.f32.mrf.mxu0 }
 0xe46   : > { %v6087_v36 = vpop.f32.mrf.mxu1  ;;  %v5787_v30 = vadd.f32 %v5786_v39, %v5705_v51 }
 0xe47   : > { %v12305_v26 = vpop.f32.mrf.mxu0 }
 0xe48   : > { %v12340_v48 = vpop.f32.mrf.mxu1 }
 0xe4a   : > { %v5862_v52 = vpop.f32.mrf.mxu0 }
 0xe4b   : > { %v5863_v55 = vadd.f32 %v5862_v52, %v5787_v30 }
 0xe4c   : > { %v12319_v56 = vpop.f32.mrf.mxu0 }
 0xe4d   : > { %v5938_v50 = vadd.f32 %v5937_v49, %v5863_v55 }
 0xe4e   : > { %v6250_v40 = vpop.f32.mrf.mxu1 }
 0xe4f   : > { %v6014_v29 = vpop.f32.mrf.mxu0 }
 0xe50   : > { %v6015_v35 = vadd.f32 %v6014_v29, %v5938_v50  ;;  %v12354_v53 = vpop.f32.mrf.mxu1 }
 0xe51   : > { %v12333_v54 = vpop.f32.mrf.mxu0 }
 0xe52   : > { %v6088_v14 = vadd.f32 %v6087_v36, %v6015_v35 }
 0xe54   : > { %6091 = vst.msk [vmem:[#allocation3 + $0x1] sm:$0x1] %vm2212_vm12, %v6088_v14 }
 0xe56   : > { %v6401_v57 = vpop.f32.mrf.mxu1 }
 0xe57   : > { %v6169_v62 = vpop.f32.mrf.mxu0 }
 0xe58   : > { %v12368_v2 = vpop.f32.mrf.mxu1  ;;  %v6251_v1 = vadd.f32 %v6250_v40, %v6169_v62 }
 0xe59   : > { %v12347_v63 = vpop.f32.mrf.mxu0 }
 0xe5e   : > { %v6551_v4 = vpop.f32.mrf.mxu1 }
 0xe5f   : > { %v6326_v0 = vpop.f32.mrf.mxu0 }
 0xe60   : > { %v12382_v9 = vpop.f32.mrf.mxu1  ;;  %v6327_v27 = vadd.f32 %v6326_v0, %v6251_v1 }
 0xe61   : > { %v12361_v10 = vpop.f32.mrf.mxu0 }
 0xe62   : > { %v6402_v28 = vadd.f32 %v6401_v57, %v6327_v27 }
 0xe67   : > { %v6478_v5 = vpop.f32.mrf.mxu0 }
 0xe68   : > { %v6479_v13 = vadd.f32 %v6478_v5, %v6402_v28 }
 0xe69   : > { %v12375_v17 = vpop.f32.mrf.mxu0 }
 0xe6a   : > { %v6552_v22 = vadd.f32 %v6551_v4, %v6479_v13 }
 0xe6c   : > { %v6555_v23 = vmul.f32 0.35355338, %v6552_v22 }
 0xe6e   : > { %v6556_v24 = vsel %vm13482_vm9, %v6555_v23, -1e+30 }
 0xe6f   : > { %v6557_v25 = vsel %vm1737_vm10, %v6556_v24, -inf }
 0xe70   : > { %6558 = vmax.xlane.f32.xlu0 %v6557_v25 }
 0xe86   : > { %7065 = vrot.lane.b32.xlu0 %v7047_v37, %s13076_s11 }
 0xe8a   : > { %7063 = vrot.lane.b32.xlu0 %v7046_v43, %s13076_s11 }
 0xe8e   : > { %7083 = vrot.lane.b32.xlu0 %v13903_v34, %s13077_s30  ;;  %s15061_s30 = sld [smem:[#allocation14_spill]] (!%p11356_p5) }
 0xe92   : > { %7055 = vrot.lane.b32.xlu0 %v11349_v7, %s13078_s19 }
 0xef9   : > { %v6559_v44 = vpop.xlane.xlu0 %6558 }
 0xefa   : > { %v6560_v45 = vsub.f32 %v6556_v24, %v6559_v44 }
 0xefc   : > { %v6561_v46 = vmul.f32 1.442695, %v6560_v45 }
 0xefd   : > { %v7066_v47 = vpop.permute.xlu0 %7065 }
 0xefe   : > { %13010 = vpow2.f32 %v6561_v46  ;;  %11351 = vst.msk [vmem:[%s13235_s29 + $0x38] sm:$0xff] %vm1253_vm8, %v7066_v47  ;;  %v7089_v60 = vsel %vm1253_vm8, %v7066_v47, 0 }
 0xeff   : > { %v14133_v49 = vand.u32 4294901760, %v7089_v60 }
 0xf01   : > { %v7064_v59 = vpop.permute.xlu0 %7063  ;;  %v14137_v26 = vsub.f32 %v7089_v60, %v14133_v49 }
 0xf02   : > { %11350 = vst.msk [vmem:[%s13235_s29 + $0x30] sm:$0xff] %vm1253_vm8, %v7064_v59  ;;  %v7087_v42 = vsel %vm1253_vm8, %v7064_v59, 0  ;;  %s13083_s29 = smov 24  }
 0xf03   : > { %v14139_v48 = vand.u32 4294901760, %v7087_v42  ;;  %v14143_v55 = vand.u32 4294901760, %v14137_v26 }
 0xf05   : > { %v14146_v56 = vsub.f32 %v7087_v42, %v14139_v48  ;;  %v7084_v40 = vpop.permute.xlu0 %7083  ;;  %v7200_v54 = vsub.f32 %v14137_v26, %v14143_v55 }
 0xf06   : > { %v7085_v14 = vsel %vm1253_vm8, %v7084_v40, 0 }
 0xf07   : > { %v14154_v35 = vand.u32 4294901760, %v14146_v56  ;;  %v7158_v62 = vand.u32 4294901760, %v7085_v14  ;;  %v14166_v2 = vand.u32 4294901760, %v7200_v54 }
 0xf09   : > { %v7207_v63 = vsub.f32 %v14146_v56, %v14154_v35  ;;  %v7056_v54 = vpop.permute.xlu0 %7055 }
 0xf0b   : > { %v13011_v19 = vpop.eup %13010 }
 0xf0c   : > { %v6563_v3 = vsel %vm1737_vm10, %v13011_v19, 0.0 }
 0xf0d   : > { %6564 = vadd.xlane.f32.xlu1 %v6563_v3 }
 0xf96   : > { %v6565_v39 = vpop.xlane.xlu1 %6564 }
 0xf97   : > { %13012 = vrcp.f32 %v6565_v39 }
 0xfa4   : > { %v13013_v51 = vpop.eup %13012 }
 0xfa5   : > { %v6567_v36 = vmul.f32 %v13013_v51, %v13011_v19 }
 0xfa7   : > { %v6569_v30 = vsel %vm1749_vm11, %v6567_v36, 0 }
 0xfa8   : > { %v6638_v52 = vand.u32 4294901760, %v6569_v30 }
 0xfaa   : > { %v6639_v50 = vsub.f32 %v6569_v30, %v6638_v52  ;;  %12395 = vmatmul.mubr.f32.vlgmr.msra.gmra.mxu1 %v6638_v52 }
 0xfab   : > { %12405 = vmatpush3.msra.mxu1 %v13996_v8  ;;  %12408 = vmatprep.mubr.msk.f32.mxu1 %vm13068_vm2, %v13067_v18 }
 0xfac   : > { %12406 = vmatprep.subr.mxu1 %v13067_v18  ;;  %v6640_v29 = vand.u32 4294901760, %v6639_v50 }
 0xfad   : > { %12407 = vmatpush3.msra.mxu1 %v14021_v6 }
 0xfae   : > { %12418 = vmatprep.subr.mxu1 %v13067_v18  ;;  %12409 = vmatmul.mubr.f32.vlgmr.msra.gmra.mxu1 %v6640_v29  ;;  %v6641_v53 = vsub.f32 %v6639_v50, %v6640_v29 }
 0xfaf   : > { %12419 = vmatpush3.msra.mxu1 %v13996_v8  ;;  %12422 = vmatprep.mubr.msk.f32.mxu1 %vm13068_vm2, %v13067_v18  ;;  %v7159_v8 = vsub.f32 %v7085_v14, %v7158_v62  ;;  %v7060_v14 = vsel %vm13391_vm6, %v13866_v32, %v7056_v54 }
 0xfb0   : > { %12420 = vmatprep.subr.mxu1 %v13067_v18  ;;  %v6642_v57 = vand.u32 4294901760, %v6641_v53  ;;  %v11348_v53 = vld [vmem:[%s13225_s21 + $0x30] sm:$0xff]  ;;  %s13082_s21 = smov 8  }
 0xfb1   : > { %12421 = vmatpush3.msra.mxu1 %v14021_v6  ;;  %v14178_v6 = vand.u32 4294901760, %v7207_v63 }
 0xfb2   : > { %12432 = vmatprep.subr.mxu1 %v13067_v18  ;;  %12388 = vmatmul.mubr.f32.vlgmr.msra.gmra.mxu0 %v6642_v57 }
 0xfb3   : > { %12398 = vmatpush3.msra.mxu0 %v14001_v20  ;;  %12423 = vmatmul.mubr.f32.vlgmr.msra.gmra.mxu1 %v6638_v52  ;;  %v7160_v20 = vand.u32 4294901760, %v7159_v8 }
 0xfb4   : > { %12433 = vmatpush3.xpose.msra.mxu1 %v14166_v2  ;;  %12399 = vmatprep.subr.mxu0 %v13067_v18 }
 0xfb5   : > { %12400 = vmatpush3.msra.mxu0 %v14024_v11  ;;  %12401 = vmatprep.mubr.msk.f32.mxu0 %vm13068_vm2, %v13067_v18 }
 0xfb6   : > { %12411 = vmatprep.subr.mxu0 %v13067_v18  ;;  %12434 = vmatprep.subr.mxu1 %v13067_v18 }
 0xfb7   : > { %12402 = vmatmul.mubr.f32.vlgmr.msra.gmra.mxu0 %v6639_v50  ;;  %12436 = vmatprep.mubr.msk.f32.mxu1 %vm13068_vm2, %v13067_v18 }
 0xfb8   : > { %12412 = vmatpush3.msra.mxu0 %v14006_v16  ;;  %12435 = vmatpush3.xpose.msra.mxu1 %v14178_v6  ;;  %v7161_v16 = vsub.f32 %v7159_v8, %v7160_v20 }
 0xfb9   : > { %12413 = vmatprep.subr.mxu0 %v13067_v18  ;;  %12415 = vmatprep.mubr.msk.f32.mxu0 %vm13068_vm2, %v13067_v18 }
 0xfba   : > { %12414 = vmatpush3.msra.mxu0 %v14029_v12  ;;  %12446 = vmatprep.subr.mxu1 %v13067_v18  ;;  %v7162_v11 = vand.u32 4294901760, %v7161_v16 }
 0xfbb   : > { %12425 = vmatprep.subr.mxu0 %v13067_v18  ;;  %12437 = vmatmul.mubr.f32.vlgmr.msra.gmra.mxu1 %v7158_v62 }
 0xfbc   : > { %12416 = vmatmul.mubr.f32.vlgmr.msra.gmra.mxu0 %v6638_v52  ;;  %12447 = vmatpush3.xpose.msra.mxu1 %v14133_v49 }
 0xfbd   : > { %12426 = vmatpush3.xpose.msra.mxu0 %v14133_v49  ;;  %12448 = vmatprep.subr.mxu1 %v13067_v18 }
 0xfbe   : > { %12427 = vmatprep.subr.mxu0 %v13067_v18  ;;  %12429 = vmatprep.mubr.msk.f32.mxu0 %vm13068_vm2, %v13067_v18 }
 0xfbf   : > { %12450 = vmatprep.mubr.msk.f32.mxu1 %vm13068_vm2, %v13067_v18 }
 0xfc0   : > { %12449 = vmatpush3.xpose.msra.mxu1 %v14139_v48 }
 0xfc1   : > { %12428 = vmatpush3.xpose.msra.mxu0 %v14139_v48  ;;  %12460 = vmatprep.subr.mxu1 %v13067_v18 }
 0xfc2   : > { %12439 = vmatprep.subr.mxu0 %v13067_v18 }
 0xfc3   : > { %12451 = vmatmul.mubr.f32.vlgmr.msra.gmra.mxu1 %v7160_v20 }
 0xfc4   : > { %12430 = vmatmul.mubr.f32.vlgmr.msra.gmra.mxu0 %v7162_v11  ;;  %12461 = vmatpush3.xpose.msra.mxu1 %v14133_v49 }
 0xfc5   : > { %12440 = vmatpush3.xpose.msra.mxu0 %v14137_v26  ;;  %12462 = vmatprep.subr.mxu1 %v13067_v18 }
 0xfc6   : > { %12441 = vmatprep.subr.mxu0 %v13067_v18  ;;  %12443 = vmatprep.mubr.msk.f32.mxu0 %vm13068_vm2, %v13067_v18 }
 0xfc7   : > { %12464 = vmatprep.mubr.msk.f32.mxu1 %vm13068_vm2, %v13067_v18 }
 0xfc8   : > { %12463 = vmatpush3.xpose.msra.mxu1 %v14139_v48 }
 0xfc9   : > { %12442 = vmatpush3.xpose.msra.mxu0 %v14146_v56  ;;  %12474 = vmatprep.subr.mxu1 %v13067_v18 }
 0xfca   : > { %12453 = vmatprep.subr.mxu0 %v13067_v18 }
 0xfcb   : > { %12465 = vmatmul.mubr.f32.vlgmr.msra.gmra.mxu1 %v7158_v62 }
 0xfcc   : > { %12444 = vmatmul.mubr.f32.vlgmr.msra.gmra.mxu0 %v7159_v8  ;;  %12478 = vmatprep.mubr.msk.f32.mxu1 %vm13068_vm2, %v13067_v18 }
 0xfcd   : > { %12454 = vmatpush3.xpose.msra.mxu0 %v14143_v55  ;;  %12457 = vmatprep.mubr.msk.f32.mxu0 %vm13068_vm2, %v13067_v18 }
 0xfce   : > { %12455 = vmatprep.subr.mxu0 %v13067_v18 }
 0xfd1   : > { %12456 = vmatpush3.xpose.msra.mxu0 %v14154_v35 }
 0xfd2   : > { %12467 = vmatprep.subr.mxu0 %v13067_v18 }
 0xfd4   : > { %12458 = vmatmul.mubr.f32.vlgmr.msra.gmra.mxu0 %v7158_v62 }
 0xfd5   : > { %12471 = vmatprep.mubr.msk.f32.mxu0 %vm13068_vm2, %v13067_v18 }
0x106a   : > { %v6725_v12 = vpop.f32.mrf.mxu1 }
0x106c   : > { %v12396_v4 = vpop.f32.mrf.mxu1 }
0x106e   : > { %v6876_v0 = vpop.f32.mrf.mxu1 }
0x1070   : > { %v12410_v1 = vpop.f32.mrf.mxu1 }
0x1072   : > { %v6644_v9 = vpop.f32.mrf.mxu0 }
0x1073   : > { %v6726_v10 = vadd.f32 %v6725_v12, %v6644_v9  ;;  %v7026_v27 = vpop.f32.mrf.mxu1 }
0x1074   : > { %v12389_v28 = vpop.f32.mrf.mxu0 }
0x1075   : > { %v12424_v5 = vpop.f32.mrf.mxu1 }
0x1077   : > { %v6801_v13 = vpop.f32.mrf.mxu0 }
0x1078   : > { %v6802_v17 = vadd.f32 %v6801_v13, %v6726_v10 }
0x1079   : > { %v12403_v22 = vpop.f32.mrf.mxu0 }
0x107a   : > { %v6877_v23 = vadd.f32 %v6876_v0, %v6802_v17 }
0x107b   : > { %v7245_v24 = vpop.f32.mrf.mxu1 }
0x107c   : > { %v6953_v25 = vpop.f32.mrf.mxu0 }
0x107d   : > { %v6954_v31 = vadd.f32 %v6953_v25, %v6877_v23  ;;  %v12438_v37 = vpop.f32.mrf.mxu1 }
0x107e   : > { %v12417_v38 = vpop.f32.mrf.mxu0 }
0x107f   : > { %v14224_v43 = vadd.f32 %v7026_v27, %v6954_v31 }
0x1083   : > { %v7396_v7 = vpop.f32.mrf.mxu1 }
0x1084   : > { %v7164_v44 = vpop.f32.mrf.mxu0 }
0x1085   : > { %v12452_v45 = vpop.f32.mrf.mxu1  ;;  %v7246_v19 = vadd.f32 %v7245_v24, %v7164_v44 }
0x1086   : > { %v12431_v46 = vpop.f32.mrf.mxu0 }
0x108b   : > { %v7546_v47 = vpop.f32.mrf.mxu1 }
0x108c   : > { %v7321_v59 = vpop.f32.mrf.mxu0 }
0x108d   : > { %v12466_v3 = vpop.f32.mrf.mxu1  ;;  %v7322_v60 = vadd.f32 %v7321_v59, %v7246_v19 }
0x108e   : > { %v12445_v39 = vpop.f32.mrf.mxu0 }
0x108f   : > { %v7397_v42 = vadd.f32 %v7396_v7, %v7322_v60 }
0x1094   : > { %v7473_v51 = vpop.f32.mrf.mxu0 }
0x1095   : > { %v7474_v36 = vadd.f32 %v7473_v51, %v7397_v42 }
0x1096   : > { %v12459_v30 = vpop.f32.mrf.mxu0 }
0x1097   : > { %v7547_v52 = vadd.f32 %v7546_v47, %v7474_v36 }
0x1099   : > { %v7550_v50 = vmul.f32 0.35355338, %v7547_v52 }
0x109b   : > { %v7551_v40 = vsel %vm13482_vm9, %v7550_v50, -1e+30 }
0x109c   : > { %v7552_v29 = vsel %vm1737_vm10, %v7551_v40, -inf }
0x109d   : > { %7553 = vmax.xlane.f32.xlu1 %v7552_v29 }
0x10ae   : > { %7053 = vrot.lane.b32.xlu1 %v11348_v53, %s13078_s19 }
0x10b2   : > { %7076 = vrot.lane.b32.xlu1 %v7060_v14, %s13079_s28 }
0x1126   : > { %v7554_v57 = vpop.xlane.xlu1 %7553 }
0x1127   : > { %v7555_v62 = vsub.f32 %v7551_v40, %v7554_v57 }
0x1129   : > { %v7556_v63 = vmul.f32 1.442695, %v7555_v62 }
0x112a   : > { %v7054_v8 = vpop.permute.xlu1 %7053 }
0x112b   : > { %13014 = vpow2.f32 %v7556_v63  ;;  %v7059_v20 = vsel %vm13404_vm7, %v13866_v32, %v7054_v8 }
0x112c   : > { %7074 = vrot.lane.b32.xlu1 %v7059_v20, %s13079_s28 }
0x112e   : > { %v7077_v16 = vpop.permute.xlu1 %7076 }
0x112f   : > { %11353 = vst.msk [vmem:[%s13240_s2 + $0x38] sm:$0xff] %vm1253_vm8, %v7077_v16  ;;  %v14241_v11 = vand.u32 4294901760, %v7077_v16 }
0x1130   : > { %8030 = vrot.lane.b32.xlu1 %v13903_v34, %s13080_s14 }
0x1131   : > { %v14246_v15 = vsub.f32 %v7077_v16, %v14241_v11  ;;  %12468 = vmatpush3.msra.mxu0 %v14241_v11 }
0x1132   : > { %12469 = vmatprep.subr.mxu0 %v13067_v18 }
0x1133   : > { %v14251_v21 = vand.u32 4294901760, %v14246_v15 }
0x1135   : > { %v7675_v32 = vsub.f32 %v14246_v15, %v14251_v21 }
0x1137   : > { %v14255_v12 = vand.u32 4294901760, %v7675_v32 }
0x1138   : > { %v13015_v4 = vpop.eup %13014 }
0x1139   : > { %12475 = vmatpush3.msra.mxu1 %v14255_v12  ;;  %v7558_v34 = vsel %vm1737_vm10, %v13015_v4, 0.0 }
0x113a   : > { %7559 = vadd.xlane.f32.xlu0 %v7558_v34  ;;  %12476 = vmatprep.subr.mxu1 %v13067_v18 }
0x119e   : > { %v7075_v0 = vpop.permute.xlu1 %7074 }
0x119f   : > { %11352 = vst.msk [vmem:[%s13240_s2 + $0x30] sm:$0xff] %vm1253_vm8, %v7075_v0  ;;  %v14262_v1 = vand.u32 4294901760, %v7075_v0  ;;  %s15059_s2 = scalar_lea.vmem %s15026_s7, %s13189_s27 }
0x11a1   : > { %v14265_v9 = vsub.f32 %v7075_v0, %v14262_v1  ;;  %12470 = vmatpush3.msra.mxu0 %v14262_v1 }
0x11a2   : > { %12481 = vmatprep.subr.mxu0 %v13067_v18  ;;  %v8031_v25 = vpop.permute.xlu1 %8030 }
0x11a3   : > { %v14270_v10 = vand.u32 4294901760, %v14265_v9  ;;  %v8032_v38 = vsel %vm1253_vm8, %v8031_v25, 0 }
0x11a4   : > { %v8101_v44 = vand.u32 4294901760, %v8032_v38 }
0x11a5   : > { %v7682_v27 = vsub.f32 %v14265_v9, %v14270_v10 }
0x11a6   : > { %v8102_v45 = vsub.f32 %v8032_v38, %v8101_v44 }
0x11a7   : > { %v14274_v28 = vand.u32 4294901760, %v7682_v27 }
0x11a9   : > { %12477 = vmatpush3.msra.mxu1 %v14274_v28 }
0x11aa   : > { %12488 = vmatprep.subr.mxu1 %v13067_v18 }
0x11c3   : > { %v7560_v5 = vpop.xlane.xlu0 %7559 }
0x11c4   : > { %13016 = vrcp.f32 %v7560_v5 }
0x11d1   : > { %v13017_v13 = vpop.eup %13016 }
0x11d2   : > { %v7562_v17 = vmul.f32 %v13017_v13, %v13015_v4 }
0x11d4   : > { %v7564_v22 = vsel %vm1749_vm11, %v7562_v17, 0 }
0x11d5   : > { %v7633_v23 = vand.u32 4294901760, %v7564_v22 }
0x11d7   : > { %v7634_v24 = vsub.f32 %v7564_v22, %v7633_v23  ;;  %12479 = vmatmul.mubr.f32.vlgmr.msra.gmra.mxu1 %v7633_v23 }
0x11d8   : > { %12489 = vmatpush3.msra.mxu1 %v14241_v11  ;;  %12492 = vmatprep.mubr.msk.f32.mxu1 %vm13068_vm2, %v13067_v18 }
0x11d9   : > { %12490 = vmatprep.subr.mxu1 %v13067_v18  ;;  %v7635_v31 = vand.u32 4294901760, %v7634_v24 }
0x11da   : > { %12491 = vmatpush3.msra.mxu1 %v14262_v1 }
0x11db   : > { %12502 = vmatprep.subr.mxu1 %v13067_v18  ;;  %12493 = vmatmul.mubr.f32.vlgmr.msra.gmra.mxu1 %v7635_v31  ;;  %v7636_v37 = vsub.f32 %v7634_v24, %v7635_v31 }
0x11dc   : > { %12503 = vmatpush3.msra.mxu1 %v14241_v11  ;;  %12506 = vmatprep.mubr.msk.f32.mxu1 %vm13068_vm2, %v13067_v18 }
0x11dd   : > { %12504 = vmatprep.subr.mxu1 %v13067_v18  ;;  %v7637_v7 = vand.u32 4294901760, %v7636_v37 }
0x11de   : > { %12505 = vmatpush3.msra.mxu1 %v14262_v1 }
0x11df   : > { %12516 = vmatprep.subr.mxu1 %v13067_v18  ;;  %12472 = vmatmul.mubr.f32.vlgmr.msra.gmra.mxu0 %v7637_v7 }
0x11e0   : > { %12482 = vmatpush3.msra.mxu0 %v14246_v15  ;;  %12507 = vmatmul.mubr.f32.vlgmr.msra.gmra.mxu1 %v7633_v23 }
0x11e1   : > { %12517 = vmatpush3.xpose.msra.mxu1 %v14166_v2  ;;  %12483 = vmatprep.subr.mxu0 %v13067_v18  ;;  %v8103_v2 = vand.u32 4294901760, %v8102_v45 }
0x11e2   : > { %12484 = vmatpush3.msra.mxu0 %v14265_v9  ;;  %12485 = vmatprep.mubr.msk.f32.mxu0 %vm13068_vm2, %v13067_v18 }
0x11e3   : > { %12495 = vmatprep.subr.mxu0 %v13067_v18  ;;  %12518 = vmatprep.subr.mxu1 %v13067_v18 }
0x11e4   : > { %12486 = vmatmul.mubr.f32.vlgmr.msra.gmra.mxu0 %v7634_v24  ;;  %12520 = vmatprep.mubr.msk.f32.mxu1 %vm13068_vm2, %v13067_v18 }
0x11e5   : > { %12496 = vmatpush3.msra.mxu0 %v14251_v21  ;;  %12519 = vmatpush3.xpose.msra.mxu1 %v14178_v6  ;;  %v8104_v6 = vsub.f32 %v8102_v45, %v8103_v2 }
0x11e6   : > { %12497 = vmatprep.subr.mxu0 %v13067_v18  ;;  %12499 = vmatprep.mubr.msk.f32.mxu0 %vm13068_vm2, %v13067_v18 }
0x11e7   : > { %12498 = vmatpush3.msra.mxu0 %v14270_v10  ;;  %12530 = vmatprep.subr.mxu1 %v13067_v18  ;;  %v8105_v46 = vand.u32 4294901760, %v8104_v6 }
0x11e8   : > { %12509 = vmatprep.subr.mxu0 %v13067_v18  ;;  %12521 = vmatmul.mubr.f32.vlgmr.msra.gmra.mxu1 %v8101_v44 }
0x11e9   : > { %12500 = vmatmul.mubr.f32.vlgmr.msra.gmra.mxu0 %v7633_v23  ;;  %12531 = vmatpush3.xpose.msra.mxu1 %v14133_v49 }
0x11ea   : > { %12510 = vmatpush3.xpose.msra.mxu0 %v14133_v49  ;;  %12532 = vmatprep.subr.mxu1 %v13067_v18 }
0x11eb   : > { %12511 = vmatprep.subr.mxu0 %v13067_v18  ;;  %12513 = vmatprep.mubr.msk.f32.mxu0 %vm13068_vm2, %v13067_v18 }
0x11ec   : > { %12534 = vmatprep.mubr.msk.f32.mxu1 %vm13068_vm2, %v13067_v18 }
0x11ed   : > { %12533 = vmatpush3.xpose.msra.mxu1 %v14139_v48 }
0x11ee   : > { %12512 = vmatpush3.xpose.msra.mxu0 %v14139_v48  ;;  %12544 = vmatprep.subr.mxu1 %v13067_v18 }
0x11ef   : > { %12523 = vmatprep.subr.mxu0 %v13067_v18 }
0x11f0   : > { %12535 = vmatmul.mubr.f32.vlgmr.msra.gmra.mxu1 %v8103_v2 }
0x11f1   : > { %12514 = vmatmul.mubr.f32.vlgmr.msra.gmra.mxu0 %v8105_v46  ;;  %12545 = vmatpush3.xpose.msra.mxu1 %v14133_v49 }
0x11f2   : > { %12524 = vmatpush3.xpose.msra.mxu0 %v14137_v26  ;;  %12546 = vmatprep.subr.mxu1 %v13067_v18 }
0x11f3   : > { %12525 = vmatprep.subr.mxu0 %v13067_v18  ;;  %12527 = vmatprep.mubr.msk.f32.mxu0 %vm13068_vm2, %v13067_v18 }
0x11f4   : > { %12548 = vmatprep.mubr.msk.f32.mxu1 %vm13068_vm2, %v13067_v18 }
0x11f5   : > { %12547 = vmatpush3.xpose.msra.mxu1 %v14139_v48 }
0x11f6   : > { %12526 = vmatpush3.xpose.msra.mxu0 %v14146_v56  ;;  %12558 = vmatprep.subr.mxu1 %v13067_v18 }
0x11f7   : > { %12537 = vmatprep.subr.mxu0 %v13067_v18 }
0x11f8   : > { %12549 = vmatmul.mubr.f32.vlgmr.msra.gmra.mxu1 %v8101_v44 }
0x11f9   : > { %12528 = vmatmul.mubr.f32.vlgmr.msra.gmra.mxu0 %v8102_v45  ;;  %12559 = vmatpush3.msra.mxu1 %v14255_v12 }
0x11fa   : > { %12538 = vmatpush3.xpose.msra.mxu0 %v14143_v55  ;;  %12560 = vmatprep.subr.mxu1 %v13067_v18 }
0x11fb   : > { %12561 = vmatpush3.msra.mxu1 %v14274_v28  ;;  %12539 = vmatprep.subr.mxu0 %v13067_v18 }
0x11fc   : > { %12541 = vmatprep.mubr.msk.f32.mxu0 %vm13068_vm2, %v13067_v18  ;;  %12562 = vmatprep.mubr.msk.f32.mxu1 %vm13068_vm2, %v13067_v18 }
0x11fd   : > { %12572 = vmatprep.subr.mxu1 %v13067_v18 }
0x11fe   : > { %12540 = vmatpush3.xpose.msra.mxu0 %v14154_v35 }
0x11ff   : > { %12551 = vmatprep.subr.mxu0 %v13067_v18 }
0x1201   : > { %12542 = vmatmul.mubr.f32.vlgmr.msra.gmra.mxu0 %v8101_v44 }
0x1202   : > { %12552 = vmatpush3.msra.mxu0 %v14241_v11  ;;  %12555 = vmatprep.mubr.msk.f32.mxu0 %vm13068_vm2, %v13067_v18 }
0x1203   : > { %12553 = vmatprep.subr.mxu0 %v13067_v18 }
0x1204   : > { %12554 = vmatpush3.msra.mxu0 %v14262_v1 }
0x1205   : > { %12565 = vmatprep.subr.mxu0 %v13067_v18 }
0x1297   : > { %v7720_v49 = vpop.f32.mrf.mxu1 }
0x1299   : > { %v12480_v26 = vpop.f32.mrf.mxu1 }
0x129b   : > { %v7871_v48 = vpop.f32.mrf.mxu1 }
0x129d   : > { %v12494_v55 = vpop.f32.mrf.mxu1 }
0x129f   : > { %v7639_v56 = vpop.f32.mrf.mxu0 }
0x12a0   : > { %v8021_v35 = vpop.f32.mrf.mxu1  ;;  %v7721_v34 = vadd.f32 %v7720_v49, %v7639_v56 }
0x12a1   : > { %v12473_v47 = vpop.f32.mrf.mxu0 }
0x12a2   : > { %v12508_v59 = vpop.f32.mrf.mxu1  ;;  %v8974_v47 = vld [vmem:[%s13204_s22] sm:$0xff] }
0x12a4   : > { %v7796_v19 = vpop.f32.mrf.mxu0 }
0x12a5   : > { %v7797_v0 = vadd.f32 %v7796_v19, %v7721_v34 }
0x12a6   : > { %v12487_v3 = vpop.f32.mrf.mxu0 }
0x12a7   : > { %v7872_v27 = vadd.f32 %v7871_v48, %v7797_v0 }
0x12a8   : > { %v8188_v39 = vpop.f32.mrf.mxu1 }
0x12a9   : > { %v7948_v60 = vpop.f32.mrf.mxu0 }
0x12aa   : > { %v12522_v42 = vpop.f32.mrf.mxu1  ;;  %v7949_v28 = vadd.f32 %v7948_v60, %v7872_v27 }
0x12ab   : > { %v12501_v51 = vpop.f32.mrf.mxu0  ;;  %v14419_v42 = vand.u32 4294901760, %v8974_v47 }
0x12ac   : > { %v8022_v5 = vadd.f32 %v8021_v35, %v7949_v28 }
0x12b0   : > { %v8339_v36 = vpop.f32.mrf.mxu1 }
0x12b1   : > { %v8107_v30 = vpop.f32.mrf.mxu0 }
0x12b2   : > { %v12536_v52 = vpop.f32.mrf.mxu1  ;;  %v8189_v53 = vadd.f32 %v8188_v39, %v8107_v30 }
0x12b3   : > { %v12515_v50 = vpop.f32.mrf.mxu0 }
0x12b8   : > { %v8489_v40 = vpop.f32.mrf.mxu1 }
0x12b9   : > { %v8264_v29 = vpop.f32.mrf.mxu0 }
0x12ba   : > { %v12550_v54 = vpop.f32.mrf.mxu1  ;;  %v8265_v57 = vadd.f32 %v8264_v29, %v8189_v53 }
0x12bb   : > { %v12529_v14 = vpop.f32.mrf.mxu0 }
0x12bc   : > { %v8340_v62 = vadd.f32 %v8339_v36, %v8265_v57 }
0x12c1   : > { %v8416_v63 = vpop.f32.mrf.mxu0 }
0x12c2   : > { %v8417_v8 = vadd.f32 %v8416_v63, %v8340_v62 }
0x12c3   : > { %v12543_v20 = vpop.f32.mrf.mxu0 }
0x12c4   : > { %v8490_v16 = vadd.f32 %v8489_v40, %v8417_v8  ;;  %v14428_v40 = vsub.f32 %v8974_v47, %v14419_v42 }
0x12c6   : > { %v8493_v32 = vmul.f32 0.35355338, %v8490_v16  ;;  %v9108_v57 = vand.u32 4294901760, %v14428_v40 }
0x12c8   : > { %v8494_v12 = vsel %vm13482_vm9, %v8493_v32, -1e+30  ;;  %v9109_v20 = vsub.f32 %v14428_v40, %v9108_v57 }
0x12c9   : > { %v8495_v4 = vsel %vm1737_vm10, %v8494_v12, -inf }
0x12ca   : > { %8496 = vmax.xlane.f32.xlu1 %v8495_v4 }
0x12db   : > { %8026 = vrot.lane.b32.xlu1 %v8022_v5, %s13081_s18 }
0x1353   : > { %v8497_v13 = vpop.xlane.xlu1 %8496 }
0x1354   : > { %v8498_v17 = vsub.f32 %v8494_v12, %v8497_v13  ;;  %v9110_v12 = vand.u32 4294901760, %v9109_v20 }
0x1356   : > { %v8499_v22 = vmul.f32 1.442695, %v8498_v17 }
0x1357   : > { %v8027_v37 = vpop.permute.xlu1 %8026 }
0x1358   : > { %13018 = vpow2.f32 %v8499_v22 }
0x1365   : > { %v13019_v23 = vpop.eup %13018 }
0x1366   : > { %v8501_v24 = vsel %vm1737_vm10, %v13019_v23, 0.0 }
0x1367   : > { %8502 = vadd.xlane.f32.xlu0 %v8501_v24 }
0x137d   : > { %3153 = vrot.lane.b32.xlu0 %v13729_v41, %s13082_s21 }
0x1381   : > { %7031 = vrot.lane.b32.xlu0 %v14224_v43, %s13082_s21 }
0x1385   : > { %4149 = vrot.lane.b32.xlu0 %v13859_v58, %s13081_s18 }
0x1389   : > { %5093 = vrot.lane.b32.xlu0 %v13979_v33, %s13083_s29 }
0x13f0   : > { %v8503_v61 = vpop.xlane.xlu0 %8502 }
0x13f1   : > { %13020 = vrcp.f32 %v8503_v61 }
0x13f4   : > { %v3154_v25 = vpop.permute.xlu0 %3153 }
0x13f5   : > { %3157 = vst.msk [vmem:[#allocation3] sm:$0x1] %vm3156_vm13, %v3154_v25 }
0x13f8   : > { %v7032_v31 = vpop.permute.xlu0 %7031 }
0x13f9   : > { %7034 = vst.msk [vmem:[#allocation3 + $0x1] sm:$0x1] %vm3156_vm13, %v7032_v31 }
0x13fa   : > { %8029 = vst.msk [vmem:[#allocation3 + $0x1] sm:$0x1] %vm4152_vm14, %v8027_v37 }
0x13fc   : > { %v4150_v38 = vpop.permute.xlu0 %4149 }
0x13fd   : > { %4153 = vst.msk [vmem:[#allocation3] sm:$0x1] %vm4152_vm14, %v4150_v38 }
0x13fe   : > { %v13021_v41 = vpop.eup %13020 }
0x13ff   : > { %v8505_v43 = vmul.f32 %v13021_v41, %v13019_v23 }
0x1400   : > { %v5094_v58 = vpop.permute.xlu0 %5093 }
0x1401   : > { %5097 = vst.msk [vmem:[#allocation3] sm:$0x1] %vm5096_vm15, %v5094_v58  ;;  %v8507_v33 = vsel %vm1749_vm11, %v8505_v43, 0 }
0x1402   : > { %v8576_v7 = vand.u32 4294901760, %v8507_v33 }
0x1404   : > { %v8577_v44 = vsub.f32 %v8507_v33, %v8576_v7  ;;  %12563 = vmatmul.mubr.f32.vlgmr.msra.gmra.mxu1 %v8576_v7 }
0x1405   : > { %12573 = vmatpush3.msra.mxu1 %v14241_v11  ;;  %12576 = vmatprep.mubr.msk.f32.mxu1 %vm13068_vm2, %v13067_v18 }
0x1406   : > { %12574 = vmatprep.subr.mxu1 %v13067_v18  ;;  %v8578_v45 = vand.u32 4294901760, %v8577_v44 }
0x1407   : > { %12575 = vmatpush3.msra.mxu1 %v14262_v1 }
0x1408   : > { %12586 = vmatprep.subr.mxu1 %v13067_v18  ;;  %12577 = vmatmul.mubr.f32.vlgmr.msra.gmra.mxu1 %v8578_v45  ;;  %v8579_v2 = vsub.f32 %v8577_v44, %v8578_v45 }
0x1409   : > { %12587 = vmatpush3.msra.mxu1 %v14241_v11  ;;  %12590 = vmatprep.mubr.msk.f32.mxu1 %vm13068_vm2, %v13067_v18 }
0x140a   : > { %12588 = vmatprep.subr.mxu1 %v13067_v18  ;;  %v8580_v6 = vand.u32 4294901760, %v8579_v2 }
0x140b   : > { %12589 = vmatpush3.msra.mxu1 %v14262_v1 }
0x140c   : > { %12556 = vmatmul.mubr.f32.vlgmr.msra.gmra.mxu0 %v8580_v6  ;;  %12591 = vmatmul.mubr.f32.vlgmr.msra.gmra.mxu1 %v8576_v7 }
0x140d   : > { %12566 = vmatpush3.msra.mxu0 %v14246_v15  ;;  %12569 = vmatprep.mubr.msk.f32.mxu0 %vm13068_vm2, %v13067_v18  ;;  %v8977_v15 = vld [vmem:[%s13204_s22 + $0x18] sm:$0xff] }
0x140e   : > { %12567 = vmatprep.subr.mxu0 %v13067_v18  ;;  %12604 = vmatprep.subr.mxu1 %v13067_v18 }
0x140f   : > { %12568 = vmatpush3.msra.mxu0 %v14265_v9  ;;  %12612 = vmatprep.mubr.msk.f32.mxu1 %vm13068_vm2, %v13067_v18  ;;  %v14392_v9 = vand.u32 4294901760, %v8977_v15 }
0x1410   : > { %12579 = vmatprep.subr.mxu0 %v13067_v18  ;;  %12570 = vmatmul.mubr.f32.vlgmr.msra.gmra.mxu0 %v8577_v44 }
0x1411   : > { %12580 = vmatpush3.msra.mxu0 %v14251_v21  ;;  %12583 = vmatprep.mubr.msk.f32.mxu0 %vm13068_vm2, %v13067_v18  ;;  %v8976_v21 = vld [vmem:[%s13204_s22 + $0x10] sm:$0xff]  ;;  %v14396_v49 = vsub.f32 %v8977_v15, %v14392_v9 }
0x1412   : > { %12581 = vmatprep.subr.mxu0 %v13067_v18  ;;  %v14398_v26 = vand.u32 4294901760, %v8976_v21 }
0x1413   : > { %12582 = vmatpush3.msra.mxu0 %v14270_v10  ;;  %v8975_v10 = vld [vmem:[%s13204_s22 + $0x8] sm:$0xff]  ;;  %v9087_v55 = vand.u32 4294901760, %v14396_v49 }
0x1414   : > { %12584 = vmatmul.mubr.f32.vlgmr.msra.gmra.mxu0 %v8576_v7  ;;  %12593 = vmatprep.subr.mxu0 %v13067_v18  ;;  %v14405_v56 = vsub.f32 %v8976_v21, %v14398_v26  ;;  %v14407_v35 = vand.u32 4294901760, %v8975_v10 }
0x1415   : > { %12601 = vmatprep.mubr.msk.f32.mxu0 %vm13068_vm2, %v13067_v18  ;;  %12594 = vmatpush3.msra.mxu0 %v14392_v9  ;;  %v9088_v3 = vsub.f32 %v14396_v49, %v9087_v55 }
0x1416   : > { %12595 = vmatprep.subr.mxu0 %v13067_v18  ;;  %v9094_v39 = vand.u32 4294901760, %v14405_v56  ;;  %v14417_v60 = vsub.f32 %v8975_v10, %v14407_v35 }
0x1417   : > { %12596 = vmatpush3.msra.mxu0 %v14398_v26  ;;  %v9089_v30 = vand.u32 4294901760, %v9088_v3  ;;  %v9489_v3 = vld [vmem:[%s13213_s10] sm:$0xff] }
0x1418   : > { %12597 = vmatprep.subr.mxu0 %v13067_v18  ;;  %v9095_v52 = vsub.f32 %v14405_v56, %v9094_v39  ;;  %v9101_v50 = vand.u32 4294901760, %v14417_v60 }
0x1419   : > { %12598 = vmatpush3.msra.mxu0 %v14407_v35  ;;  %12605 = vmatpush3.msra.mxu1 %v9089_v30 }
0x141a   : > { %12599 = vmatprep.subr.mxu0 %v13067_v18  ;;  %v9096_v54 = vand.u32 4294901760, %v9095_v52  ;;  %v9102_v14 = vsub.f32 %v14417_v60, %v9101_v50  ;;  %12606 = vmatprep.subr.mxu1 %v13067_v18 }
0x141b   : > { %12600 = vmatpush3.msra.mxu0 %v14419_v42 }
0x141c   : > { %12615 = vmatprep.subr.mxu0 %v13067_v18  ;;  %12607 = vmatpush3.msra.mxu1 %v9096_v54  ;;  %v9103_v8 = vand.u32 4294901760, %v9102_v14 }
0x141d   : > { %12608 = vmatprep.subr.mxu1 %v13067_v18 }
0x141e   : > { %12609 = vmatpush3.msra.mxu1 %v9103_v8 }
0x141f   : > { %12610 = vmatprep.subr.mxu1 %v13067_v18 }
0x1420   : > { %12611 = vmatpush3.msra.mxu1 %v9110_v12 }
0x1421   : > { %12626 = vmatprep.subr.mxu1 %v13067_v18 }
0x14c4   : > { %v8663_v11 = vpop.f32.mrf.mxu1 }
0x14c6   : > { %v12564_v1 = vpop.f32.mrf.mxu1 }
0x14c8   : > { %v8814_v46 = vpop.f32.mrf.mxu1 }
0x14ca   : > { %v12578_v48 = vpop.f32.mrf.mxu1 }
0x14cb   : > { %v9491_v48 = vld [vmem:[%s13213_s10 + $0x10] sm:$0xff] }
0x14cc   : > { %v8582_v59 = vpop.f32.mrf.mxu0  ;;  %v8964_v19 = vpop.f32.mrf.mxu1 }
0x14cd   : > { %v8664_v29 = vadd.f32 %v8663_v11, %v8582_v59 }
0x14ce   : > { %v12557_v51 = vpop.f32.mrf.mxu0  ;;  %v12592_v36 = vpop.f32.mrf.mxu1 }
0x14cf   : > { %v14527_v51 = vand.u32 4294901760, %v9489_v3 }
0x14d0   : > { %v8739_v53 = vpop.f32.mrf.mxu0 }
0x14d1   : > { %v8740_v62 = vadd.f32 %v8739_v53, %v8664_v29 }
0x14d2   : > { %v12571_v63 = vpop.f32.mrf.mxu0 }
0x14d3   : > { %v8815_v16 = vadd.f32 %v8814_v46, %v8740_v62 }
0x14d4   : > { %v8891_v32 = vpop.f32.mrf.mxu0 }
0x14d5   : > { %v8892_v4 = vadd.f32 %v8891_v32, %v8815_v16 }
0x14d6   : > { %v12585_v34 = vpop.f32.mrf.mxu0 }
0x14d7   : > { %v8965_v0 = vadd.f32 %v8964_v19, %v8892_v4  ;;  %v11354_v4 = vld [vmem:[%s15059_s2] ss:$0 sm:$0xff] }
0x14d9   : > { %8969 = vrot.lane.b32.xlu0 %v8965_v0, %s13083_s29 }
0x154b   : > { %v8970_v27 = vpop.permute.xlu0 %8969 }
0x154c   : > { %8972 = vst.msk [vmem:[#allocation3 + $0x1] sm:$0x1] %vm5096_vm15, %v8970_v27 }
0x1553   : > { %v8973_v28 = vld [vmem:[#allocation3] sm:$0x3] }
0x1554   : > { %v8979_v5 = vsel %vm699_vm5, %v8973_v28, 0 }
0x1555   : > { %v9050_v13 = vand.u32 4294901760, %v8979_v5 }
0x1557   : > { %v9051_v17 = vsub.f32 %v8979_v5, %v9050_v13  ;;  %12613 = vmatmul.mubr.f32.vlgmr.msra.gmra.mxu1 %v9050_v13 }
0x1558   : > { %12627 = vmatpush3.msra.mxu1 %v14392_v9  ;;  %12634 = vmatprep.mubr.msk.f32.mxu1 %vm13068_vm2, %v13067_v18 }
0x1559   : > { %12628 = vmatprep.subr.mxu1 %v13067_v18  ;;  %v9052_v22 = vand.u32 4294901760, %v9051_v17 }
0x155a   : > { %12629 = vmatpush3.msra.mxu1 %v14398_v26 }
0x155b   : > { %12630 = vmatprep.subr.mxu1 %v13067_v18  ;;  %v9053_v23 = vsub.f32 %v9051_v17, %v9052_v22 }
0x155c   : > { %12631 = vmatpush3.msra.mxu1 %v14407_v35 }
0x155d   : > { %12632 = vmatprep.subr.mxu1 %v13067_v18  ;;  %v9054_v24 = vand.u32 4294901760, %v9053_v23 }
0x155e   : > { %12633 = vmatpush3.msra.mxu1 %v14419_v42 }
0x155f   : > { %12635 = vmatmul.mubr.f32.vlgmr.msra.gmra.mxu1 %v9052_v22  ;;  %12648 = vmatprep.subr.mxu1 %v13067_v18 }
0x1560   : > { %12602 = vmatmul.mubr.f32.vlgmr.msra.gmra.mxu0 %v9054_v24  ;;  %12649 = vmatpush3.msra.mxu1 %v14392_v9  ;;  %v13028_v9 = vld [vmem:[#allocation2] sm:$0x3]  ;;  %v10000_v24 = vld [vmem:[%s13230_s23 + $0x58] sm:$0xff] }
0x1561   : > { %12616 = vmatpush3.msra.mxu0 %v14396_v49  ;;  %12650 = vmatprep.subr.mxu1 %v13067_v18 }
0x1562   : > { %12617 = vmatprep.subr.mxu0 %v13067_v18  ;;  %12651 = vmatpush3.msra.mxu1 %v14398_v26  ;;  %v9492_v26 = vld [vmem:[%s13213_s10 + $0x18] sm:$0xff] }
0x1563   : > { %12618 = vmatpush3.msra.mxu0 %v14405_v56  ;;  %12652 = vmatprep.subr.mxu1 %v13067_v18  ;;  %v14500_v10 = vand.u32 4294901760, %v9492_v26  ;;  %v14506_v56 = vand.u32 4294901760, %v9491_v48 }
0x1564   : > { %12619 = vmatprep.subr.mxu0 %v13067_v18  ;;  %12653 = vmatpush3.msra.mxu1 %v14407_v35  ;;  %v9490_v35 = vld [vmem:[%s13213_s10 + $0x8] sm:$0xff] }
0x1565   : > { %12620 = vmatpush3.msra.mxu0 %v14417_v60  ;;  %12654 = vmatprep.subr.mxu1 %v13067_v18  ;;  %v14513_v59 = vsub.f32 %v9491_v48, %v14506_v56  ;;  %v14515_v19 = vand.u32 4294901760, %v9490_v35 }
0x1566   : > { %12621 = vmatprep.subr.mxu0 %v13067_v18  ;;  %12623 = vmatprep.mubr.msk.f32.mxu0 %vm13068_vm2, %v13067_v18 }
0x1567   : > { %12622 = vmatpush3.msra.mxu0 %v14428_v40  ;;  %12655 = vmatpush3.msra.mxu1 %v14419_v42  ;;  %v9609_v60 = vand.u32 4294901760, %v14513_v59  ;;  %v14525_v42 = vsub.f32 %v9490_v35, %v14515_v19  ;;  %v9994_v35 = vld [vmem:[%s13230_s23 + $0x28] sm:$0xff] }
0x1568   : > { %12656 = vmatprep.mubr.msk.f32.mxu1 %vm13068_vm2, %v13067_v18  ;;  %12624 = vmatmul.mubr.f32.vlgmr.msra.gmra.mxu0 %v9051_v17 }
0x1569   : > { %12637 = vmatprep.subr.mxu0 %v13067_v18  ;;  %12657 = vmatmul.mubr.f32.vlgmr.msra.gmra.mxu1 %v9050_v13  ;;  %v9610_v30 = vsub.f32 %v14513_v59, %v9609_v60  ;;  %v9616_v52 = vand.u32 4294901760, %v14525_v42 }
0x156a   : > { %12638 = vmatpush3.msra.mxu0 %v9087_v55  ;;  %12645 = vmatprep.mubr.msk.f32.mxu0 %vm13068_vm2, %v13067_v18  ;;  %v14504_v55 = vsub.f32 %v9492_v26, %v14500_v10 }
0x156b   : > { %12639 = vmatprep.subr.mxu0 %v13067_v18  ;;  %12670 = vmatprep.subr.mxu1 %v13067_v18  ;;  %v9611_v40 = vand.u32 4294901760, %v9610_v30  ;;  %v9617_v29 = vsub.f32 %v14525_v42, %v9616_v52 }
0x156c   : > { %12640 = vmatpush3.msra.mxu0 %v9094_v39  ;;  %12678 = vmatprep.mubr.msk.f32.mxu1 %vm13068_vm2, %v13067_v18  ;;  %v9602_v47 = vand.u32 4294901760, %v14504_v55 }
0x156d   : > { %12641 = vmatprep.subr.mxu0 %v13067_v18  ;;  %v9618_v54 = vand.u32 4294901760, %v9617_v29 }
0x156e   : > { %12642 = vmatpush3.msra.mxu0 %v9101_v50  ;;  %v9603_v39 = vsub.f32 %v14504_v55, %v9602_v47  ;;  %v14536_v50 = vsub.f32 %v9489_v3, %v14527_v51  ;;  %v14669_v3 = vand.u32 4294901760, %v9994_v35 }
0x156f   : > { %12643 = vmatprep.subr.mxu0 %v13067_v18 }
0x1570   : > { %12644 = vmatpush3.msra.mxu0 %v9108_v57  ;;  %v9604_v36 = vand.u32 4294901760, %v9603_v39  ;;  %v9623_v53 = vand.u32 4294901760, %v14536_v50 }
0x1571   : > { %12646 = vmatmul.mubr.f32.vlgmr.msra.gmra.mxu0 %v9050_v13  ;;  %12659 = vmatprep.subr.mxu0 %v13067_v18 }
0x1572   : > { %12667 = vmatprep.mubr.msk.f32.mxu0 %vm13068_vm2, %v13067_v18  ;;  %12660 = vmatpush3.msra.mxu0 %v14500_v10  ;;  %v9624_v14 = vsub.f32 %v14536_v50, %v9623_v53 }
0x1573   : > { %12661 = vmatprep.subr.mxu0 %v13067_v18  ;;  %12671 = vmatpush3.msra.mxu1 %v9604_v36  ;;  %v14678_v36 = vsub.f32 %v9994_v35, %v14669_v3 }
0x1574   : > { %12662 = vmatpush3.msra.mxu0 %v14506_v56  ;;  %12672 = vmatprep.subr.mxu1 %v13067_v18  ;;  %v9625_v57 = vand.u32 4294901760, %v9624_v14 }
0x1575   : > { %12663 = vmatprep.subr.mxu0 %v13067_v18  ;;  %12673 = vmatpush3.msra.mxu1 %v9611_v40  ;;  %v10145_v29 = vand.u32 4294901760, %v14678_v36 }
0x1576   : > { %12664 = vmatpush3.msra.mxu0 %v14515_v19  ;;  %12674 = vmatprep.subr.mxu1 %v13067_v18 }
0x1577   : > { %12665 = vmatprep.subr.mxu0 %v13067_v18  ;;  %12675 = vmatpush3.msra.mxu1 %v9618_v54 }
0x1578   : > { %12666 = vmatpush3.msra.mxu0 %v14527_v51  ;;  %12676 = vmatprep.subr.mxu1 %v13067_v18 }
0x1579   : > { %12681 = vmatprep.subr.mxu0 %v13067_v18  ;;  %12677 = vmatpush3.msra.mxu1 %v9625_v57  ;;  %v9991_v57 = vld [vmem:[%s13230_s23 + $0x10] sm:$0xff] }
0x157a   : > { %12692 = vmatprep.subr.mxu1 %v13067_v18 }
0x1617   : > { %v9147_v61 = vpop.f32.mrf.mxu1 }
0x1619   : > { %v12614_v25 = vpop.f32.mrf.mxu1 }
0x161a   : > { %v9999_v25 = vld [vmem:[%s13230_s23 + $0x50] sm:$0xff] }
0x161f   : > { %v9304_v31 = vpop.f32.mrf.mxu1 }
0x1620   : > { %v9056_v37 = vpop.f32.mrf.mxu0 }
0x1621   : > { %v12636_v38 = vpop.f32.mrf.mxu1  ;;  %v9148_v33 = vadd.f32 %v9147_v61, %v9056_v37  ;;  %v14607_v61 = vand.u32 4294901760, %v10000_v24  ;;  %v14613_v37 = vand.u32 4294901760, %v9999_v25 }
0x1622   : > { %v12603_v41 = vpop.f32.mrf.mxu0  ;;  %v9998_v38 = vld [vmem:[%s13230_s23 + $0x48] sm:$0xff] }
0x1628   : > { %v9227_v43 = vpop.f32.mrf.mxu0 }
0x1629   : > { %v9462_v58 = vpop.f32.mrf.mxu1  ;;  %v9228_v45 = vadd.f32 %v9227_v43, %v9148_v33  ;;  %v14620_v43 = vsub.f32 %v9999_v25, %v14613_v37  ;;  %v9997_v33 = vld [vmem:[%s13230_s23 + $0x40] sm:$0xff] }
0x162a   : > { %v12625_v7 = vpop.f32.mrf.mxu0 }
0x162b   : > { %v12658_v44 = vpop.f32.mrf.mxu1  ;;  %v9305_v2 = vadd.f32 %v9304_v31, %v9228_v45  ;;  %v14611_v31 = vsub.f32 %v10000_v24, %v14607_v61 }
0x162c   : > { %v10110_v44 = vand.u32 4294901760, %v14620_v43 }
0x162d   : > { %v10103_v41 = vand.u32 4294901760, %v14611_v31 }
0x162f   : > { %v10104_v7 = vsub.f32 %v14611_v31, %v10103_v41 }
0x1631   : > { %v9387_v6 = vpop.f32.mrf.mxu0 }
0x1632   : > { %v9388_v11 = vadd.f32 %v9387_v6, %v9305_v2  ;;  %v14634_v2 = vand.u32 4294901760, %v9997_v33  ;;  %v9996_v6 = vld [vmem:[%s13230_s23 + $0x38] sm:$0xff] }
0x1633   : > { %v12647_v15 = vpop.f32.mrf.mxu0 }
0x1634   : > { %v9463_v1 = vadd.f32 %v9462_v58, %v9388_v11  ;;  %v14622_v58 = vand.u32 4294901760, %v9998_v38  ;;  %v10105_v11 = vand.u32 4294901760, %v10104_v7  ;;  %v10111_v15 = vsub.f32 %v14620_v43, %v10110_v44 }
0x1636   : > { %v14494_v21 = vadd.f32 %v13028_v9, %v9463_v1  ;;  %v14632_v45 = vsub.f32 %v9998_v38, %v14622_v58  ;;  %v14644_v9 = vsub.f32 %v9997_v33, %v14634_v2  ;;  %v10112_v26 = vand.u32 4294901760, %v10111_v15 }
0x1638   : > { %v9468_v46 = vmul.f32 %v14494_v21, %v14494_v21  ;;  %v10117_v1 = vand.u32 4294901760, %v14632_v45  ;;  %v10124_v48 = vand.u32 4294901760, %v14644_v9 }
0x163a   : > { %v9469_v49 = vsel %vm673_vm1, %v9468_v46, 0.0  ;;  %v14647_v46 = vand.u32 4294901760, %v9996_v6 }
0x163b   : > { %9470 = vadd.xlane.f32.xlu0 %v9469_v49  ;;  %v9995_v49 = vld [vmem:[%s13230_s23 + $0x30] sm:$0xff] }
0x16c4   : > { %v9471_v62 = vpop.xlane.xlu0 %9470 }
0x16c5   : > { %v9472_v63 = vmul.f32 0.03125, %v9471_v62 }
0x16c7   : > { %v9473_v8 = vadd.f32 1e-05, %v9472_v63  ;;  %v10146_v63 = vsub.f32 %v14678_v36, %v10145_v29 }
0x16c9   : > { %13022 = vrsqrt.f32 %v9473_v8  ;;  %vm9476_vm0 = vcmp.eq.f32.partialorder %v9473_v8, inf  ;;  %v9479_v32 = vand.u32 2147483648, %v9473_v8  ;;  %vm9478_vm3 = vcmp.eq.f32.partialorder %v9473_v8, 0.0 }
0x16d6   : > { %v13023_v20 = vpop.eup %13022 }
0x16d7   : > { %v9475_v16 = vmul.f32 %v13023_v20, %v9473_v8 }
0x16d9   : > { %v9477_v12 = vsel %vm9476_vm0, %v9473_v8, %v9475_v16  ;;  %v14710_v16 = vand.u32 4294901760, %v9991_v57 }
0x16da   : > { %v9480_v34 = vsel %vm9478_vm3, %v9479_v32, %v9477_v12  ;;  %v9990_v32 = vld [vmem:[%s13230_s23 + $0x8] sm:$0xff]  ;;  %v10147_v12 = vand.u32 4294901760, %v10146_v63 }
0x16db   : > { %v9481_v0 = vmul.f32 %v9480_v34, %v14494_v21 }
0x16dd   : > { %v9488_v27 = vmul.f32 %v11354_v4, %v9481_v0  ;;  %v14719_v0 = vand.u32 4294901760, %v9990_v32 }
0x16df   : > { %v9494_v28 = vsel %vm699_vm5, %v9488_v27, 0  ;;  %v14723_v27 = vsub.f32 %v9991_v57, %v14710_v16 }
0x16e0   : > { %v9565_v5 = vand.u32 4294901760, %v9494_v28 }
0x16e2   : > { %v9566_v13 = vsub.f32 %v9494_v28, %v9565_v5  ;;  %12679 = vmatmul.mubr.f32.vlgmr.msra.gmra.mxu1 %v9565_v5  ;;  %v9989_v28 = vld [vmem:[%s13230_s23] sm:$0xff] }
0x16e3   : > { %12693 = vmatpush3.msra.mxu1 %v14500_v10  ;;  %12700 = vmatprep.mubr.msk.f32.mxu1 %vm13068_vm2, %v13067_v18 }
0x16e4   : > { %12694 = vmatprep.subr.mxu1 %v13067_v18  ;;  %v9567_v17 = vand.u32 4294901760, %v9566_v13 }
0x16e5   : > { %12695 = vmatpush3.msra.mxu1 %v14506_v56 }
0x16e6   : > { %12696 = vmatprep.subr.mxu1 %v13067_v18  ;;  %v9568_v22 = vsub.f32 %v9566_v13, %v9567_v17 }
0x16e7   : > { %12697 = vmatpush3.msra.mxu1 %v14515_v19 }
0x16e8   : > { %12698 = vmatprep.subr.mxu1 %v13067_v18  ;;  %v9569_v23 = vand.u32 4294901760, %v9568_v22  ;;  %v14734_v22 = vand.u32 4294901760, %v9989_v28 }
0x16e9   : > { %12699 = vmatpush3.msra.mxu1 %v14527_v51 }
0x16ea   : > { %12701 = vmatmul.mubr.f32.vlgmr.msra.gmra.mxu1 %v9567_v17  ;;  %12714 = vmatprep.subr.mxu1 %v13067_v18  ;;  %v14732_v17 = vsub.f32 %v9990_v32, %v14719_v0  ;;  %v14742_v38 = vsub.f32 %v9989_v28, %v14734_v22 }
0x16eb   : > { %12668 = vmatmul.mubr.f32.vlgmr.msra.gmra.mxu0 %v9569_v23  ;;  %12715 = vmatpush3.msra.mxu1 %v14500_v10  ;;  %v10118_v10 = vsub.f32 %v14632_v45, %v10117_v1  ;;  %v10166_v23 = vand.u32 4294901760, %v14723_v27 }
0x16ec   : > { %12682 = vmatpush3.msra.mxu0 %v14504_v55  ;;  %12716 = vmatprep.subr.mxu1 %v13067_v18  ;;  %v14655_v55 = vand.u32 4294901760, %v9995_v49  ;;  %v10173_v25 = vand.u32 4294901760, %v14732_v17 }
0x16ed   : > { %12683 = vmatprep.subr.mxu0 %v13067_v18  ;;  %12717 = vmatpush3.msra.mxu1 %v14506_v56  ;;  %v14659_v56 = vsub.f32 %v9996_v6, %v14647_v46  ;;  %v10167_v33 = vsub.f32 %v14723_v27, %v10166_v23  ;;  %v10180_v6 = vand.u32 4294901760, %v14742_v38 }
0x16ee   : > { %12684 = vmatpush3.msra.mxu0 %v14513_v59  ;;  %12718 = vmatprep.subr.mxu1 %v13067_v18  ;;  %v10125_v59 = vsub.f32 %v14644_v9, %v10124_v48  ;;  %v10174_v7 = vsub.f32 %v14732_v17, %v10173_v25 }
0x16ef   : > { %12685 = vmatprep.subr.mxu0 %v13067_v18  ;;  %12719 = vmatpush3.msra.mxu1 %v14515_v19  ;;  %v14667_v19 = vsub.f32 %v9995_v49, %v14655_v55  ;;  %v10131_v39 = vand.u32 4294901760, %v14659_v56  ;;  %v10181_v49 = vsub.f32 %v14742_v38, %v10180_v6 }
0x16f0   : > { %12686 = vmatpush3.msra.mxu0 %v14525_v42  ;;  %12720 = vmatprep.subr.mxu1 %v13067_v18  ;;  %v10126_v42 = vand.u32 4294901760, %v10125_v59  ;;  %v10175_v15 = vand.u32 4294901760, %v10174_v7 }
0x16f1   : > { %12687 = vmatprep.subr.mxu0 %v13067_v18  ;;  %12689 = vmatprep.mubr.msk.f32.mxu0 %vm13068_vm2, %v13067_v18 }
0x16f2   : > { %12688 = vmatpush3.msra.mxu0 %v14536_v50  ;;  %12721 = vmatpush3.msra.mxu1 %v14527_v51  ;;  %v10138_v51 = vand.u32 4294901760, %v14667_v19  ;;  %v9992_v50 = vld [vmem:[%s13230_s23 + $0x18] sm:$0xff] }
0x16f3   : > { %12722 = vmatprep.mubr.msk.f32.mxu1 %vm13068_vm2, %v13067_v18  ;;  %12690 = vmatmul.mubr.f32.vlgmr.msra.gmra.mxu0 %v9566_v13  ;;  %v14696_v54 = vand.u32 4294901760, %v9992_v50 }
0x16f4   : > { %12703 = vmatprep.subr.mxu0 %v13067_v18  ;;  %12723 = vmatmul.mubr.f32.vlgmr.msra.gmra.mxu1 %v9565_v5  ;;  %v10139_v40 = vsub.f32 %v14667_v19, %v10138_v51 }
0x16f5   : > { %12704 = vmatpush3.msra.mxu0 %v9602_v47  ;;  %12711 = vmatprep.mubr.msk.f32.mxu0 %vm13068_vm2, %v13067_v18  ;;  %v10119_v47 = vand.u32 4294901760, %v10118_v10  ;;  %v14707_v20 = vsub.f32 %v9992_v50, %v14696_v54 }
0x16f6   : > { %12705 = vmatprep.subr.mxu0 %v13067_v18  ;;  %12752 = vmatprep.subr.mxu1 %v13067_v18  ;;  %v10140_v62 = vand.u32 4294901760, %v10139_v40 }
0x16f7   : > { %12706 = vmatpush3.msra.mxu0 %v9609_v60  ;;  %12776 = vmatprep.mubr.msk.f32.mxu1 %vm13068_vm2, %v13067_v18  ;;  %v9993_v60 = vld [vmem:[%s13230_s23 + $0x20] sm:$0xff]  ;;  %v10159_v34 = vand.u32 4294901760, %v14707_v20 }
0x16f8   : > { %12707 = vmatprep.subr.mxu0 %v13067_v18  ;;  %12753 = vmatpush3.msra.mxu1 %v10105_v11  ;;  %v14680_v30 = vand.u32 4294901760, %v9993_v60  ;;  %v10168_v11 = vand.u32 4294901760, %v10167_v33 }
0x16f9   : > { %12708 = vmatpush3.msra.mxu0 %v9616_v52  ;;  %12754 = vmatprep.subr.mxu1 %v13067_v18  ;;  %v10132_v52 = vsub.f32 %v14659_v56, %v10131_v39  ;;  %v10160_v13 = vsub.f32 %v14707_v20, %v10159_v34 }
0x16fa   : > { %12709 = vmatprep.subr.mxu0 %v13067_v18  ;;  %12755 = vmatpush3.msra.mxu1 %v10112_v26  ;;  %v10182_v26 = vand.u32 4294901760, %v10181_v49 }
0x16fb   : > { %12710 = vmatpush3.msra.mxu0 %v9623_v53  ;;  %12756 = vmatprep.subr.mxu1 %v13067_v18  ;;  %v14694_v53 = vsub.f32 %v9993_v60, %v14680_v30  ;;  %v10133_v14 = vand.u32 4294901760, %v10132_v52  ;;  %v10161_v24 = vand.u32 4294901760, %v10160_v13 }
0x16fc   : > { %12712 = vmatmul.mubr.f32.vlgmr.msra.gmra.mxu0 %v9565_v5  ;;  %12725 = vmatprep.subr.mxu0 %v13067_v18 }
0x16fd   : > { %12749 = vmatprep.mubr.msk.f32.mxu0 %vm13068_vm2, %v13067_v18  ;;  %12726 = vmatpush3.msra.mxu0 %v14607_v61  ;;  %v10152_v8 = vand.u32 4294901760, %v14694_v53 }
0x16fe   : > { %12727 = vmatprep.subr.mxu0 %v13067_v18  ;;  %12757 = vmatpush3.msra.mxu1 %v10119_v47 }
0x16ff   : > { %12728 = vmatpush3.msra.mxu0 %v14613_v37  ;;  %12758 = vmatprep.subr.mxu1 %v13067_v18  ;;  %v10153_v4 = vsub.f32 %v14694_v53, %v10152_v8 }
0x1700   : > { %12729 = vmatprep.subr.mxu0 %v13067_v18  ;;  %12759 = vmatpush3.msra.mxu1 %v10126_v42 }
0x1701   : > { %12730 = vmatpush3.msra.mxu0 %v14622_v58  ;;  %12760 = vmatprep.subr.mxu1 %v13067_v18  ;;  %v10154_v5 = vand.u32 4294901760, %v10153_v4 }
0x1702   : > { %12731 = vmatprep.subr.mxu0 %v13067_v18  ;;  %12761 = vmatpush3.msra.mxu1 %v10133_v14 }
0x1703   : > { %12732 = vmatpush3.msra.mxu0 %v14634_v2  ;;  %12762 = vmatprep.subr.mxu1 %v13067_v18 }
0x1704   : > { %12733 = vmatprep.subr.mxu0 %v13067_v18  ;;  %12763 = vmatpush3.msra.mxu1 %v10140_v62 }
0x1705   : > { %12734 = vmatpush3.msra.mxu0 %v14647_v46  ;;  %12764 = vmatprep.subr.mxu1 %v13067_v18 }
0x1706   : > { %12735 = vmatprep.subr.mxu0 %v13067_v18  ;;  %12765 = vmatpush3.msra.mxu1 %v10147_v12 }
0x1707   : > { %12736 = vmatpush3.msra.mxu0 %v14655_v55  ;;  %12766 = vmatprep.subr.mxu1 %v13067_v18 }
0x1708   : > { %12737 = vmatprep.subr.mxu0 %v13067_v18  ;;  %12767 = vmatpush3.msra.mxu1 %v10154_v5 }
0x1709   : > { %12738 = vmatpush3.msra.mxu0 %v14669_v3  ;;  %12768 = vmatprep.subr.mxu1 %v13067_v18 }
0x170a   : > { %12739 = vmatprep.subr.mxu0 %v13067_v18  ;;  %12769 = vmatpush3.msra.mxu1 %v10161_v24 }
0x170b   : > { %12740 = vmatpush3.msra.mxu0 %v14680_v30  ;;  %12770 = vmatprep.subr.mxu1 %v13067_v18 }
0x170c   : > { %12741 = vmatprep.subr.mxu0 %v13067_v18  ;;  %12771 = vmatpush3.msra.mxu1 %v10168_v11 }
0x170d   : > { %12742 = vmatpush3.msra.mxu0 %v14696_v54  ;;  %12772 = vmatprep.subr.mxu1 %v13067_v18 }
0x170e   : > { %12743 = vmatprep.subr.mxu0 %v13067_v18  ;;  %12773 = vmatpush3.msra.mxu1 %v10175_v15 }
0x170f   : > { %12744 = vmatpush3.msra.mxu0 %v14710_v16  ;;  %12774 = vmatprep.subr.mxu1 %v13067_v18 }
0x1710   : > { %12745 = vmatprep.subr.mxu0 %v13067_v18  ;;  %12775 = vmatpush3.msra.mxu1 %v10182_v26 }
0x1711   : > { %12746 = vmatpush3.msra.mxu0 %v14719_v0  ;;  %12806 = vmatprep.subr.mxu1 %v13067_v18 }
0x1712   : > { %12747 = vmatprep.subr.mxu0 %v13067_v18 }
0x1713   : > { %12748 = vmatpush3.msra.mxu0 %v14734_v22 }
0x1714   : > { %12779 = vmatprep.subr.mxu0 %v13067_v18 }
0x17a2   : > { %v9662_v10 = vpop.f32.mrf.mxu1 }
0x17a4   : > { %v12680_v35 = vpop.f32.mrf.mxu1 }
0x17aa   : > { %v9819_v47 = vpop.f32.mrf.mxu1 }
0x17ab   : > { %v9571_v59 = vpop.f32.mrf.mxu0 }
0x17ac   : > { %v12702_v60 = vpop.f32.mrf.mxu1  ;;  %v9663_v40 = vadd.f32 %v9662_v10, %v9571_v59 }
0x17ad   : > { %v12669_v42 = vpop.f32.mrf.mxu0 }
0x17b3   : > { %v9742_v52 = vpop.f32.mrf.mxu0 }
0x17b4   : > { %v9977_v50 = vpop.f32.mrf.mxu1  ;;  %v9743_v62 = vadd.f32 %v9742_v52, %v9663_v40 }
0x17b5   : > { %v12691_v14 = vpop.f32.mrf.mxu0 }
0x17b6   : > { %v12724_v57 = vpop.f32.mrf.mxu1  ;;  %v9820_v63 = vadd.f32 %v9819_v47, %v9743_v62 }
0x17bc   : > { %v9902_v32 = vpop.f32.mrf.mxu0 }
0x17bd   : > { %v9903_v12 = vadd.f32 %v9902_v32, %v9820_v63 }
0x17be   : > { %v12713_v4 = vpop.f32.mrf.mxu0 }
0x17bf   : > { %v9978_v28 = vadd.f32 %v9977_v50, %v9903_v12 }
0x17c1   : > { %v11355_v5 = vmul.f32 -1.442695, %v9978_v28 }
0x17c3   : > { %13024 = vpow2.f32 %v11355_v5 }
0x17d0   : > { %v13025_v13 = vpop.eup %13024 }
0x17d1   : > { %v9984_v24 = vadd.f32 1.0, %v13025_v13 }
0x17d3   : > { %13026 = vrcp.f32 %v9984_v24 }
0x17e0   : > { %v13027_v33 = vpop.eup %13026 }
0x17e1   : > { %v9987_v7 = vmul.f32 %v13027_v33, %v9978_v28 }
0x17e3   : > { %v9988_v11 = vmul.f32 %v9987_v7, %v9978_v28 }
0x17e5   : > { %v10003_v15 = vsel %vm10001_vm4, %v9988_v11, 0 }
0x17e6   : > { %v14762_v49 = vand.u32 4294901760, %v10003_v15 }
0x17e8   : > { %v10083_v26 = vsub.f32 %v10003_v15, %v14762_v49  ;;  %12777 = vmatmul.mubr.f32.vlgmr.msra.gmra.mxu1 %v14762_v49 }
0x17e9   : > { %12807 = vmatpush3.msra.mxu1 %v14607_v61  ;;  %12830 = vmatprep.mubr.msk.f32.mxu1 %vm13068_vm2, %v13067_v18 }
0x17ea   : > { %12808 = vmatprep.subr.mxu1 %v13067_v18  ;;  %v10084_v10 = vand.u32 4294901760, %v10083_v26 }
0x17eb   : > { %12809 = vmatpush3.msra.mxu1 %v14613_v37 }
0x17ec   : > { %12810 = vmatprep.subr.mxu1 %v13067_v18  ;;  %v10085_v35 = vsub.f32 %v10083_v26, %v10084_v10 }
0x17ed   : > { %12811 = vmatpush3.msra.mxu1 %v14622_v58 }
0x17ee   : > { %12812 = vmatprep.subr.mxu1 %v13067_v18  ;;  %v10086_v47 = vand.u32 4294901760, %v10085_v35 }
0x17ef   : > { %12813 = vmatpush3.msra.mxu1 %v14634_v2 }
0x17f0   : > { %12814 = vmatprep.subr.mxu1 %v13067_v18  ;;  %12750 = vmatmul.mubr.f32.vlgmr.msra.gmra.mxu0 %v10086_v47 }
0x17f1   : > { %12780 = vmatpush3.msra.mxu0 %v14611_v31  ;;  %12815 = vmatpush3.msra.mxu1 %v14647_v46 }
0x17f2   : > { %12781 = vmatprep.subr.mxu0 %v13067_v18  ;;  %12816 = vmatprep.subr.mxu1 %v13067_v18 }
0x17f3   : > { %12782 = vmatpush3.msra.mxu0 %v14620_v43  ;;  %12817 = vmatpush3.msra.mxu1 %v14655_v55 }
0x17f4   : > { %12783 = vmatprep.subr.mxu0 %v13067_v18  ;;  %12818 = vmatprep.subr.mxu1 %v13067_v18 }
0x17f5   : > { %12784 = vmatpush3.msra.mxu0 %v14632_v45  ;;  %12819 = vmatpush3.msra.mxu1 %v14669_v3 }
0x17f6   : > { %12785 = vmatprep.subr.mxu0 %v13067_v18  ;;  %12820 = vmatprep.subr.mxu1 %v13067_v18 }
0x17f7   : > { %12786 = vmatpush3.msra.mxu0 %v14644_v9  ;;  %12821 = vmatpush3.msra.mxu1 %v14680_v30 }
0x17f8   : > { %12787 = vmatprep.subr.mxu0 %v13067_v18  ;;  %12822 = vmatprep.subr.mxu1 %v13067_v18 }
0x17f9   : > { %12788 = vmatpush3.msra.mxu0 %v14659_v56  ;;  %12823 = vmatpush3.msra.mxu1 %v14696_v54 }
0x17fa   : > { %12789 = vmatprep.subr.mxu0 %v13067_v18  ;;  %12824 = vmatprep.subr.mxu1 %v13067_v18 }
0x17fb   : > { %12790 = vmatpush3.msra.mxu0 %v14667_v19  ;;  %12825 = vmatpush3.msra.mxu1 %v14710_v16 }
0x17fc   : > { %12791 = vmatprep.subr.mxu0 %v13067_v18  ;;  %12826 = vmatprep.subr.mxu1 %v13067_v18 }
0x17fd   : > { %12792 = vmatpush3.msra.mxu0 %v14678_v36  ;;  %12827 = vmatpush3.msra.mxu1 %v14719_v0 }
0x17fe   : > { %12793 = vmatprep.subr.mxu0 %v13067_v18  ;;  %12828 = vmatprep.subr.mxu1 %v13067_v18 }
0x17ff   : > { %12794 = vmatpush3.msra.mxu0 %v14694_v53  ;;  %12829 = vmatpush3.msra.mxu1 %v14734_v22 }
0x1800   : > { %12795 = vmatprep.subr.mxu0 %v13067_v18  ;;  %12831 = vmatmul.mubr.f32.vlgmr.msra.gmra.mxu1 %v10084_v10 }
0x1801   : > { %12860 = vmatprep.subr.mxu1 %v13067_v18  ;;  %12796 = vmatpush3.msra.mxu0 %v14707_v20 }
0x1802   : > { %12861 = vmatpush3.msra.mxu1 %v14607_v61  ;;  %12797 = vmatprep.subr.mxu0 %v13067_v18 }
0x1803   : > { %12862 = vmatprep.subr.mxu1 %v13067_v18  ;;  %12798 = vmatpush3.msra.mxu0 %v14723_v27 }
0x1804   : > { %12863 = vmatpush3.msra.mxu1 %v14613_v37  ;;  %12799 = vmatprep.subr.mxu0 %v13067_v18 }
0x1805   : > { %12864 = vmatprep.subr.mxu1 %v13067_v18  ;;  %12800 = vmatpush3.msra.mxu0 %v14732_v17 }
0x1806   : > { %12865 = vmatpush3.msra.mxu1 %v14622_v58  ;;  %12801 = vmatprep.subr.mxu0 %v13067_v18 }
0x1807   : > { %12866 = vmatprep.subr.mxu1 %v13067_v18  ;;  %12802 = vmatpush3.msra.mxu0 %v14742_v38 }
0x1808   : > { %12803 = vmatprep.mubr.msk.f32.mxu0 %vm13068_vm2, %v13067_v18  ;;  %12867 = vmatpush3.msra.mxu1 %v14634_v2 }
0x1809   : > { %12804 = vmatmul.mubr.f32.vlgmr.msra.gmra.mxu0 %v10083_v26  ;;  %12833 = vmatprep.subr.mxu0 %v13067_v18 }
0x180a   : > { %12868 = vmatprep.subr.mxu1 %v13067_v18  ;;  %12834 = vmatpush3.msra.mxu0 %v10103_v41 }
0x180b   : > { %12869 = vmatpush3.msra.mxu1 %v14647_v46  ;;  %12835 = vmatprep.subr.mxu0 %v13067_v18 }
0x180c   : > { %12870 = vmatprep.subr.mxu1 %v13067_v18  ;;  %12836 = vmatpush3.msra.mxu0 %v10110_v44 }
0x180d   : > { %12871 = vmatpush3.msra.mxu1 %v14655_v55  ;;  %12837 = vmatprep.subr.mxu0 %v13067_v18 }
0x180e   : > { %12872 = vmatprep.subr.mxu1 %v13067_v18  ;;  %12838 = vmatpush3.msra.mxu0 %v10117_v1 }
0x180f   : > { %12873 = vmatpush3.msra.mxu1 %v14669_v3  ;;  %12839 = vmatprep.subr.mxu0 %v13067_v18 }
0x1810   : > { %12874 = vmatprep.subr.mxu1 %v13067_v18  ;;  %12840 = vmatpush3.msra.mxu0 %v10124_v48 }
0x1811   : > { %12875 = vmatpush3.msra.mxu1 %v14680_v30  ;;  %12841 = vmatprep.subr.mxu0 %v13067_v18 }
0x1812   : > { %12876 = vmatprep.subr.mxu1 %v13067_v18  ;;  %12842 = vmatpush3.msra.mxu0 %v10131_v39 }
0x1813   : > { %12877 = vmatpush3.msra.mxu1 %v14696_v54  ;;  %12843 = vmatprep.subr.mxu0 %v13067_v18 }
0x1814   : > { %12878 = vmatprep.subr.mxu1 %v13067_v18  ;;  %12844 = vmatpush3.msra.mxu0 %v10138_v51 }
0x1815   : > { %12879 = vmatpush3.msra.mxu1 %v14710_v16  ;;  %12845 = vmatprep.subr.mxu0 %v13067_v18 }
0x1816   : > { %12880 = vmatprep.subr.mxu1 %v13067_v18  ;;  %12846 = vmatpush3.msra.mxu0 %v10145_v29 }
0x1817   : > { %12881 = vmatpush3.msra.mxu1 %v14719_v0  ;;  %12847 = vmatprep.subr.mxu0 %v13067_v18 }
0x1818   : > { %12882 = vmatprep.subr.mxu1 %v13067_v18  ;;  %12848 = vmatpush3.msra.mxu0 %v10152_v8 }
0x1819   : > { %12883 = vmatpush3.msra.mxu1 %v14734_v22  ;;  %12884 = vmatprep.mubr.msk.f32.mxu1 %vm13068_vm2, %v13067_v18 }
0x181a   : > { %12849 = vmatprep.subr.mxu0 %v13067_v18  ;;  %12885 = vmatmul.mubr.f32.vlgmr.msra.gmra.mxu1 %v14762_v49 }
0x181b   : > { %12850 = vmatpush3.msra.mxu0 %v10159_v34  ;;  %12857 = vmatprep.mubr.msk.f32.mxu0 %vm13068_vm2, %v13067_v18 }
0x181c   : > { %12851 = vmatprep.subr.mxu0 %v13067_v18 }
0x181d   : > { %12852 = vmatpush3.msra.mxu0 %v10166_v23 }
0x181e   : > { %12853 = vmatprep.subr.mxu0 %v13067_v18 }
0x181f   : > { %12854 = vmatpush3.msra.mxu0 %v10173_v25 }
0x1820   : > { %12855 = vmatprep.subr.mxu0 %v13067_v18 }
0x1821   : > { %12856 = vmatpush3.msra.mxu0 %v10180_v6 }
0x1822   : > { %12858 = vmatmul.mubr.f32.vlgmr.msra.gmra.mxu0 %v14762_v49 }
0x18a8   : > { %v10219_v61 = vpop.f32.mrf.mxu1 }
0x18aa   : > { %v12778_v31 = vpop.f32.mrf.mxu1 }
0x18b0   : > { %v10088_v37 = vpop.f32.mrf.mxu0 }
0x18b1   : > { %v10220_v1 = vadd.f32 %v10219_v61, %v10088_v37 }
0x18b2   : > { %v12751_v41 = vpop.f32.mrf.mxu0 }
0x18c0   : > { %v10400_v43 = vpop.f32.mrf.mxu1 }
0x18c2   : > { %v12832_v58 = vpop.f32.mrf.mxu1 }
0x18c9   : > { %v10315_v44 = vpop.f32.mrf.mxu0 }
0x18ca   : > { %v10316_v46 = vadd.f32 %v10315_v44, %v10220_v1 }
0x18cb   : > { %v12805_v45 = vpop.f32.mrf.mxu0 }
0x18cc   : > { %v10401_v48 = vadd.f32 %v10400_v43, %v10316_v46 }
0x18da   : > { %v10590_v2 = vpop.f32.mrf.mxu1 }
0x18dc   : > { %v12886_v9 = vpop.f32.mrf.mxu1 }
0x18e2   : > { %v10507_v55 = vpop.f32.mrf.mxu0 }
0x18e3   : > { %v10508_v18 = vadd.f32 %v10507_v55, %v10401_v48 }
0x18e4   : > { %v12859_v56 = vpop.f32.mrf.mxu0 }
0x18e5   : > { %v10591_v19 = vadd.f32 %v10590_v2, %v10508_v18  ;;  %10599 = sbr.rel (%p11356_p5) target bundleno = 6772 (0x1a74), region = 84 }
0x18e7   : > { %v14883_v3 = vadd.f32 %v10591_v19, %v14494_v21 }
0x18e9   : > { %10595 = vst.msk [vmem:[#allocation2] sm:$0x3] %vm673_vm1, %v14883_v3 }
0x18ea   : > { %v10601_v39 = vmul.f32 %v14883_v3, %v14883_v3  ;;  %v10625_v36 = vld [vmem:[%s15060_s20 + $0x18] sm:$0xff]  ;;  %v10624_v21 = vld [vmem:[%s15060_s20 + $0x10] sm:$0xff]  ;;  %v10623_v30 = vld [vmem:[%s15060_s20 + $0x8] sm:$0xff]  ;;  %v13084_v29 = vmov 0.0  }
0x18eb   : > { %12898 = vmatprep.subr.mxu1 %v13084_v29  ;;  %v14901_v53 = vand.u32 4294901760, %v10625_v36  ;;  %v14903_v54 = vand.u32 4294901760, %v10624_v21  ;;  %v14905_v8 = vand.u32 4294901760, %v10623_v30  ;;  %v10622_v20 = vld [vmem:[%s15060_s20] sm:$0xff]  ;;  %12887 = vmatprep.subr.mxu0 %v13084_v29 }
0x18ec   : > { %v10602_v51 = vsel %vm673_vm1, %v10601_v39, 0.0  ;;  %v14911_v16 = vand.u32 4294901760, %v10622_v20  ;;  %vm13085_vm1 = vmmov 0   ;;  %v11357_v5 = vld [vmem:[%s15061_s30] ss:$0 sm:$0xff] }
0x18ed   : > { %10603 = vadd.xlane.f32.xlu0 %v10602_v51  ;;  %12906 = vmatprep.mubr.msk.f32.mxu1 %vm13085_vm1, %v13084_v29  ;;  %v14918_v34 = vsub.f32 %v10625_v36, %v14901_v53  ;;  %v14921_v0 = vsub.f32 %v10624_v21, %v14903_v54  ;;  %v14924_v27 = vsub.f32 %v10623_v30, %v14905_v8 }
0x18ee   : > { %12895 = vmatprep.mubr.msk.f32.mxu0 %vm13085_vm1, %v13084_v29  ;;  %12888 = vmatpush3.msra.mxu0 %v14901_v53  ;;  %v14928_v17 = vsub.f32 %v10622_v20, %v14911_v16 }
0x18ef   : > { %12889 = vmatprep.subr.mxu0 %v13084_v29  ;;  %v10735_v22 = vand.u32 4294901760, %v14918_v34  ;;  %v10742_v23 = vand.u32 4294901760, %v14921_v0  ;;  %v10749_v25 = vand.u32 4294901760, %v14924_v27 }
0x18f0   : > { %12890 = vmatpush3.msra.mxu0 %v14903_v54  ;;  %v10756_v38 = vand.u32 4294901760, %v14928_v17 }
0x18f1   : > { %12891 = vmatprep.subr.mxu0 %v13084_v29  ;;  %v10736_v6 = vsub.f32 %v14918_v34, %v10735_v22  ;;  %v10743_v59 = vsub.f32 %v14921_v0, %v10742_v23  ;;  %v10750_v60 = vsub.f32 %v14924_v27, %v10749_v25 }
0x18f2   : > { %12892 = vmatpush3.msra.mxu0 %v14905_v8  ;;  %v10757_v50 = vsub.f32 %v14928_v17, %v10756_v38 }
0x18f3   : > { %12893 = vmatprep.subr.mxu0 %v13084_v29  ;;  %v10737_v42 = vand.u32 4294901760, %v10736_v6  ;;  %v10744_v52 = vand.u32 4294901760, %v10743_v59  ;;  %v10751_v40 = vand.u32 4294901760, %v10750_v60 }
0x18f4   : > { %12894 = vmatpush3.msra.mxu0 %v14911_v16  ;;  %v10758_v14 = vand.u32 4294901760, %v10757_v50 }
0x18f5   : > { %12909 = vmatprep.subr.mxu0 %v13084_v29  ;;  %12899 = vmatpush3.msra.mxu1 %v10737_v42 }
0x18f6   : > { %12900 = vmatprep.subr.mxu1 %v13084_v29 }
0x18f7   : > { %12901 = vmatpush3.msra.mxu1 %v10744_v52 }
0x18f8   : > { %12902 = vmatprep.subr.mxu1 %v13084_v29 }
0x18f9   : > { %12903 = vmatpush3.msra.mxu1 %v10751_v40 }
0x18fa   : > { %12904 = vmatprep.subr.mxu1 %v13084_v29 }
0x18fb   : > { %12905 = vmatpush3.msra.mxu1 %v10758_v14 }
0x18fc   : > { %12920 = vmatprep.subr.mxu1 %v13084_v29 }
0x1976   : > { %v10604_v57 = vpop.xlane.xlu0 %10603 }
0x1977   : > { %v10605_v62 = vmul.f32 0.03125, %v10604_v57 }
0x1979   : > { %v10606_v63 = vadd.f32 1e-05, %v10605_v62 }
0x197b   : > { %13029 = vrsqrt.f32 %v10606_v63  ;;  %vm10609_vm2 = vcmp.eq.f32.partialorder %v10606_v63, inf  ;;  %v10612_v4 = vand.u32 2147483648, %v10606_v63  ;;  %vm10611_vm6 = vcmp.eq.f32.partialorder %v10606_v63, 0.0 }
0x1988   : > { %v13030_v32 = vpop.eup %13029 }
0x1989   : > { %v10608_v12 = vmul.f32 %v13030_v32, %v10606_v63 }
0x198b   : > { %v10610_v28 = vsel %vm10609_vm2, %v10606_v63, %v10608_v12 }
0x198c   : > { %v10613_v13 = vsel %vm10611_vm6, %v10612_v4, %v10610_v28 }
0x198d   : > { %v10614_v24 = vmul.f32 %v10613_v13, %v14883_v3 }
0x198f   : > { %v10621_v33 = vmul.f32 %v11357_v5, %v10614_v24 }
0x1991   : > { %v10627_v7 = vsel %vm699_vm5, %v10621_v33, 0  ;;  %vm11114_vm5 = vcmask 517120  }
0x1992   : > { %v10698_v11 = vand.u32 4294901760, %v10627_v7 }
0x1994   : > { %v10699_v15 = vsub.f32 %v10627_v7, %v10698_v11  ;;  %12907 = vmatmul.mubr.f32.vlgmr.msra.gmra.mxu1 %v10698_v11 }
0x1995   : > { %12921 = vmatpush3.msra.mxu1 %v14901_v53  ;;  %12928 = vmatprep.mubr.msk.f32.mxu1 %vm13085_vm1, %v13084_v29 }
0x1996   : > { %12922 = vmatprep.subr.mxu1 %v13084_v29  ;;  %v10700_v49 = vand.u32 4294901760, %v10699_v15 }
0x1997   : > { %12923 = vmatpush3.msra.mxu1 %v14903_v54 }
0x1998   : > { %12924 = vmatprep.subr.mxu1 %v13084_v29  ;;  %v10701_v26 = vsub.f32 %v10699_v15, %v10700_v49 }
0x1999   : > { %12925 = vmatpush3.msra.mxu1 %v14905_v8 }
0x199a   : > { %12926 = vmatprep.subr.mxu1 %v13084_v29  ;;  %v10702_v10 = vand.u32 4294901760, %v10701_v26 }
0x199b   : > { %12927 = vmatpush3.msra.mxu1 %v14911_v16 }
0x199c   : > { %12929 = vmatmul.mubr.f32.vlgmr.msra.gmra.mxu1 %v10700_v49  ;;  %12942 = vmatprep.subr.mxu1 %v13084_v29 }
0x199d   : > { %12896 = vmatmul.mubr.f32.vlgmr.msra.gmra.mxu0 %v10702_v10  ;;  %12943 = vmatpush3.msra.mxu1 %v14901_v53 }
0x199e   : > { %12910 = vmatpush3.msra.mxu0 %v14918_v34  ;;  %12944 = vmatprep.subr.mxu1 %v13084_v29 }
0x199f   : > { %12911 = vmatprep.subr.mxu0 %v13084_v29  ;;  %12945 = vmatpush3.msra.mxu1 %v14903_v54 }
0x19a0   : > { %12912 = vmatpush3.msra.mxu0 %v14921_v0  ;;  %12946 = vmatprep.subr.mxu1 %v13084_v29 }
0x19a1   : > { %12913 = vmatprep.subr.mxu0 %v13084_v29  ;;  %12947 = vmatpush3.msra.mxu1 %v14905_v8 }
0x19a2   : > { %12914 = vmatpush3.msra.mxu0 %v14924_v27  ;;  %12948 = vmatprep.subr.mxu1 %v13084_v29 }
0x19a3   : > { %12915 = vmatprep.subr.mxu0 %v13084_v29  ;;  %12917 = vmatprep.mubr.msk.f32.mxu0 %vm13085_vm1, %v13084_v29 }
0x19a4   : > { %12916 = vmatpush3.msra.mxu0 %v14928_v17  ;;  %12949 = vmatpush3.msra.mxu1 %v14911_v16 }
0x19a5   : > { %12950 = vmatprep.mubr.msk.f32.mxu1 %vm13085_vm1, %v13084_v29  ;;  %12918 = vmatmul.mubr.f32.vlgmr.msra.gmra.mxu0 %v10699_v15 }
0x19a6   : > { %12931 = vmatprep.subr.mxu0 %v13084_v29  ;;  %12951 = vmatmul.mubr.f32.vlgmr.msra.gmra.mxu1 %v10698_v11 }
0x19a7   : > { %12932 = vmatpush3.msra.mxu0 %v10735_v22  ;;  %12939 = vmatprep.mubr.msk.f32.mxu0 %vm13085_vm1, %v13084_v29 }
0x19a8   : > { %12933 = vmatprep.subr.mxu0 %v13084_v29 }
0x19a9   : > { %12934 = vmatpush3.msra.mxu0 %v10742_v23 }
0x19aa   : > { %12935 = vmatprep.subr.mxu0 %v13084_v29 }
0x19ab   : > { %12936 = vmatpush3.msra.mxu0 %v10749_v25 }
0x19ac   : > { %12937 = vmatprep.subr.mxu0 %v13084_v29 }
0x19ad   : > { %12938 = vmatpush3.msra.mxu0 %v10756_v38 }
0x19ae   : > { %12940 = vmatmul.mubr.f32.vlgmr.msra.gmra.mxu0 %v10698_v11 }
0x1a54   : > { %v10795_v35 = vpop.f32.mrf.mxu1 }
0x1a56   : > { %v12908_v47 = vpop.f32.mrf.mxu1 }
0x1a5c   : > { %v10952_v61 = vpop.f32.mrf.mxu1 }
0x1a5d   : > { %v10704_v31 = vpop.f32.mrf.mxu0 }
0x1a5e   : > { %v12930_v37 = vpop.f32.mrf.mxu1  ;;  %v10796_v44 = vadd.f32 %v10795_v35, %v10704_v31 }
0x1a5f   : > { %v12897_v41 = vpop.f32.mrf.mxu0 }
0x1a65   : > { %v10875_v43 = vpop.f32.mrf.mxu0 }
0x1a66   : > { %v11110_v58 = vpop.f32.mrf.mxu1  ;;  %v10876_v1 = vadd.f32 %v10875_v43, %v10796_v44 }
0x1a67   : > { %v12919_v45 = vpop.f32.mrf.mxu0 }
0x1a68   : > { %v12952_v2 = vpop.f32.mrf.mxu1  ;;  %v10953_v9 = vadd.f32 %v10952_v61, %v10876_v1 }
0x1a6e   : > { %v11035_v46 = vpop.f32.mrf.mxu0 }
0x1a6f   : > { %v11036_v48 = vadd.f32 %v11035_v46, %v10953_v9 }
0x1a70   : > { %v12941_v55 = vpop.f32.mrf.mxu0 }
0x1a71   : > { %v11111_v18 = vadd.f32 %v11110_v58, %v11036_v48 }
0x1a73   : > { %11115 = vst.msk [vmem:[#allocation5] sm:$0x3] %vm11114_vm5, %v11111_v18 }
0x1a74 PF: > { %p12958_p6 = scmp.eq.s32.totalorder %s13181_s25, 1  ;;  %s13086_s19 = smov [#allocation5]  }
0x1a75   : > { %s11133_s28 = sshll.u32 %s13086_s19, 4  ;;  %s11134_s28 = int_to_ptr.vmem [resolvable:$true] %s11133_s28 }
0x1a76   : > { %s13031_s14 = scalar_lea.vmem %s11134_s28, 32  ;;  %p13038_p10 = scmp.lt.s32.totalorder %s11134_s28, %s11134_s28 }
0x1a77   : > { %p13032_p7 = scmp.ne.s32.totalorder %s11134_s28, %s13031_s14  ;;  %p13039_p11 = scmp.lt.s32.totalorder %s13031_s14, %s13031_s14 }
0x1a79   : > { %p13033_p8 = pnand %p13032_p7, %p12958_p6  ;;  %p13040_p12 = por %p13039_p11, %p13038_p10 }
0x1a7b   : > { %p13034_p9 = pneg %p13033_p8 }
0x1a7d   : > { %p13041_p13 = pnand %p13040_p12, %p13034_p9 }
0x1a7f   : > { %13044 = shalt.err (!%p13041_p13)
}
0x1a80   : > { %s15062_s29 = sld [smem:[#allocation16_spill]] }
0x1a86   : > { %12955 = dma.vmem_to_hbm [thread:$0]  (%p12958_p6), %s11134_s28, 32, %s15062_s29, [#allocation6]  }
0x1a87   : > { %13060 = dma.done.wait (%p12958_p6), [#allocation6], 32  }
0x1a88   : > { %13062 = vsyncadd (%p12958_p6), [#allocation6], 4294967264 }
0x1a89 PF: > { %s15063_s10 = sld [smem:[#allocation8_spill]] }
0x1a8f   : > { %s29_s24 = sadd.s32 1, %s15063_s10  }
0x1a90   : > { %p26_p0 = scmp.ge.s32.totalorder %s29_s24, 4  }
0x1a92   :  { %28 = sbr.rel (!%p26_p0) target bundleno = 17 (0x11), region = 168 }
0x1a97   :  { %11168 = vsyncpa [#allocation6], 1 }
0x1a98   :  { %11170 = vsyncpa [#allocation6 + $0x1], 1 }

</bundles_post_ra>
